<compile_context>
chip_gen: v7x
topology: tpu7x:2x2x1
jax: 0.10.0
libtpu: 0.0.40
codegen_flags: <defaults>
</compile_context>

<pallas_src>
import jax
import jax.numpy as jnp
from jax import lax
from jax.experimental import pallas as pl
from jax.experimental.pallas import tpu as pltpu

EPS = 1e-5
GROUPS = 32
# MXU input dtype (accumulation is always f32).  Use jnp.float32 on v5e (no bf16 VPU).
MXU_DTYPE = jnp.bfloat16


def _round_up(x, m):
    return (x + m - 1) // m * m


def _pick_rows_per_chunk(h, w, target_lanes=512):
    """Largest row count rc dividing h with rc*w <= target_lanes and >=2 chunks."""
    best = 1
    for rc in range(1, h):
        if h % rc == 0 and rc * w <= target_lanes:
            best = rc
    return best


# ----------------------------- kernel ------------------------------------------

def _make_kernel(Cin, Cout, H, W, RC, PADL, has_shortcut):
    HW = H * W
    CHUNK = RC * W
    NCH = H // RC
    CMAX = max(Cin, Cout)

    def gn_silu(x, gm, gamma, beta):
        """GroupNorm(GROUPS) + SiLU.  x: (C, HW) f32; gm: (C, C) f32 pre-scaled by 1/(HW*cg)."""
        s1 = jnp.sum(x, axis=1, keepdims=True)
        s2 = jnp.sum(x * x, axis=1, keepdims=True)
        stats = jnp.concatenate([s1, s2], axis=1)                       # (C, 2)
        g = jnp.dot(gm, stats, preferred_element_type=jnp.float32)      # [group mean, E[x^2]]
        mean = g[:, 0:1]
        var = jnp.maximum(g[:, 1:2] - mean * mean, 0.0)
        y = (x - mean) * (lax.rsqrt(var + EPS) * gamma) + beta
        # SiLU: exp and the (approximate) reciprocal both run on the EUP.
        return y * pl.reciprocal(1.0 + jnp.exp(-y), approx=True)

    def conv_chunks(hp_ref, cin, w_t, bias, mask_l, mask_r, emit):
        """3x3 same-pad conv: per row-chunk, 9 static-offset tap loads from the
        zero-row-padded scratch + column-edge mask multiplies + one big-K matmul."""
        for c in range(NCH):
            q0 = c * CHUNK                                   # flat output offset of chunk
            base = PADL + q0
            taps = []
            for ky in range(3):
                for kx in range(3):
                    start = base + (ky - 1) * W + (kx - 1)
                    t = hp_ref[:cin, start:start + CHUNK]    # bf16 static-slice load
                    if kx == 0:
                        t = t * mask_l
                    elif kx == 2:
                        t = t * mask_r
                    taps.append(t)
            patches = jnp.concatenate(taps, axis=0)          # (9*cin, CHUNK) bf16
            y = jnp.dot(w_t, patches, preferred_element_type=jnp.float32) + bias
            emit(q0, y)

    def kernel(x_ref, gm1_ref, gm2_ref, cv1_ref, cv2_ref, w1_ref, w2_ref, *rest):
        if has_shortcut:
            wsc_ref, o_ref, hp_ref, h2_ref = rest
        else:
            o_ref, hp_ref, h2_ref = rest

        # Column-edge validity masks: built once, reused by every tap of both convs.
        col = lax.broadcasted_iota(jnp.int32, (1, CHUNK), 1) % W
        mask_l = (col > 0).astype(jnp.float32).astype(MXU_DTYPE)        # dx = -1
        mask_r = (col < W - 1).astype(jnp.float32).astype(MXU_DTYPE)    # dx = +1

        # Zero the row halos once; both convs reuse them.
        zpad = jnp.zeros((CMAX, PADL), MXU_DTYPE)
        hp_ref[:, :PADL] = zpad
        hp_ref[:, PADL + HW:] = zpad

        gam1 = cv1_ref[:, 0:1]; bet1 = cv1_ref[:, 1:2]
        gam2 = cv2_ref[:, 0:1]; bet2 = cv2_ref[:, 1:2]
        b1 = cv2_ref[:, 2:3];   b2 = cv2_ref[:, 3:4]

        x = x_ref[...].astype(jnp.float32)                              # (Cin, HW)
        h = gn_silu(x, gm1_ref[...], gam1, bet1)                        # GN1 + SiLU
        hp_ref[:Cin, PADL:PADL + HW] = h.astype(MXU_DTYPE)              # bf16 early cast

        def emit1(q0, y):                                               # conv1 -> scratch
            h2_ref[:, q0:q0 + CHUNK] = y
        conv_chunks(hp_ref, Cin, w1_ref[...], b1, mask_l, mask_r, emit1)

        h = gn_silu(h2_ref[...], gm2_ref[...], gam2, bet2)              # GN2 + SiLU
        # nn.Dropout: identity at inference.
        # TODO(synk): training-mode dropout needs pltpu.prng_* masking here.
        hp_ref[:Cout, PADL:PADL + HW] = h.astype(MXU_DTYPE)

        if has_shortcut:
            bsc = cv2_ref[:, 4:5]
            wsc = wsc_ref[...]

        def emit2(q0, y):                                               # conv2 + shortcut
            xc = x_ref[:, q0:q0 + CHUNK]
            if has_shortcut:
                sc = jnp.dot(wsc, xc.astype(MXU_DTYPE),
                             preferred_element_type=jnp.float32) + bsc
            else:
                sc = xc.astype(jnp.float32)
            o_ref[:, q0:q0 + CHUNK] = (sc + y).astype(o_ref.dtype)
        conv_chunks(hp_ref, Cout, w2_ref[...], b2, mask_l, mask_r, emit2)

    return kernel


# ----------------------------- wrapper ------------------------------------------

def _group_matrix(C, HW):
    """(C, C) group-sum matrix, pre-scaled by 1/(HW * channels_per_group)."""
    cg = C // GROUPS
    g = jnp.arange(C, dtype=jnp.int32) // cg
    gm = (g[:, None] == g[None, :]).astype(jnp.float32)
    return gm / float(cg * HW)


def resnet_block_forward(x_nchw, params):
    """Inference forward equivalent to PyTorch ResnetBlock.forward (NCHW in/out)."""
    N, Cin, H, W = x_nchw.shape
    Cout = params["w1"].shape[-1]
    HW = H * W
    has_shortcut = Cin != Cout
    assert Cin % GROUPS == 0 and Cout % GROUPS == 0

    RC = _pick_rows_per_chunk(H, W)          # rows per conv chunk (H % RC == 0)
    PADL = _round_up(W + 1, 128)             # lane-aligned row halo on each side
    CMAX = max(Cin, Cout)
    HWP = 2 * PADL + HW

    f32 = jnp.float32
    # channels-first with spatial flattened onto lanes: pure reshape, no transpose
    xf = x_nchw.reshape(N, Cin, HW)

    # im2col weight layout: (Cout, 9*Cin), contraction index = (ky*3+kx)*Cin + ci
    w1t = jnp.transpose(params["w1"], (3, 0, 1, 2)).reshape(Cout, 9 * Cin).astype(MXU_DTYPE)
    w2t = jnp.transpose(params["w2"], (3, 0, 1, 2)).reshape(Cout, 9 * Cout).astype(MXU_DTYPE)

    gm1 = _group_matrix(Cin, HW)
    gm2 = _group_matrix(Cout, HW)

    # packed per-channel vectors (avoid six separately lane-padded (C,1) inputs)
    cv1 = jnp.stack([params["gn1_g"].astype(f32), params["gn1_b"].astype(f32)], axis=1)
    bsc = params["bsc"].astype(f32) if has_shortcut else jnp.zeros((Cout,), f32)
    cv2 = jnp.stack([params["gn2_g"].astype(f32), params["gn2_b"].astype(f32),
                     params["b1"].astype(f32), params["b2"].astype(f32), bsc], axis=1)

    inputs = [xf, gm1, gm2, cv1, cv2, w1t, w2t]
    if has_shortcut:
        inputs.append(jnp.transpose(params["wsc"], (1, 0)).astype(MXU_DTYPE))  # (Cout, Cin)

    def const_spec(a):
        nd = a.ndim
        imap = lambda n: (0,) * nd
        try:
            # loop-invariant operand: single-buffered (no double-buffer VMEM waste)
            return pl.BlockSpec(a.shape, imap, pipeline_mode=pl.Buffered(1))
        except (TypeError, AttributeError):
            return pl.BlockSpec(a.shape, imap)

    in_specs = [pl.BlockSpec((None, Cin, HW), lambda n: (n, 0, 0))]
    in_specs += [const_spec(a) for a in inputs[1:]]

    out = pl.pallas_call(
        _make_kernel(Cin, Cout, H, W, RC, PADL, has_shortcut),
        out_shape=jax.ShapeDtypeStruct((N, Cout, HW), x_nchw.dtype),
        grid=(N,),
        in_specs=in_specs,
        out_specs=pl.BlockSpec((None, Cout, HW), lambda n: (n, 0, 0)),
        scratch_shapes=[
            pltpu.VMEM((CMAX, HWP), MXU_DTYPE),   # zero-row-padded conv input (1-row halo)
            pltpu.VMEM((Cout, HW), f32),          # conv1 output (GN2 input)
        ],
        compiler_params=pltpu.CompilerParams(
            dimension_semantics=("parallel",),     # v7x: one batch element per TensorCore
            vmem_limit_bytes=48 * 1024 * 1024,
        ),
    )(*inputs)
    return out.reshape(N, Cout, H, W)


# ----------------------------- pure-JAX reference --------------------------------

def _ref_forward(x, p, matmul_dtype=jnp.float32):
    """XLA reference; matmul_dtype rounds conv/matmul operands like the kernel's MXU inputs."""

    def gn(h, g, b):
        N, C, H, W = h.shape
        hg = h.reshape(N, GROUPS, -1)
        m = hg.mean(-1, keepdims=True)
        v = hg.var(-1, keepdims=True)
        hn = ((hg - m) / jnp.sqrt(v + EPS)).reshape(N, C, H, W)
        return hn * g[None, :, None, None] + b[None, :, None, None]

    def silu(z):
        return z * jax.nn.sigmoid(z)

    def conv(h, w_hwio, bias, pad):
        w = jnp.transpose(w_hwio, (3, 2, 0, 1)).astype(matmul_dtype)
        y = lax.conv_general_dilated(
            h.astype(matmul_dtype), w, (1, 1), [(pad, pad), (pad, pad)],
            dimension_numbers=("NCHW", "OIHW", "NCHW"),
            preferred_element_type=jnp.float32,
            precision=lax.Precision.HIGHEST)
        return y.astype(jnp.float32) + bias[None, :, None, None]

    h = silu(gn(x, p["gn1_g"], p["gn1_b"]))
    h = conv(h, p["w1"], p["b1"], 1)
    h = silu(gn(h, p["gn2_g"], p["gn2_b"]))
    h = conv(h, p["w2"], p["b2"], 1)
    if "wsc" in p:
        xs = conv(x, p["wsc"].reshape(1, 1, *p["wsc"].shape), p["bsc"], 0)
    else:
        xs = x
    return xs + h


# ----------------------------- main ----------------------------------------------

def _make_params(key, in_c, out_c, with_shortcut):
    ks = jax.random.split(key, 12)
    p = {
        "gn1_g": 1.0 + 0.1 * jax.random.normal(ks[0], (in_c,), jnp.float32),
        "gn1_b": 0.1 * jax.random.normal(ks[1], (in_c,), jnp.float32),
        "w1": 0.05 * jax.random.normal(ks[2], (3, 3, in_c, out_c), jnp.float32),
        "b1": 0.05 * jax.random.normal(ks[3], (out_c,), jnp.float32),
        "gn2_g": 1.0 + 0.1 * jax.random.normal(ks[4], (out_c,), jnp.float32),
        "gn2_b": 0.1 * jax.random.normal(ks[5], (out_c,), jnp.float32),
        "w2": 0.05 * jax.random.normal(ks[6], (3, 3, out_c, out_c), jnp.float32),
        "b2": 0.05 * jax.random.normal(ks[7], (out_c,), jnp.float32),
    }
    if with_shortcut:
        p["wsc"] = 0.05 * jax.random.normal(ks[8], (in_c, out_c), jnp.float32)
        p["bsc"] = 0.05 * jax.random.normal(ks[9], (out_c,), jnp.float32)
    return p, ks[10]


if __name__ == "__main__":
    fwd = jax.jit(resnet_block_forward)

    # Case 1: in_c != out_c (exercises the 1x1-conv shortcut); GroupNorm(32, C) needs C % 32 == 0.
    p1, kx1 = _make_params(jax.random.PRNGKey(0), 32, 64, True)
    x1 = jax.random.normal(kx1, (2, 32, 16, 16), jnp.float32)           # NCHW like PyTorch
    o1 = jax.block_until_ready(fwd(x1, p1))
    assert o1.shape == (2, 64, 16, 16), o1.shape

    # Reference matched to the kernel's MXU input rounding (bf16-in / f32-accumulate).
    # Tolerance accounts for the EUP approx-reciprocal in SiLU and one-pass GN variance.
    r1m = _ref_forward(x1, p1, matmul_dtype=MXU_DTYPE)
    assert jnp.allclose(o1, r1m, atol=2e-2, rtol=2e-2), float(jnp.max(jnp.abs(o1 - r1m)))
    # Loose sanity check vs. the full-f32 reference.
    r1f = _ref_forward(x1, p1, matmul_dtype=jnp.float32)
    assert jnp.allclose(o1, r1f, atol=3e-2, rtol=3e-2), float(jnp.max(jnp.abs(o1 - r1f)))

    # Case 2: in_c == out_c (identity shortcut path).
    p2, kx2 = _make_params(jax.random.PRNGKey(1), 64, 64, False)
    x2 = jax.random.normal(kx2, (2, 64, 16, 16), jnp.float32)
    o2 = jax.block_until_ready(fwd(x2, p2))
    assert o2.shape == (2, 64, 16, 16), o2.shape
    r2m = _ref_forward(x2, p2, matmul_dtype=MXU_DTYPE)
    assert jnp.allclose(o2, r2m, atol=2e-2, rtol=2e-2), float(jnp.max(jnp.abs(o2 - r2m)))

    print("KERNEL_OK")
</pallas_src>

<mosaic_0001>
module attributes {stable_mosaic.version = 11 : i64} {
  func.func @kernel(%arg0: i32, %arg1: memref<1x32x256xf32, #tpu.memory_space<vmem>>, %arg2: memref<32x32xf32, #tpu.memory_space<vmem>>, %arg3: memref<64x64xf32, #tpu.memory_space<vmem>>, %arg4: memref<32x2xf32, #tpu.memory_space<vmem>>, %arg5: memref<64x5xf32, #tpu.memory_space<vmem>>, %arg6: memref<64x288xbf16, #tpu.memory_space<vmem>>, %arg7: memref<64x576xbf16, #tpu.memory_space<vmem>>, %arg8: memref<64x32xbf16, #tpu.memory_space<vmem>>, %arg9: memref<1x64x256xf32, #tpu.memory_space<vmem>>, %arg10: memref<64x512xbf16, #tpu.memory_space<vmem>>, %arg11: memref<64x256xf32, #tpu.memory_space<vmem>>) attributes {dimension_semantics = [#tpu.dimension_semantics<parallel>], iteration_bounds = array<i64: 2>, scalar_prefetch = 0 : i64, scratch_operands = 2 : i64, tpu.core_type = #tpu.core_type<tc>, window_params = [{transform_indices = @transform_0, window_bounds = array<i64: 1, 32, 256>}, {pipeline_mode = #tpu.pipeline_mode<synchronous>, transform_indices = @transform_1, window_bounds = array<i64: 32, 32>}, {pipeline_mode = #tpu.pipeline_mode<synchronous>, transform_indices = @transform_2, window_bounds = array<i64: 64, 64>}, {pipeline_mode = #tpu.pipeline_mode<synchronous>, transform_indices = @transform_3, window_bounds = array<i64: 32, 2>}, {pipeline_mode = #tpu.pipeline_mode<synchronous>, transform_indices = @transform_4, window_bounds = array<i64: 64, 5>}, {pipeline_mode = #tpu.pipeline_mode<synchronous>, transform_indices = @transform_5, window_bounds = array<i64: 64, 288>}, {pipeline_mode = #tpu.pipeline_mode<synchronous>, transform_indices = @transform_6, window_bounds = array<i64: 64, 576>}, {pipeline_mode = #tpu.pipeline_mode<synchronous>, transform_indices = @transform_7, window_bounds = array<i64: 64, 32>}, {transform_indices = @transform_8, window_bounds = array<i64: 1, 64, 256>}]} {
    %0 = tpu.iota {dimensions = array<i32: 1>} : vector<1x128xi32>
    %c16_i32 = arith.constant 16 : i32
    %c0_i32 = arith.constant 0 : i32
    %1 = arith.cmpi eq, %c16_i32, %c0_i32 : i32
    %c1_i32 = arith.constant 1 : i32
    %2 = arith.select %1, %c1_i32, %c16_i32 : i32
    %3 = vector.broadcast %2 : i32 to vector<1x128xi32>
    %4 = arith.remsi %0, %3 : vector<1x128xi32>
    %c0_i32_0 = arith.constant 0 : i32
    %5 = vector.broadcast %c0_i32_0 : i32 to vector<1x128xi32>
    %6 = arith.cmpi ne, %4, %5 : vector<1x128xi32>
    %c0_i32_1 = arith.constant 0 : i32
    %7 = vector.broadcast %c0_i32_1 : i32 to vector<1x128xi32>
    %8 = arith.cmpi slt, %4, %7 : vector<1x128xi32>
    %c0_i32_2 = arith.constant 0 : i32
    %9 = arith.cmpi slt, %2, %c0_i32_2 : i32
    %10 = vector.broadcast %9 : i1 to vector<1x128xi1>
    %11 = vector.broadcast %10 : vector<1x128xi1> to vector<1x128xi1>
    %12 = arith.xori %8, %11 : vector<1x128xi1>
    %13 = arith.andi %12, %6 : vector<1x128xi1>
    %14 = vector.broadcast %2 : i32 to vector<1x128xi32>
    %15 = arith.addi %4, %14 : vector<1x128xi32>
    %16 = arith.select %13, %15, %4 : vector<1x128xi1>, vector<1x128xi32>
    %c0_i32_3 = arith.constant 0 : i32
    %17 = vector.broadcast %c0_i32_3 : i32 to vector<1x128xi32>
    %18 = arith.cmpi sgt, %16, %17 : vector<1x128xi32>
    %19 = arith.extui %18 : vector<1x128xi1> to vector<1x128xi32>
    %20 = arith.sitofp %19 : vector<1x128xi32> to vector<1x128xf32>
    %21 = arith.truncf %20 : vector<1x128xf32> to vector<1x128xbf16>
    %c15_i32 = arith.constant 15 : i32
    %22 = vector.broadcast %c15_i32 : i32 to vector<1x128xi32>
    %23 = arith.cmpi slt, %16, %22 : vector<1x128xi32>
    %24 = arith.extui %23 : vector<1x128xi1> to vector<1x128xi32>
    %25 = arith.sitofp %24 : vector<1x128xi32> to vector<1x128xf32>
    %26 = arith.truncf %25 : vector<1x128xf32> to vector<1x128xbf16>
    %cst = arith.constant 0.000000e+00 : bf16
    %27 = vector.broadcast %cst : bf16 to vector<64x128xbf16>
    %c0 = arith.constant 0 : index
    %c0_4 = arith.constant 0 : index
    %28 = vector.load %arg10[%c0, %c0_4] : memref<64x512xbf16, #tpu.memory_space<vmem>>, vector<64x128xbf16>
    tpu.vector_store %arg10[%c0, %c0_4], %27 {strides = array<i32>} : memref<64x512xbf16, #tpu.memory_space<vmem>>, vector<64x128xbf16>,
    %c0_5 = arith.constant 0 : index
    %c384 = arith.constant 384 : index
    %29 = vector.load %arg10[%c0_5, %c384] : memref<64x512xbf16, #tpu.memory_space<vmem>>, vector<64x128xbf16>
    tpu.vector_store %arg10[%c0_5, %c384], %27 {strides = array<i32>} : memref<64x512xbf16, #tpu.memory_space<vmem>>, vector<64x128xbf16>,
    %c0_6 = arith.constant 0 : index
    %c0_7 = arith.constant 0 : index
    %30 = vector.load %arg4[%c0_6, %c0_7] : memref<32x2xf32, #tpu.memory_space<vmem>>, vector<32x1xf32>
    %c0_8 = arith.constant 0 : index
    %c1 = arith.constant 1 : index
    %31 = vector.load %arg4[%c0_8, %c1] : memref<32x2xf32, #tpu.memory_space<vmem>>, vector<32x1xf32>
    %c0_9 = arith.constant 0 : index
    %c0_10 = arith.constant 0 : index
    %32 = vector.load %arg5[%c0_9, %c0_10] : memref<64x5xf32, #tpu.memory_space<vmem>>, vector<64x1xf32>
    %c0_11 = arith.constant 0 : index
    %c1_12 = arith.constant 1 : index
    %33 = vector.load %arg5[%c0_11, %c1_12] : memref<64x5xf32, #tpu.memory_space<vmem>>, vector<64x1xf32>
    %c0_13 = arith.constant 0 : index
    %c2 = arith.constant 2 : index
    %34 = vector.load %arg5[%c0_13, %c2] : memref<64x5xf32, #tpu.memory_space<vmem>>, vector<64x1xf32>
    %c0_14 = arith.constant 0 : index
    %c3 = arith.constant 3 : index
    %35 = vector.load %arg5[%c0_14, %c3] : memref<64x5xf32, #tpu.memory_space<vmem>>, vector<64x1xf32>
    %c0_15 = arith.constant 0 : index
    %c0_16 = arith.constant 0 : index
    %c0_17 = arith.constant 0 : index
    %36 = vector.load %arg1[%c0_15, %c0_16, %c0_17] : memref<1x32x256xf32, #tpu.memory_space<vmem>>, vector<1x32x256xf32>
    %37 = vector.shape_cast %36 : vector<1x32x256xf32> to vector<32x256xf32>
    %c0_18 = arith.constant 0 : index
    %c0_19 = arith.constant 0 : index
    %38 = vector.load %arg2[%c0_18, %c0_19] : memref<32x32xf32, #tpu.memory_space<vmem>>, vector<32x32xf32>
    %cst_20 = arith.constant dense<0.000000e+00> : vector<32xf32>
    %39 = vector.multi_reduction <add>, %37, %cst_20 [1] : vector<32x256xf32> to vector<32xf32>
    %40 = vector.shape_cast %39 : vector<32xf32> to vector<32x1xf32>
    %41 = arith.mulf %37, %37 : vector<32x256xf32>
    %cst_21 = arith.constant dense<0.000000e+00> : vector<32xf32>
    %42 = vector.multi_reduction <add>, %41, %cst_21 [1] : vector<32x256xf32> to vector<32xf32>
    %43 = vector.shape_cast %42 : vector<32xf32> to vector<32x1xf32>
    %44 = tpu.concatenate %40, %43 in 1 : vector<32x1xf32>, vector<32x1xf32> -> vector<32x2xf32>
    %cst_22 = arith.constant dense<0.000000e+00> : vector<32x2xf32>
    %45 = tpu.matmul %38, %44, %cst_22 {dimension_numbers = #tpu.dot_dimension_numbers<[1], [0], [0], [1], [0, 0, 1, 1], [], []>} : vector<32x32xf32>, vector<32x2xf32>, vector<32x2xf32> -> vector<32x2xf32>
    %46 = vector.extract_strided_slice %45 {offsets = [0, 0], sizes = [32, 1], strides = [1, 1]} : vector<32x2xf32> to vector<32x1xf32>
    %47 = vector.extract_strided_slice %45 {offsets = [0, 1], sizes = [32, 1], strides = [1, 1]} : vector<32x2xf32> to vector<32x1xf32>
    %48 = arith.mulf %46, %46 : vector<32x1xf32>
    %49 = arith.subf %47, %48 : vector<32x1xf32>
    %cst_23 = arith.constant 0.000000e+00 : f32
    %50 = vector.broadcast %cst_23 : f32 to vector<32x1xf32>
    %51 = arith.maximumf %49, %50 : vector<32x1xf32>
    %52 = vector.broadcast %46 : vector<32x1xf32> to vector<32x256xf32>
    %53 = arith.subf %37, %52 : vector<32x256xf32>
    %cst_24 = arith.constant 9.99999974E-6 : f32
    %54 = vector.broadcast %cst_24 : f32 to vector<32x1xf32>
    %55 = arith.addf %51, %54 : vector<32x1xf32>
    %56 = math.rsqrt %55 : vector<32x1xf32>
    %57 = arith.mulf %56, %30 : vector<32x1xf32>
    %58 = vector.broadcast %57 : vector<32x1xf32> to vector<32x256xf32>
    %59 = arith.mulf %53, %58 : vector<32x256xf32>
    %60 = vector.broadcast %31 : vector<32x1xf32> to vector<32x256xf32>
    %61 = arith.addf %59, %60 : vector<32x256xf32>
    %cst_25 = arith.constant 0.000000e+00 : f32
    %62 = vector.broadcast %cst_25 : f32 to vector<32x256xf32>
    %63 = arith.subf %62, %61 : vector<32x256xf32>
    %64 = math.exp %63 : vector<32x256xf32>
    %cst_26 = arith.constant 1.000000e+00 : f32
    %65 = vector.broadcast %cst_26 : f32 to vector<32x256xf32>
    %66 = arith.addf %65, %64 : vector<32x256xf32>
    %67 = tpu.reciprocal %66 {approx = true} : vector<32x256xf32> -> vector<32x256xf32>
    %68 = arith.mulf %61, %67 : vector<32x256xf32>
    %69 = arith.truncf %68 : vector<32x256xf32> to vector<32x256xbf16>
    %c0_27 = arith.constant 0 : index
    %c128 = arith.constant 128 : index
    %70 = vector.load %arg10[%c0_27, %c128] : memref<64x512xbf16, #tpu.memory_space<vmem>>, vector<32x256xbf16>
    tpu.vector_store %arg10[%c0_27, %c128], %69 {strides = array<i32>} : memref<64x512xbf16, #tpu.memory_space<vmem>>, vector<32x256xbf16>,
    %c0_28 = arith.constant 0 : index
    %c0_29 = arith.constant 0 : index
    %71 = vector.load %arg6[%c0_28, %c0_29] : memref<64x288xbf16, #tpu.memory_space<vmem>>, vector<64x288xbf16>
    %c0_30 = arith.constant 0 : index
    %c111 = arith.constant 111 : index
    %72 = vector.load %arg10[%c0_30, %c111] : memref<64x512xbf16, #tpu.memory_space<vmem>>, vector<32x128xbf16>
    %73 = vector.broadcast %21 : vector<1x128xbf16> to vector<32x128xbf16>
    %74 = arith.mulf %72, %73 : vector<32x128xbf16>
    %c0_31 = arith.constant 0 : index
    %c112 = arith.constant 112 : index
    %75 = vector.load %arg10[%c0_31, %c112] : memref<64x512xbf16, #tpu.memory_space<vmem>>, vector<32x128xbf16>
    %c0_32 = arith.constant 0 : index
    %c113 = arith.constant 113 : index
    %76 = vector.load %arg10[%c0_32, %c113] : memref<64x512xbf16, #tpu.memory_space<vmem>>, vector<32x128xbf16>
    %77 = vector.broadcast %26 : vector<1x128xbf16> to vector<32x128xbf16>
    %78 = arith.mulf %76, %77 : vector<32x128xbf16>
    %c0_33 = arith.constant 0 : index
    %c127 = arith.constant 127 : index
    %79 = vector.load %arg10[%c0_33, %c127] : memref<64x512xbf16, #tpu.memory_space<vmem>>, vector<32x128xbf16>
    %80 = vector.broadcast %21 : vector<1x128xbf16> to vector<32x128xbf16>
    %81 = arith.mulf %79, %80 : vector<32x128xbf16>
    %c0_34 = arith.constant 0 : index
    %c128_35 = arith.constant 128 : index
    %82 = vector.load %arg10[%c0_34, %c128_35] : memref<64x512xbf16, #tpu.memory_space<vmem>>, vector<32x128xbf16>
    %c0_36 = arith.constant 0 : index
    %c129 = arith.constant 129 : index
    %83 = vector.load %arg10[%c0_36, %c129] : memref<64x512xbf16, #tpu.memory_space<vmem>>, vector<32x128xbf16>
    %84 = vector.broadcast %26 : vector<1x128xbf16> to vector<32x128xbf16>
    %85 = arith.mulf %83, %84 : vector<32x128xbf16>
    %c0_37 = arith.constant 0 : index
    %c143 = arith.constant 143 : index
    %86 = vector.load %arg10[%c0_37, %c143] : memref<64x512xbf16, #tpu.memory_space<vmem>>, vector<32x128xbf16>
    %87 = vector.broadcast %21 : vector<1x128xbf16> to vector<32x128xbf16>
    %88 = arith.mulf %86, %87 : vector<32x128xbf16>
    %c0_38 = arith.constant 0 : index
    %c144 = arith.constant 144 : index
    %89 = vector.load %arg10[%c0_38, %c144] : memref<64x512xbf16, #tpu.memory_space<vmem>>, vector<32x128xbf16>
    %c0_39 = arith.constant 0 : index
    %c145 = arith.constant 145 : index
    %90 = vector.load %arg10[%c0_39, %c145] : memref<64x512xbf16, #tpu.memory_space<vmem>>, vector<32x128xbf16>
    %91 = vector.broadcast %26 : vector<1x128xbf16> to vector<32x128xbf16>
    %92 = arith.mulf %90, %91 : vector<32x128xbf16>
    %93 = tpu.concatenate %74, %75, %78, %81, %82, %85, %88, %89, %92 in 0 : vector<32x128xbf16>, vector<32x128xbf16>, vector<32x128xbf16>, vector<32x128xbf16>, vector<32x128xbf16>, vector<32x128xbf16>, vector<32x128xbf16>, vector<32x128xbf16>, vector<32x128xbf16> -> vector<288x128xbf16>
    %cst_40 = arith.constant dense<0.000000e+00> : vector<64x128xf32>
    %94 = tpu.matmul %71, %93, %cst_40 {dimension_numbers = #tpu.dot_dimension_numbers<[1], [0], [0], [1], [0, 0, 1, 1], [], []>} : vector<64x288xbf16>, vector<288x128xbf16>, vector<64x128xf32> -> vector<64x128xf32>
    %95 = vector.broadcast %34 : vector<64x1xf32> to vector<64x128xf32>
    %96 = arith.addf %94, %95 : vector<64x128xf32>
    %c0_41 = arith.constant 0 : index
    %c0_42 = arith.constant 0 : index
    %97 = vector.load %arg11[%c0_41, %c0_42] : memref<64x256xf32, #tpu.memory_space<vmem>>, vector<64x128xf32>
    tpu.vector_store %arg11[%c0_41, %c0_42], %96 {strides = array<i32>} : memref<64x256xf32, #tpu.memory_space<vmem>>, vector<64x128xf32>,
    %c0_43 = arith.constant 0 : index
    %c239 = arith.constant 239 : index
    %98 = vector.load %arg10[%c0_43, %c239] : memref<64x512xbf16, #tpu.memory_space<vmem>>, vector<32x128xbf16>
    %99 = vector.broadcast %21 : vector<1x128xbf16> to vector<32x128xbf16>
    %100 = arith.mulf %98, %99 : vector<32x128xbf16>
    %c0_44 = arith.constant 0 : index
    %c240 = arith.constant 240 : index
    %101 = vector.load %arg10[%c0_44, %c240] : memref<64x512xbf16, #tpu.memory_space<vmem>>, vector<32x128xbf16>
    %c0_45 = arith.constant 0 : index
    %c241 = arith.constant 241 : index
    %102 = vector.load %arg10[%c0_45, %c241] : memref<64x512xbf16, #tpu.memory_space<vmem>>, vector<32x128xbf16>
    %103 = vector.broadcast %26 : vector<1x128xbf16> to vector<32x128xbf16>
    %104 = arith.mulf %102, %103 : vector<32x128xbf16>
    %c0_46 = arith.constant 0 : index
    %c255 = arith.constant 255 : index
    %105 = vector.load %arg10[%c0_46, %c255] : memref<64x512xbf16, #tpu.memory_space<vmem>>, vector<32x128xbf16>
    %106 = vector.broadcast %21 : vector<1x128xbf16> to vector<32x128xbf16>
    %107 = arith.mulf %105, %106 : vector<32x128xbf16>
    %c0_47 = arith.constant 0 : index
    %c256 = arith.constant 256 : index
    %108 = vector.load %arg10[%c0_47, %c256] : memref<64x512xbf16, #tpu.memory_space<vmem>>, vector<32x128xbf16>
    %c0_48 = arith.constant 0 : index
    %c257 = arith.constant 257 : index
    %109 = vector.load %arg10[%c0_48, %c257] : memref<64x512xbf16, #tpu.memory_space<vmem>>, vector<32x128xbf16>
    %110 = vector.broadcast %26 : vector<1x128xbf16> to vector<32x128xbf16>
    %111 = arith.mulf %109, %110 : vector<32x128xbf16>
    %c0_49 = arith.constant 0 : index
    %c271 = arith.constant 271 : index
    %112 = vector.load %arg10[%c0_49, %c271] : memref<64x512xbf16, #tpu.memory_space<vmem>>, vector<32x128xbf16>
    %113 = vector.broadcast %21 : vector<1x128xbf16> to vector<32x128xbf16>
    %114 = arith.mulf %112, %113 : vector<32x128xbf16>
    %c0_50 = arith.constant 0 : index
    %c272 = arith.constant 272 : index
    %115 = vector.load %arg10[%c0_50, %c272] : memref<64x512xbf16, #tpu.memory_space<vmem>>, vector<32x128xbf16>
    %c0_51 = arith.constant 0 : index
    %c273 = arith.constant 273 : index
    %116 = vector.load %arg10[%c0_51, %c273] : memref<64x512xbf16, #tpu.memory_space<vmem>>, vector<32x128xbf16>
    %117 = vector.broadcast %26 : vector<1x128xbf16> to vector<32x128xbf16>
    %118 = arith.mulf %116, %117 : vector<32x128xbf16>
    %119 = tpu.concatenate %100, %101, %104, %107, %108, %111, %114, %115, %118 in 0 : vector<32x128xbf16>, vector<32x128xbf16>, vector<32x128xbf16>, vector<32x128xbf16>, vector<32x128xbf16>, vector<32x128xbf16>, vector<32x128xbf16>, vector<32x128xbf16>, vector<32x128xbf16> -> vector<288x128xbf16>
    %cst_52 = arith.constant dense<0.000000e+00> : vector<64x128xf32>
    %120 = tpu.matmul %71, %119, %cst_52 {dimension_numbers = #tpu.dot_dimension_numbers<[1], [0], [0], [1], [0, 0, 1, 1], [], []>} : vector<64x288xbf16>, vector<288x128xbf16>, vector<64x128xf32> -> vector<64x128xf32>
    %121 = vector.broadcast %34 : vector<64x1xf32> to vector<64x128xf32>
    %122 = arith.addf %120, %121 : vector<64x128xf32>
    %c0_53 = arith.constant 0 : index
    %c128_54 = arith.constant 128 : index
    %123 = vector.load %arg11[%c0_53, %c128_54] : memref<64x256xf32, #tpu.memory_space<vmem>>, vector<64x128xf32>
    tpu.vector_store %arg11[%c0_53, %c128_54], %122 {strides = array<i32>} : memref<64x256xf32, #tpu.memory_space<vmem>>, vector<64x128xf32>,
    %c0_55 = arith.constant 0 : index
    %c0_56 = arith.constant 0 : index
    %124 = vector.load %arg11[%c0_55, %c0_56] : memref<64x256xf32, #tpu.memory_space<vmem>>, vector<64x256xf32>
    %c0_57 = arith.constant 0 : index
    %c0_58 = arith.constant 0 : index
    %125 = vector.load %arg3[%c0_57, %c0_58] : memref<64x64xf32, #tpu.memory_space<vmem>>, vector<64x64xf32>
    %cst_59 = arith.constant dense<0.000000e+00> : vector<64xf32>
    %126 = vector.multi_reduction <add>, %124, %cst_59 [1] : vector<64x256xf32> to vector<64xf32>
    %127 = vector.shape_cast %126 : vector<64xf32> to vector<64x1xf32>
    %128 = arith.mulf %124, %124 : vector<64x256xf32>
    %cst_60 = arith.constant dense<0.000000e+00> : vector<64xf32>
    %129 = vector.multi_reduction <add>, %128, %cst_60 [1] : vector<64x256xf32> to vector<64xf32>
    %130 = vector.shape_cast %129 : vector<64xf32> to vector<64x1xf32>
    %131 = tpu.concatenate %127, %130 in 1 : vector<64x1xf32>, vector<64x1xf32> -> vector<64x2xf32>
    %cst_61 = arith.constant dense<0.000000e+00> : vector<64x2xf32>
    %132 = tpu.matmul %125, %131, %cst_61 {dimension_numbers = #tpu.dot_dimension_numbers<[1], [0], [0], [1], [0, 0, 1, 1], [], []>} : vector<64x64xf32>, vector<64x2xf32>, vector<64x2xf32> -> vector<64x2xf32>
    %133 = vector.extract_strided_slice %132 {offsets = [0, 0], sizes = [64, 1], strides = [1, 1]} : vector<64x2xf32> to vector<64x1xf32>
    %134 = vector.extract_strided_slice %132 {offsets = [0, 1], sizes = [64, 1], strides = [1, 1]} : vector<64x2xf32> to vector<64x1xf32>
    %135 = arith.mulf %133, %133 : vector<64x1xf32>
    %136 = arith.subf %134, %135 : vector<64x1xf32>
    %cst_62 = arith.constant 0.000000e+00 : f32
    %137 = vector.broadcast %cst_62 : f32 to vector<64x1xf32>
    %138 = arith.maximumf %136, %137 : vector<64x1xf32>
    %139 = vector.broadcast %133 : vector<64x1xf32> to vector<64x256xf32>
    %140 = arith.subf %124, %139 : vector<64x256xf32>
    %cst_63 = arith.constant 9.99999974E-6 : f32
    %141 = vector.broadcast %cst_63 : f32 to vector<64x1xf32>
    %142 = arith.addf %138, %141 : vector<64x1xf32>
    %143 = math.rsqrt %142 : vector<64x1xf32>
    %144 = arith.mulf %143, %32 : vector<64x1xf32>
    %145 = vector.broadcast %144 : vector<64x1xf32> to vector<64x256xf32>
    %146 = arith.mulf %140, %145 : vector<64x256xf32>
    %147 = vector.broadcast %33 : vector<64x1xf32> to vector<64x256xf32>
    %148 = arith.addf %146, %147 : vector<64x256xf32>
    %cst_64 = arith.constant 0.000000e+00 : f32
    %149 = vector.broadcast %cst_64 : f32 to vector<64x256xf32>
    %150 = arith.subf %149, %148 : vector<64x256xf32>
    %151 = math.exp %150 : vector<64x256xf32>
    %cst_65 = arith.constant 1.000000e+00 : f32
    %152 = vector.broadcast %cst_65 : f32 to vector<64x256xf32>
    %153 = arith.addf %152, %151 : vector<64x256xf32>
    %154 = tpu.reciprocal %153 {approx = true} : vector<64x256xf32> -> vector<64x256xf32>
    %155 = arith.mulf %148, %154 : vector<64x256xf32>
    %156 = arith.truncf %155 : vector<64x256xf32> to vector<64x256xbf16>
    %c0_66 = arith.constant 0 : index
    %c128_67 = arith.constant 128 : index
    %157 = vector.load %arg10[%c0_66, %c128_67] : memref<64x512xbf16, #tpu.memory_space<vmem>>, vector<64x256xbf16>
    tpu.vector_store %arg10[%c0_66, %c128_67], %156 {strides = array<i32>} : memref<64x512xbf16, #tpu.memory_space<vmem>>, vector<64x256xbf16>,
    %c0_68 = arith.constant 0 : index
    %c4 = arith.constant 4 : index
    %158 = vector.load %arg5[%c0_68, %c4] : memref<64x5xf32, #tpu.memory_space<vmem>>, vector<64x1xf32>
    %c0_69 = arith.constant 0 : index
    %c0_70 = arith.constant 0 : index
    %159 = vector.load %arg8[%c0_69, %c0_70] : memref<64x32xbf16, #tpu.memory_space<vmem>>, vector<64x32xbf16>
    %c0_71 = arith.constant 0 : index
    %c0_72 = arith.constant 0 : index
    %160 = vector.load %arg7[%c0_71, %c0_72] : memref<64x576xbf16, #tpu.memory_space<vmem>>, vector<64x576xbf16>
    %c0_73 = arith.constant 0 : index
    %c111_74 = arith.constant 111 : index
    %161 = vector.load %arg10[%c0_73, %c111_74] : memref<64x512xbf16, #tpu.memory_space<vmem>>, vector<64x128xbf16>
    %162 = vector.broadcast %21 : vector<1x128xbf16> to vector<64x128xbf16>
    %163 = arith.mulf %161, %162 : vector<64x128xbf16>
    %c0_75 = arith.constant 0 : index
    %c112_76 = arith.constant 112 : index
    %164 = vector.load %arg10[%c0_75, %c112_76] : memref<64x512xbf16, #tpu.memory_space<vmem>>, vector<64x128xbf16>
    %c0_77 = arith.constant 0 : index
    %c113_78 = arith.constant 113 : index
    %165 = vector.load %arg10[%c0_77, %c113_78] : memref<64x512xbf16, #tpu.memory_space<vmem>>, vector<64x128xbf16>
    %166 = vector.broadcast %26 : vector<1x128xbf16> to vector<64x128xbf16>
    %167 = arith.mulf %165, %166 : vector<64x128xbf16>
    %c0_79 = arith.constant 0 : index
    %c127_80 = arith.constant 127 : index
    %168 = vector.load %arg10[%c0_79, %c127_80] : memref<64x512xbf16, #tpu.memory_space<vmem>>, vector<64x128xbf16>
    %169 = vector.broadcast %21 : vector<1x128xbf16> to vector<64x128xbf16>
    %170 = arith.mulf %168, %169 : vector<64x128xbf16>
    %c0_81 = arith.constant 0 : index
    %c128_82 = arith.constant 128 : index
    %171 = vector.load %arg10[%c0_81, %c128_82] : memref<64x512xbf16, #tpu.memory_space<vmem>>, vector<64x128xbf16>
    %c0_83 = arith.constant 0 : index
    %c129_84 = arith.constant 129 : index
    %172 = vector.load %arg10[%c0_83, %c129_84] : memref<64x512xbf16, #tpu.memory_space<vmem>>, vector<64x128xbf16>
    %173 = vector.broadcast %26 : vector<1x128xbf16> to vector<64x128xbf16>
    %174 = arith.mulf %172, %173 : vector<64x128xbf16>
    %c0_85 = arith.constant 0 : index
    %c143_86 = arith.constant 143 : index
    %175 = vector.load %arg10[%c0_85, %c143_86] : memref<64x512xbf16, #tpu.memory_space<vmem>>, vector<64x128xbf16>
    %176 = vector.broadcast %21 : vector<1x128xbf16> to vector<64x128xbf16>
    %177 = arith.mulf %175, %176 : vector<64x128xbf16>
    %c0_87 = arith.constant 0 : index
    %c144_88 = arith.constant 144 : index
    %178 = vector.load %arg10[%c0_87, %c144_88] : memref<64x512xbf16, #tpu.memory_space<vmem>>, vector<64x128xbf16>
    %c0_89 = arith.constant 0 : index
    %c145_90 = arith.constant 145 : index
    %179 = vector.load %arg10[%c0_89, %c145_90] : memref<64x512xbf16, #tpu.memory_space<vmem>>, vector<64x128xbf16>
    %180 = vector.broadcast %26 : vector<1x128xbf16> to vector<64x128xbf16>
    %181 = arith.mulf %179, %180 : vector<64x128xbf16>
    %182 = tpu.concatenate %163, %164, %167, %170, %171, %174, %177, %178, %181 in 0 : vector<64x128xbf16>, vector<64x128xbf16>, vector<64x128xbf16>, vector<64x128xbf16>, vector<64x128xbf16>, vector<64x128xbf16>, vector<64x128xbf16>, vector<64x128xbf16>, vector<64x128xbf16> -> vector<576x128xbf16>
    %cst_91 = arith.constant dense<0.000000e+00> : vector<64x128xf32>
    %183 = tpu.matmul %160, %182, %cst_91 {dimension_numbers = #tpu.dot_dimension_numbers<[1], [0], [0], [1], [0, 0, 1, 1], [], []>} : vector<64x576xbf16>, vector<576x128xbf16>, vector<64x128xf32> -> vector<64x128xf32>
    %184 = vector.broadcast %35 : vector<64x1xf32> to vector<64x128xf32>
    %185 = arith.addf %183, %184 : vector<64x128xf32>
    %c0_92 = arith.constant 0 : index
    %c0_93 = arith.constant 0 : index
    %c0_94 = arith.constant 0 : index
    %186 = vector.load %arg1[%c0_92, %c0_93, %c0_94] : memref<1x32x256xf32, #tpu.memory_space<vmem>>, vector<1x32x128xf32>
    %187 = vector.shape_cast %186 : vector<1x32x128xf32> to vector<32x128xf32>
    %188 = arith.truncf %187 : vector<32x128xf32> to vector<32x128xbf16>
    %cst_95 = arith.constant dense<0.000000e+00> : vector<64x128xf32>
    %189 = tpu.matmul %159, %188, %cst_95 {dimension_numbers = #tpu.dot_dimension_numbers<[1], [0], [0], [1], [0, 0, 1, 1], [], []>} : vector<64x32xbf16>, vector<32x128xbf16>, vector<64x128xf32> -> vector<64x128xf32>
    %190 = vector.broadcast %158 : vector<64x1xf32> to vector<64x128xf32>
    %191 = arith.addf %189, %190 : vector<64x128xf32>
    %192 = arith.addf %191, %185 : vector<64x128xf32>
    %c0_96 = arith.constant 0 : index
    %c0_97 = arith.constant 0 : index
    %c0_98 = arith.constant 0 : index
    %193 = vector.load %arg9[%c0_96, %c0_97, %c0_98] : memref<1x64x256xf32, #tpu.memory_space<vmem>>, vector<1x64x128xf32>
    %194 = vector.shape_cast %193 : vector<1x64x128xf32> to vector<64x128xf32>
    %195 = vector.shape_cast %192 : vector<64x128xf32> to vector<1x64x128xf32>
    tpu.vector_store %arg9[%c0_96, %c0_97, %c0_98], %195 {strides = array<i32>} : memref<1x64x256xf32, #tpu.memory_space<vmem>>, vector<1x64x128xf32>,
    %c0_99 = arith.constant 0 : index
    %c239_100 = arith.constant 239 : index
    %196 = vector.load %arg10[%c0_99, %c239_100] : memref<64x512xbf16, #tpu.memory_space<vmem>>, vector<64x128xbf16>
    %197 = vector.broadcast %21 : vector<1x128xbf16> to vector<64x128xbf16>
    %198 = arith.mulf %196, %197 : vector<64x128xbf16>
    %c0_101 = arith.constant 0 : index
    %c240_102 = arith.constant 240 : index
    %199 = vector.load %arg10[%c0_101, %c240_102] : memref<64x512xbf16, #tpu.memory_space<vmem>>, vector<64x128xbf16>
    %c0_103 = arith.constant 0 : index
    %c241_104 = arith.constant 241 : index
    %200 = vector.load %arg10[%c0_103, %c241_104] : memref<64x512xbf16, #tpu.memory_space<vmem>>, vector<64x128xbf16>
    %201 = vector.broadcast %26 : vector<1x128xbf16> to vector<64x128xbf16>
    %202 = arith.mulf %200, %201 : vector<64x128xbf16>
    %c0_105 = arith.constant 0 : index
    %c255_106 = arith.constant 255 : index
    %203 = vector.load %arg10[%c0_105, %c255_106] : memref<64x512xbf16, #tpu.memory_space<vmem>>, vector<64x128xbf16>
    %204 = vector.broadcast %21 : vector<1x128xbf16> to vector<64x128xbf16>
    %205 = arith.mulf %203, %204 : vector<64x128xbf16>
    %c0_107 = arith.constant 0 : index
    %c256_108 = arith.constant 256 : index
    %206 = vector.load %arg10[%c0_107, %c256_108] : memref<64x512xbf16, #tpu.memory_space<vmem>>, vector<64x128xbf16>
    %c0_109 = arith.constant 0 : index
    %c257_110 = arith.constant 257 : index
    %207 = vector.load %arg10[%c0_109, %c257_110] : memref<64x512xbf16, #tpu.memory_space<vmem>>, vector<64x128xbf16>
    %208 = vector.broadcast %26 : vector<1x128xbf16> to vector<64x128xbf16>
    %209 = arith.mulf %207, %208 : vector<64x128xbf16>
    %c0_111 = arith.constant 0 : index
    %c271_112 = arith.constant 271 : index
    %210 = vector.load %arg10[%c0_111, %c271_112] : memref<64x512xbf16, #tpu.memory_space<vmem>>, vector<64x128xbf16>
    %211 = vector.broadcast %21 : vector<1x128xbf16> to vector<64x128xbf16>
    %212 = arith.mulf %210, %211 : vector<64x128xbf16>
    %c0_113 = arith.constant 0 : index
    %c272_114 = arith.constant 272 : index
    %213 = vector.load %arg10[%c0_113, %c272_114] : memref<64x512xbf16, #tpu.memory_space<vmem>>, vector<64x128xbf16>
    %c0_115 = arith.constant 0 : index
    %c273_116 = arith.constant 273 : index
    %214 = vector.load %arg10[%c0_115, %c273_116] : memref<64x512xbf16, #tpu.memory_space<vmem>>, vector<64x128xbf16>
    %215 = vector.broadcast %26 : vector<1x128xbf16> to vector<64x128xbf16>
    %216 = arith.mulf %214, %215 : vector<64x128xbf16>
    %217 = tpu.concatenate %198, %199, %202, %205, %206, %209, %212, %213, %216 in 0 : vector<64x128xbf16>, vector<64x128xbf16>, vector<64x128xbf16>, vector<64x128xbf16>, vector<64x128xbf16>, vector<64x128xbf16>, vector<64x128xbf16>, vector<64x128xbf16>, vector<64x128xbf16> -> vector<576x128xbf16>
    %cst_117 = arith.constant dense<0.000000e+00> : vector<64x128xf32>
    %218 = tpu.matmul %160, %217, %cst_117 {dimension_numbers = #tpu.dot_dimension_numbers<[1], [0], [0], [1], [0, 0, 1, 1], [], []>} : vector<64x576xbf16>, vector<576x128xbf16>, vector<64x128xf32> -> vector<64x128xf32>
    %219 = vector.broadcast %35 : vector<64x1xf32> to vector<64x128xf32>
    %220 = arith.addf %218, %219 : vector<64x128xf32>
    %c0_118 = arith.constant 0 : index
    %c0_119 = arith.constant 0 : index
    %c128_120 = arith.constant 128 : index
    %221 = vector.load %arg1[%c0_118, %c0_119, %c128_120] : memref<1x32x256xf32, #tpu.memory_space<vmem>>, vector<1x32x128xf32>
    %222 = vector.shape_cast %221 : vector<1x32x128xf32> to vector<32x128xf32>
    %223 = arith.truncf %222 : vector<32x128xf32> to vector<32x128xbf16>
    %cst_121 = arith.constant dense<0.000000e+00> : vector<64x128xf32>
    %224 = tpu.matmul %159, %223, %cst_121 {dimension_numbers = #tpu.dot_dimension_numbers<[1], [0], [0], [1], [0, 0, 1, 1], [], []>} : vector<64x32xbf16>, vector<32x128xbf16>, vector<64x128xf32> -> vector<64x128xf32>
    %225 = vector.broadcast %158 : vector<64x1xf32> to vector<64x128xf32>
    %226 = arith.addf %224, %225 : vector<64x128xf32>
    %227 = arith.addf %226, %220 : vector<64x128xf32>
    %c0_122 = arith.constant 0 : index
    %c0_123 = arith.constant 0 : index
    %c128_124 = arith.constant 128 : index
    %228 = vector.load %arg9[%c0_122, %c0_123, %c128_124] : memref<1x64x256xf32, #tpu.memory_space<vmem>>, vector<1x64x128xf32>
    %229 = vector.shape_cast %228 : vector<1x64x128xf32> to vector<64x128xf32>
    %230 = vector.shape_cast %227 : vector<64x128xf32> to vector<1x64x128xf32>
    tpu.vector_store %arg9[%c0_122, %c0_123, %c128_124], %230 {strides = array<i32>} : memref<1x64x256xf32, #tpu.memory_space<vmem>>, vector<1x64x128xf32>,
    return
  }
  func.func @transform_0(%arg0: i32) -> (i32, i32, i32) {
    %c0_i32 = arith.constant 0 : i32
    %c0_i32_0 = arith.constant 0 : i32
    %c0_i32_1 = arith.constant 0 : i32
    return %arg0, %c0_i32, %c0_i32_0 : i32, i32, i32
  }
  func.func @transform_1(%arg0: i32) -> (i32, i32) {
    %c0_i32 = arith.constant 0 : i32
    %c0_i32_0 = arith.constant 0 : i32
    %c0_i32_1 = arith.constant 0 : i32
    return %c0_i32, %c0_i32_0 : i32, i32
  }
  func.func @transform_2(%arg0: i32) -> (i32, i32) {
    %c0_i32 = arith.constant 0 : i32
    %c0_i32_0 = arith.constant 0 : i32
    %c0_i32_1 = arith.constant 0 : i32
    return %c0_i32, %c0_i32_0 : i32, i32
  }
  func.func @transform_3(%arg0: i32) -> (i32, i32) {
    %c0_i32 = arith.constant 0 : i32
    %c0_i32_0 = arith.constant 0 : i32
    %c0_i32_1 = arith.constant 0 : i32
    return %c0_i32, %c0_i32_0 : i32, i32
  }
  func.func @transform_4(%arg0: i32) -> (i32, i32) {
    %c0_i32 = arith.constant 0 : i32
    %c0_i32_0 = arith.constant 0 : i32
    %c0_i32_1 = arith.constant 0 : i32
    return %c0_i32, %c0_i32_0 : i32, i32
  }
  func.func @transform_5(%arg0: i32) -> (i32, i32) {
    %c0_i32 = arith.constant 0 : i32
    %c0_i32_0 = arith.constant 0 : i32
    %c0_i32_1 = arith.constant 0 : i32
    return %c0_i32, %c0_i32_0 : i32, i32
  }
  func.func @transform_6(%arg0: i32) -> (i32, i32) {
    %c0_i32 = arith.constant 0 : i32
    %c0_i32_0 = arith.constant 0 : i32
    %c0_i32_1 = arith.constant 0 : i32
    return %c0_i32, %c0_i32_0 : i32, i32
  }
  func.func @transform_7(%arg0: i32) -> (i32, i32) {
    %c0_i32 = arith.constant 0 : i32
    %c0_i32_0 = arith.constant 0 : i32
    %c0_i32_1 = arith.constant 0 : i32
    return %c0_i32, %c0_i32_0 : i32, i32
  }
  func.func @transform_8(%arg0: i32) -> (i32, i32, i32) {
    %c0_i32 = arith.constant 0 : i32
    %c0_i32_0 = arith.constant 0 : i32
    %c0_i32_1 = arith.constant 0 : i32
    return %arg0, %c0_i32, %c0_i32_0 : i32, i32, i32
  }
}

</mosaic_0001>

<bundles_post_ra>
// kernel: resnet_block_forward.1
= control target key start
LH: loop header
LB: loop body
LE: loop exit
PB: predicated region body
PF: predicated region fallthrough
CT: control target
= control target key end

     0   :  { %s4919_s27 = smov 0   ;;  %s7576_s0 = inlined_call_operand.vmem [shape: f32[2,32,256], index: 0, kind: input, shape index: {}]   ;;  %s7577_s1 = inlined_call_operand.vmem [shape: f32[32,32], index: 1, kind: input, shape index: {}]   ;;  %s7578_s2 = inlined_call_operand.vmem [shape: f32[64,64], index: 2, kind: input, shape index: {}]   ;;  %s7579_s3 = inlined_call_operand.vmem [shape: f32[32,2], index: 3, kind: input, shape index: {}]   ;;  %s7580_s4 = inlined_call_operand.vmem [shape: f32[64,5], index: 4, kind: input, shape index: {}]   ;;  %s7581_s5 = inlined_call_operand.vmem [shape: bf16[64,288], index: 5, kind: input, shape index: {}]   ;;  %s7582_s6 = inlined_call_operand.vmem [shape: bf16[64,576], index: 6, kind: input, shape index: {}]   ;;  %s7583_s7 = inlined_call_operand.vmem [shape: bf16[64,32], index: 7, kind: input, shape index: {}]   ;;  %s7584_s8 = inlined_call_operand.vmem [shape: f32[2,64,256], index: 8, kind: output, shape index: {}]  }
   0x1 LB: > { %s4021_s28 = sadd.s32 4294967295, %s4854_s27   ;;  %p4025_p0 = scmp.ge.s32.totalorder %s4854_s27, 1  ;;  %s4854_s27 = sphi %s4919_s27, %s18_s27  }
   0x2   : > { %p262_p1 = scmp.lt.s32.totalorder %s4854_s27, 3 }
   0x4   : > { %p263_p2 = pnand %p4025_p0, %p262_p1 }
   0x6   : > { %266 = sbr.rel (%p263_p2) target bundleno = 2898 (0xb52), region = 52 }
   0xd   : > { %p296_p3 = scmp.lt.s32.totalorder %s4021_s28, 1  ;;  %v357_v24 = vld [vmem:[%s7577_s1] sm:$0xff]  ;;  %vm398_vm0 = vcmask 261120   ;;  %v4990_v25 = vld [vmem:[%s7579_s3 + $0x8] sm:$0xff]  ;;  %s4856_s17 = smov 1   ;;  %v5001_v27 = vld [vmem:[%s7579_s3 + $0x18] sm:$0xff]  ;;  %v307_v47 = vlaneseq }
   0xe   : > { %4420 = vmatprep.mubr.msk.f32.mxu1 %vm398_vm0, %v357_v24  ;;  %v337_v26 = vld [vmem:[%s7579_s3] sm:$0xff]  ;;  %v339_v28 = vld [vmem:[%s7579_s3 + $0x10] sm:$0xff]  ;;  %vm393_vm1 = vcmask 7168   ;;  %v358_v43 = vld [vmem:[%s7577_s1 + $0x8] sm:$0xff]  ;;  %v4857_v46 = vmov 0   ;;  %v7585_v56 = vmov 1  }
   0xf   : > { %s7705_s28 = smov (!%p296_p3, %s4021_s28), 1  ;;  %v359_v44 = vld [vmem:[%s7577_s1 + $0x10] sm:$0xff]  ;;  %v360_v45 = vld [vmem:[%s7577_s1 + $0x18] sm:$0xff]  ;;  %4633 = vset.pattern.permute.xlu1 %v4857_v46  ;;  %4632 = vset.pattern.permute.xlu0 %v4857_v46  ;;  %v308_v52 = vand.u32 127, %v307_v47  ;;  %v4859_v58 = vmov 0.0   ;;  %s4860_s30 = smov 15  }
  0x10   : > { %s4106_s29 = sshll.u32 %s7705_s28, 6  ;;  %s4861_s9 = smov 127   ;;  %vm766_vm4 = vcmask 1039360   ;;  %vm843_vm5 = vcmask 777216   ;;  %vm815_vm6 = vcmask 900096   ;;  %vm858_vm7 = vcmask 769024  }
  0x11   : > { %s4933_s10 = scalar_lea.vmem %s7576_s0, %s4106_s29  ;;  %v313_v55 = vand.u32 15, %v308_v52  ;;  %s4862_s11 = smov 17   ;;  %vm781_vm8 = vcmask 1031168   ;;  %vm830_vm9 = vcmask 785408   ;;  %vm796_vm10 = vcmask 916480  }
  0x12   : > { %v4936_v0 = vld [vmem:[%s4933_s10 + $0x30] sm:$0xff]  ;;  %v4939_v1 = vld [vmem:[%s4933_s10 + $0x38] sm:$0xff]  ;;  %v4942_v2 = vld [vmem:[%s4933_s10] sm:$0xff]  ;;  %s4863_s12 = smov 113   ;;  %s4864_s13 = smov 111   ;;  %vm1033_vm11 = vcmask 138240  }
  0x13   : > { %v370_v3 = vadd.f32 %v4939_v1, %v4936_v0  ;;  %v4947_v4 = vld [vmem:[%s4933_s10 + $0x8] sm:$0xff]  ;;  %v373_v5 = vmul.f32 %v4942_v2, %v4942_v2  ;;  %v4952_v6 = vld [vmem:[%s4933_s10 + $0x10] sm:$0xff]  ;;  %v4955_v7 = vld [vmem:[%s4933_s10 + $0x18] sm:$0xff]  ;;  %v379_v17 = vmul.f32 %v4936_v0, %v4936_v0  ;;  %v380_v18 = vmul.f32 %v4939_v1, %v4939_v1  ;;  %s4865_s14 = smov 126   ;;  %s4866_s15 = smov 110  }
  0x14   : > { %v361_v8 = vadd.f32 %v4947_v4, %v4942_v2  ;;  %v374_v9 = vmul.f32 %v4947_v4, %v4947_v4  ;;  %v375_v10 = vmul.f32 %v4952_v6, %v4952_v6  ;;  %v376_v11 = vmul.f32 %v4955_v7, %v4955_v7  ;;  %v4966_v12 = vld [vmem:[%s4933_s10 + $0x20] sm:$0xff]  ;;  %v4969_v13 = vld [vmem:[%s4933_s10 + $0x28] sm:$0xff]  ;;  %s4867_s16 = smov 112   ;;  %s4868_s18 = smov 96  }
  0x15   : > { %371 = vadd.xlane.f32.xlu1 %v370_v3  ;;  %v364_v15 = vadd.f32 %v4955_v7, %v4952_v6  ;;  %v367_v19 = vadd.f32 %v4969_v13, %v4966_v12  ;;  %v377_v20 = vmul.f32 %v4966_v12, %v4966_v12  ;;  %v378_v21 = vmul.f32 %v4969_v13, %v4969_v13  ;;  %s4869_s19 = smov 94   ;;  %s4870_s20 = smov 95  }
  0x16   : > { %362 = vadd.xlane.f32.xlu0 %v361_v8  ;;  %v381_v14 = vadd.f32 %v374_v9, %v373_v5  ;;  %v384_v16 = vadd.f32 %v376_v11, %v375_v10  ;;  %v390_v22 = vadd.f32 %v380_v18, %v379_v17  ;;  %vm325_vm2 = vcmp.lt.s32.totalorder %v313_v55, 15 }
  0x17   : > { %v387_v23 = vadd.f32 %v378_v21, %v377_v20  ;;  %v4031_v59 = vsel %vm325_vm2, 1.0, %v4859_v58  ;;  %vm321_vm3 = vcmp.gt.s32.totalorder %v313_v55, 0  ;;  %vm1688_vm12 = vcmask 523264  }
  0x18   : > { %v328_v61 = vpack.c.bf16 %v4031_v59, %v4031_v59  ;;  %v4030_v62 = vsel %vm321_vm3, 1.0, %v4859_v58 }
  0x19   : > { %382 = vadd.xlane.f32.xlu1 %v381_v14  ;;  %v324_v63 = vpack.c.bf16 %v4030_v62, %v4030_v62 }
  0x1a   : > { %365 = vadd.xlane.f32.xlu0 %v364_v15 }
  0x1d   : > { %385 = vadd.xlane.f32.xlu1 %v384_v16 }
  0x1e   : > { %368 = vadd.xlane.f32.xlu0 %v367_v19 }
  0x21   : > { %391 = vadd.xlane.f32.xlu1 %v390_v22 }
  0x22   : > { %388 = vadd.xlane.f32.xlu0 %v387_v23 }
  0x32   : > { %566 = vrot.lane.b32.xlu1 %v4990_v25, %s4856_s17 }
  0x36   : > { %570 = vrot.lane.b32.xlu1 %v5001_v27, %s4856_s17 }
  0x38   : > { %564 = vrot.lane.b32.xlu0 %v337_v26, %s4856_s17 }
  0x3c   : > { %568 = vrot.lane.b32.xlu0 %v339_v28, %s4856_s17 }
  0xa2   : > { %v372_v29 = vpop.xlane.xlu1 %371 }
  0xa3   : > { %v363_v30 = vpop.xlane.xlu0 %362 }
  0xa6   : > { %v383_v31 = vpop.xlane.xlu1 %382 }
  0xa7   : > { %v366_v32 = vpop.xlane.xlu0 %365  ;;  %v394_v34 = vsel %vm393_vm1, %v363_v30, %v383_v31 }
  0xaa   : > { %v386_v33 = vpop.xlane.xlu1 %385 }
  0xab   : > { %v395_v35 = vsel %vm393_vm1, %v366_v32, %v386_v33  ;;  %v369_v36 = vpop.xlane.xlu0 %368 }
  0xac   : > { %v4534_v37 = vpack.c.bf16 %v395_v35, %v394_v34 }
  0xae   : > { %v392_v38 = vpop.xlane.xlu1 %391  ;;  %4535 = vmatprep.subr.bf16.mxu1 %v4534_v37 }
  0xaf   : > { %v397_v39 = vsel %vm393_vm1, %v372_v29, %v392_v38  ;;  %v389_v40 = vpop.xlane.xlu0 %388  ;;  %4537 = vmatpush3.bf16.msra.mxu1 %v4534_v37 }
  0xb0   : > { %v396_v41 = vsel %vm393_vm1, %v369_v36, %v389_v40 }
  0xb1   : > { %v4538_v42 = vpack.c.bf16 %v397_v39, %v396_v41 }
  0xb2   : > { %v5056_v3 = vpop.permute.xlu1 %566 }
  0xb3   : > { %4539 = vmatprep.subr.bf16.mxu1 %v4538_v42  ;;  %v565_v5 = vpop.permute.xlu0 %564 }
  0xb4   : > { %4541 = vmatpush3.bf16.msra.mxu1 %v4538_v42 }
  0xb6   : > { %v5058_v8 = vpop.permute.xlu1 %570 }
  0xb7   : > { %4421 = vmatmul.mubr.msk.f32.vlgmr.msra.gmra.mrb[0].mxu1 %vm398_vm0, %v358_v43  ;;  %v5060_v9 = vpop.permute.xlu0 %568 }
  0xb8   : > { %4423 = vmatprep.mubr.msk.f32.mxu1 %vm398_vm0, %v359_v44 }
  0xbb   : > { %4424 = vmatmul.mubr.msk.f32.gmra.mrb[2].mxu1 %vm398_vm0, %v360_v45 }
 0x18a   : > { %v5027_v48 = vpop.f32.mrb[0].mxu1 }
 0x18b   : > { %v497_v49 = vmul.f32 %v5027_v48, %v5027_v48  ;;  %v477_v50 = vpop.f32.mrb[1].mxu1 }
 0x18c   : > { %v496_v51 = vmul.f32 %v477_v50, %v477_v50 }
 0x18d   : > { %506 = vrot.lane.b32.xlu1 %v497_v49, %s4856_s17 }
 0x18e   : > { %504 = vrot.lane.b32.xlu0 %v496_v51, %s4856_s17  ;;  %v5033_v53 = vpop.f32.mrb[2].mxu1 }
 0x18f   : > { %v5035_v54 = vpop.f32.mrb[3].mxu1  ;;  %v499_v57 = vmul.f32 %v5033_v53, %v5033_v53 }
 0x190   : > { %v498_v60 = vmul.f32 %v5035_v54, %v5035_v54 }
 0x191   : > { %531 = vperm.xlu1 %4633, %v5027_v48  }
 0x192   : > { %526 = vperm.xlu0 %4632, %v477_v50  }
 0x195   : > { %536 = vperm.xlu1 %4633, %v5035_v54  }
 0x196   : > { %4634 = vset.pattern.permute.xlu0 %v7585_v56 }
 0x197   : > { %609 = vperm.xlu0 %4634, %v337_v26  }
 0x199   : > { %510 = vrot.lane.b32.xlu1 %v499_v57, %s4856_s17 }
 0x19b   : > { %617 = vperm.xlu0 %4634, %v339_v28  }
 0x19d   : > { %508 = vrot.lane.b32.xlu1 %v498_v60, %s4856_s17 }
 0x19f   : > { %733 = vrot.lane.b32.xlu0 %v328_v61, %s4856_s17 }
 0x1a1   : > { %541 = vperm.xlu1 %4633, %v5033_v53  }
 0x1a3   : > { %740 = vrot.lane.b32.xlu0 %v324_v63, %s4860_s30 }
 0x1a5   : > { %4635 = vset.pattern.permute.xlu1 %v7585_v56 }
 0x1a6   : > { %613 = vperm.xlu1 %4635, %v4990_v25  }
 0x1a7   : > { %724 = vrot.lane.b32.xlu0 %v324_v63, %s4861_s9 }
 0x1aa   : > { %621 = vperm.xlu1 %4635, %v5001_v27  }
 0x1ab   : > { %4637 = vrot.lane.b32.xlu0 %v4857_v46, %s4861_s9 }
 0x1ae   : > { %747 = vrot.lane.b32.xlu1 %v328_v61, %s4862_s11 }
 0x1b2   : > { %717 = vrot.lane.b32.xlu1 %v328_v61, %s4863_s12 }
 0x1b6   : > { %709 = vrot.lane.b32.xlu1 %v324_v63, %s4864_s13 }
 0x1ff   : > { %v507_v10 = vpop.permute.xlu1 %506 }
 0x200   : > { %v505_v14 = vpop.permute.xlu0 %504  ;;  %v517_v37 = vsub.f32 %v5027_v48, %v507_v10 }
 0x201   : > { %v516_v26 = vsub.f32 %v477_v50, %v505_v14 }
 0x202   : > { %v521_v40 = vmax.f32 %v517_v37, 0.0 }
 0x203   : > { %v520_v28 = vmax.f32 %v516_v26, 0.0 }
 0x204   : > { %v553_v45 = vadd.f32 1e-05, %v521_v40 }
 0x205   : > { %v552_v35 = vadd.f32 1e-05, %v520_v28 }
 0x207   : > { %4727 = vrsqrt.f32 %v552_v35 }
 0x210   : > { %v5062_v11 = vpop.permute.xlu1 %531 }
 0x211   : > { %v5066_v16 = vpop.permute.xlu0 %526  ;;  %v4728_v48 = vpop.eup %4727 }
 0x212   : > { %v576_v50 = vmul.f32 %v4728_v48, %v565_v5  ;;  %v545_v26 = vsub.f32 %v4947_v4, %v5066_v16 }
 0x214   : > { %v5064_v15 = vpop.permute.xlu1 %536 }
 0x216   : > { %v5068_v18 = vpop.permute.xlu0 %609 }
 0x218   : > { %v511_v17 = vpop.permute.xlu1 %510 }
 0x219   : > { %v519_v29 = vsub.f32 %v5033_v53, %v511_v17  ;;  %v544_v17 = vsub.f32 %v4942_v2, %v5066_v16  ;;  %v547_v2 = vsub.f32 %v4955_v7, %v5062_v11 }
 0x21a   : > { %v5070_v20 = vpop.permute.xlu0 %617 }
 0x21b   : > { %v523_v36 = vmax.f32 %v519_v29, 0.0 }
 0x21c   : > { %v509_v19 = vpop.permute.xlu1 %508 }
 0x21d   : > { %v555_v38 = vadd.f32 1e-05, %v523_v36  ;;  %v518_v41 = vsub.f32 %v5035_v54, %v509_v19 }
 0x21e   : > { %v5076_v23 = vpop.permute.xlu0 %733 }
 0x21f   : > { %v5097_v33 = vmul.bf16 0, %v5076_v23  ;;  %4729 = vrsqrt.f32 %v555_v38  ;;  %v522_v47 = vmax.f32 %v518_v41, 0.0  ;;  %v546_v41 = vsub.f32 %v4952_v6, %v5062_v11 }
 0x220   : > { %v5072_v21 = vpop.permute.xlu1 %541  ;;  %4731 = vrsqrt.f32 %v553_v45 }
 0x221   : > { %v554_v49 = vadd.f32 1e-05, %v522_v47 }
 0x222   : > { %v5080_v25 = vpop.permute.xlu0 %740 }
 0x223   : > { %v5112_v39 = vmul.bf16 0, %v5080_v25  ;;  %4733 = vrsqrt.f32 %v554_v49 }
 0x225   : > { %v5074_v22 = vpop.permute.xlu1 %613 }
 0x226   : > { %v5087_v31 = vpop.permute.xlu0 %724 }
 0x227   : > { %v5100_v34 = vmul.bf16 0, %v5087_v31 }
 0x229   : > { %v5078_v24 = vpop.permute.xlu1 %621  ;;  %v4730_v51 = vpop.eup %4729 }
 0x22a   : > { %v579_v52 = vmul.f32 %v4730_v51, %v5058_v8  ;;  %v4732_v53 = vpop.eup %4731  ;;  %v5140_v58 = vpop.permute.xlu0 %4637 }
 0x22b   : > { %v577_v54 = vmul.f32 %v4732_v53, %v5056_v3 }
 0x22d   : > { %v5082_v27 = vpop.permute.xlu1 %747  ;;  %v4734_v55 = vpop.eup %4733 }
 0x22e   : > { %v5118_v43 = vmul.bf16 0, %v5082_v27  ;;  %v578_v57 = vmul.f32 %v4734_v55, %v5060_v9 }
 0x231   : > { %v5085_v30 = vpop.permute.xlu1 %717 }
 0x232   : > { %v5090_v32 = vmul.bf16 0, %v5085_v30 }
 0x234   : > { %777 = vrot.lane.b32.xlu0 %v5090_v32, %s4865_s14  ;;  %773 = vrot.lane.b32.xlu1 %v5090_v32, %s4865_s14 }
 0x235   : > { %v5115_v42 = vpop.permute.xlu1 %709 }
 0x236   : > { %v5125_v44 = vmul.bf16 0, %v5115_v42 }
 0x238   : > { %1300 = vrot.lane.b32.xlu0 %v5097_v33, %s4866_s15  ;;  %788 = vrot.lane.b32.xlu1 %v5100_v34, %s4867_s16 }
 0x23c   : > { %1304 = vrot.lane.b32.xlu0 %v5097_v33, %s4866_s15  ;;  %792 = vrot.lane.b32.xlu1 %v5100_v34, %s4867_s16 }
 0x240   : > { %1314 = vrot.lane.b32.xlu0 %v5112_v39, %s4868_s18  ;;  %1340 = vrot.lane.b32.xlu1 %v5118_v43, %s4869_s19 }
 0x244   : > { %1318 = vrot.lane.b32.xlu0 %v5112_v39, %s4868_s18  ;;  %969 = vrot.lane.b32.xlu1 %v5125_v44, %s4862_s11 }
 0x248   : > { %4642 = vrot.lane.b32.xlu0 %v4857_v46, %s4870_s20  ;;  %582 = vperm.xlu1 %4635, %v576_v50  }
 0x24c   : > { %965 = vrot.lane.b32.xlu0 %v5125_v44, %s4862_s11  ;;  %597 = vperm.xlu1 %4635, %v579_v52  }
 0x250   : > { %1344 = vrot.lane.b32.xlu0 %v5118_v43, %s4869_s19 }
 0x254   : > { %587 = vperm.xlu0 %4634, %v577_v54  }
 0x258   : > { %592 = vperm.xlu0 %4634, %v578_v57  }
 0x2a6   : > { %v5142_v59 = vpop.permute.xlu0 %777  ;;  %v5146_v61 = vpop.permute.xlu1 %773 }
 0x2aa   : > { %v5144_v60 = vpop.permute.xlu0 %1300  ;;  %v5150_v63 = vpop.permute.xlu1 %788 }
 0x2ae   : > { %v5148_v62 = vpop.permute.xlu0 %1304  ;;  %v5154_v3 = vpop.permute.xlu1 %792 }
 0x2b2   : > { %v5152_v5 = vpop.permute.xlu0 %1314  ;;  %v5158_v9 = vpop.permute.xlu1 %1340 }
 0x2b6   : > { %v5156_v8 = vpop.permute.xlu0 %1318  ;;  %v5162_v14 = vpop.permute.xlu1 %969 }
 0x2ba   : > { %v5160_v10 = vpop.permute.xlu0 %4642 }
 0x2be   : > { %v5168_v29 = vpop.permute.xlu0 %965 }
 0x2c2   : > { %v5172_v40 = vpop.permute.xlu0 %1344 }
 0x2c7   : > { %v583_v19 = vpop.permute.xlu1 %582 }
 0x2c8   : > { %v600_v28 = vmul.f32 %v583_v19, %v544_v17  ;;  %v601_v35 = vmul.f32 %v583_v19, %v545_v26 }
 0x2ca   : > { %v624_v36 = vadd.f32 %v5068_v18, %v600_v28  ;;  %v625_v37 = vadd.f32 %v5068_v18, %v601_v35  ;;  %v548_v35 = vsub.f32 %v4966_v12, %v5064_v15 }
 0x2cc   : > { %v632_v38 = vsub.f32 0.0, %v624_v36  ;;  %v633_v45 = vsub.f32 0.0, %v625_v37 }
 0x2ce   : > { %v640_v47 = vmul.f32 1.442695, %v632_v38  ;;  %v642_v49 = vmul.f32 1.442695, %v633_v45 }
 0x2d0   : > { %4735 = vpow2.f32 %v640_v47 }
 0x2d1   : > { %4737 = vpow2.f32 %v642_v49  ;;  %v549_v49 = vsub.f32 %v4969_v13, %v5064_v15 }
 0x2d3   : > { %v588_v4 = vpop.permute.xlu0 %587 }
 0x2d4   : > { %v602_v16 = vmul.f32 %v588_v4, %v546_v41  ;;  %v603_v48 = vmul.f32 %v588_v4, %v547_v2  ;;  %v598_v41 = vpop.permute.xlu1 %597  ;;  %v550_v2 = vsub.f32 %v4936_v0, %v5072_v21 }
 0x2d6   : > { %v626_v50 = vadd.f32 %v5074_v22, %v602_v16  ;;  %v627_v18 = vadd.f32 %v5074_v22, %v603_v48 }
 0x2d7   : > { %v593_v28 = vpop.permute.xlu0 %592 }
 0x2d8   : > { %v634_v51 = vsub.f32 0.0, %v626_v50  ;;  %v635_v52 = vsub.f32 0.0, %v627_v18  ;;  %v604_v4 = vmul.f32 %v593_v28, %v548_v35 }
 0x2da   : > { %v644_v53 = vmul.f32 1.442695, %v634_v51  ;;  %v646_v54 = vmul.f32 1.442695, %v635_v52  ;;  %v4736_v6 = vpop.eup %4735  ;;  %v606_v51 = vmul.f32 %v598_v41, %v550_v2 }
 0x2db   : > { %v656_v7 = vadd.f32 1.0, %v4736_v6  ;;  %v4738_v11 = vpop.eup %4737  ;;  %v605_v6 = vmul.f32 %v593_v28, %v549_v49 }
 0x2dc   : > { %4739 = vpow2.f32 %v644_v53  ;;  %v657_v57 = vadd.f32 1.0, %v4738_v11  ;;  %v551_v53 = vsub.f32 %v4939_v1, %v5072_v21  ;;  %v5198_v13 = vadd.f32 %v5078_v24, %v606_v51 }
 0x2dd   : > { %4741 = vpow2.f32 %v646_v54  ;;  %v5203_v1 = vadd.f32 %v5070_v20, %v605_v6 }
 0x2de   : > { %4743 = vrcp.f32 %v656_v7  ;;  %v5191_v7 = vadd.f32 %v5070_v20, %v604_v4  ;;  %v607_v0 = vmul.f32 %v598_v41, %v551_v53 }
 0x2e0   : > { %v636_v21 = vsub.f32 0.0, %v5191_v7 }
 0x2e6   : > { %v4740_v55 = vpop.eup %4739 }
 0x2e7   : > { %v658_v17 = vadd.f32 1.0, %v4740_v55  ;;  %v4742_v19 = vpop.eup %4741 }
 0x2e8   : > { %v659_v26 = vadd.f32 1.0, %v4742_v19  ;;  %v4744_v22 = vpop.eup %4743 }
 0x2e9   : > { %4745 = vrcp.f32 %v658_v17  ;;  %v672_v45 = vmul.f32 %v4744_v22, %v624_v36  ;;  %v5211_v36 = vadd.f32 %v5078_v24, %v607_v0 }
 0x2ea   : > { %4747 = vrcp.f32 %v657_v57 }
 0x2eb   : > { %4749 = vrcp.f32 %v659_v26  ;;  %v639_v20 = vsub.f32 0.0, %v5211_v36 }
 0x2ed   : > { %v654_v57 = vmul.f32 1.442695, %v639_v20 }
 0x2f3   : > { %v4746_v38 = vpop.eup %4745 }
 0x2f4   : > { %v674_v47 = vmul.f32 %v4746_v38, %v626_v50  ;;  %v4748_v16 = vpop.eup %4747  ;;  %v637_v50 = vsub.f32 0.0, %v5203_v1 }
 0x2f5   : > { %v4750_v48 = vpop.eup %4749  ;;  %v673_v54 = vmul.f32 %v4748_v16, %v625_v37  ;;  %v638_v37 = vsub.f32 0.0, %v5198_v13 }
 0x2f6   : > { %v5186_v52 = vpack.c.bf16 %v674_v47, %v672_v45  ;;  %v675_v12 = vmul.f32 %v4750_v48, %v627_v18  ;;  %v648_v18 = vmul.f32 1.442695, %v636_v21  ;;  %v650_v24 = vmul.f32 1.442695, %v637_v50 }
 0x2f7   : > { %v652_v11 = vmul.f32 1.442695, %v638_v37 }
 0x2f8   : > { %760 = vrot.lane.b32.xlu1 %v5186_v52, %s4861_s9  ;;  %799 = vrot.lane.b32.xlu0 %v5186_v52, %s4864_s13  ;;  %v5200_v15 = vpack.c.bf16 %v675_v12, %v673_v54  ;;  %v736_v55 = vmul.bf16 %v5076_v23, %v5186_v52  ;;  %4751 = vpow2.f32 %v648_v18  ;;  %v750_v17 = vmul.bf16 %v5082_v27, %v5186_v52 }
 0x2f9   : > { %4753 = vpow2.f32 %v652_v11  ;;  %v721_v35 = vmul.bf16 %v5085_v30, %v5186_v52  ;;  %v743_v45 = vmul.bf16 %v5080_v25, %v5186_v52  ;;  %v728_v47 = vmul.bf16 %v5087_v31, %v5186_v52 }
 0x2fa   : > { %4755 = vpow2.f32 %v650_v24  ;;  %v737_v19 = vmul.bf16 %v5076_v23, %v5200_v15  ;;  %v744_v26 = vmul.bf16 %v5080_v25, %v5200_v15  ;;  %v751_v28 = vmul.bf16 %v5082_v27, %v5200_v15 }
 0x2fb   : > { %4757 = vpow2.f32 %v654_v57  ;;  %v1227_v49 = vmul.bf16 %v5085_v30, %v5200_v15  ;;  %v1231_v53 = vmul.bf16 %v5087_v31, %v5200_v15  ;;  %v713_v0 = vmul.bf16 %v5115_v42, %v5186_v52 }
 0x2fc   : > { %1290 = vrot.lane.b32.xlu1 %v5200_v15, %s4864_s13  ;;  %837 = vrot.lane.b32.xlu0 %v5200_v15, %s4870_s20 }
 0x300   : > { %835 = vrot.lane.b32.xlu1 %v5186_v52, %s4870_s20  ;;  %1254 = vrot.lane.b32.xlu0 %v5200_v15, %s4861_s9 }
 0x302   : > { %v4752_v22 = vpop.eup %4751 }
 0x303   : > { %v4754_v38 = vpop.eup %4753  ;;  %v660_v41 = vadd.f32 1.0, %v4752_v22 }
 0x304   : > { %1252 = vrot.lane.b32.xlu1 %v5186_v52, %s4861_s9  ;;  %807 = vrot.lane.b32.xlu0 %v736_v55, %s4866_s15  ;;  %v4756_v2 = vpop.eup %4755  ;;  %v662_v4 = vadd.f32 1.0, %v4754_v38  ;;  %v1223_v52 = vmul.bf16 %v5115_v42, %v5200_v15 }
 0x305   : > { %v4758_v16 = vpop.eup %4757  ;;  %v661_v48 = vadd.f32 1.0, %v4756_v2  ;;  %4759 = vrcp.f32 %v660_v41 }
 0x306   : > { %v663_v51 = vadd.f32 1.0, %v4758_v16  ;;  %4761 = vrcp.f32 %v662_v4  ;;  %v4639_v4 = vunpack.i.l.bf16 %v5140_v58 }
 0x307   : > { %4763 = vrcp.f32 %v661_v48 }
 0x308   : > { %1324 = vrot.lane.b32.xlu1 %v5200_v15, %s4870_s20  ;;  %850 = vrot.lane.b32.xlu0 %v750_v17, %s4869_s19  ;;  %4765 = vrcp.f32 %v663_v51 }
 0x30c   : > { %809 = vrot.lane.b32.xlu1 %v737_v19, %s4866_s15  ;;  %824 = vrot.lane.b32.xlu0 %v744_v26, %s4868_s18 }
 0x30f   : > { %v4760_v12 = vpop.eup %4759 }
 0x310   : > { %852 = vrot.lane.b32.xlu1 %v751_v28, %s4869_s19  ;;  %775 = vrot.lane.b32.xlu0 %v721_v35, %s4865_s14  ;;  %v4762_v54 = vpop.eup %4761  ;;  %v676_v6 = vmul.f32 %v4760_v12, %v5191_v7 }
 0x311   : > { %v4764_v21 = vpop.eup %4763  ;;  %v678_v37 = vmul.f32 %v4762_v54, %v5198_v13 }
 0x312   : > { %v4766_v50 = vpop.eup %4765  ;;  %v677_v18 = vmul.f32 %v4764_v21, %v5203_v1 }
 0x313   : > { %v682_v20 = vpack.c.bf16 %v678_v37, %v676_v6  ;;  %v679_v11 = vmul.f32 %v4766_v50, %v5211_v36 }
 0x314   : > { %822 = vrot.lane.b32.xlu1 %v743_v45, %s4868_s18  ;;  %790 = vrot.lane.b32.xlu0 %v728_v47, %s4867_s16 }
 0x315   : > { %v683_v7 = vpack.c.bf16 %v679_v11, %v677_v18  ;;  %v738_v13 = vmul.bf16 %v5076_v23, %v682_v20  ;;  %v752_v15 = vmul.bf16 %v5082_v27, %v682_v20  ;;  %v745_v36 = vmul.bf16 %v5080_v25, %v682_v20 }
 0x316   : > { %v730_v24 = vmul.bf16 %v5087_v31, %v682_v20 }
 0x317   : > { %v739_v1 = vmul.bf16 %v5076_v23, %v683_v7  ;;  %v753_v55 = vmul.bf16 %v5082_v27, %v683_v7  ;;  %v746_v57 = vmul.bf16 %v5080_v25, %v683_v7  ;;  %v1229_v17 = vmul.bf16 %v5085_v30, %v683_v7 }
 0x318   : > { %1298 = vrot.lane.b32.xlu1 %v737_v19, %s4866_s15  ;;  %1268 = vrot.lane.b32.xlu0 %v1227_v49, %s4865_s14  ;;  %v723_v19 = vmul.bf16 %v5085_v30, %v682_v20  ;;  %v1225_v22 = vmul.bf16 %v5115_v42, %v683_v7 }
 0x31c   : > { %1312 = vrot.lane.b32.xlu1 %v744_v26, %s4868_s18  ;;  %1282 = vrot.lane.b32.xlu0 %v1231_v53, %s4867_s16  ;;  %v715_v26 = vmul.bf16 %v5115_v42, %v682_v20 }
 0x320   : > { %1266 = vrot.lane.b32.xlu1 %v721_v35, %s4865_s14  ;;  %1338 = vrot.lane.b32.xlu0 %v751_v28, %s4869_s19  ;;  %v1233_v28 = vmul.bf16 %v5087_v31, %v683_v7 }
 0x324   : > { %1280 = vrot.lane.b32.xlu1 %v728_v47, %s4867_s16  ;;  %1352 = vrot.lane.b32.xlu0 %v713_v0, %s4862_s11 }
 0x328   : > { %967 = vrot.lane.b32.xlu1 %v713_v0, %s4862_s11  ;;  %764 = vrot.lane.b32.xlu0 %v682_v20, %s4861_s9 }
 0x32c   : > { %1354 = vrot.lane.b32.xlu1 %v1223_v52, %s4862_s11  ;;  %1292 = vrot.lane.b32.xlu0 %v683_v7, %s4864_s13 }
 0x330   : > { %841 = vrot.lane.b32.xlu0 %v683_v7, %s4870_s20  ;;  %801 = vrot.lane.b32.xlu1 %v682_v20, %s4864_s13 }
 0x334   : > { %1258 = vrot.lane.b32.xlu0 %v683_v7, %s4861_s9  ;;  %839 = vrot.lane.b32.xlu1 %v682_v20, %s4870_s20 }
 0x338   : > { %1256 = vrot.lane.b32.xlu1 %v682_v20, %s4861_s9  ;;  %811 = vrot.lane.b32.xlu0 %v738_v13, %s4866_s15 }
 0x33c   : > { %1328 = vrot.lane.b32.xlu1 %v683_v7, %s4870_s20  ;;  %854 = vrot.lane.b32.xlu0 %v752_v15, %s4869_s19 }
 0x340   : > { %813 = vrot.lane.b32.xlu1 %v739_v1, %s4866_s15  ;;  %826 = vrot.lane.b32.xlu0 %v745_v36, %s4868_s18 }
 0x344   : > { %856 = vrot.lane.b32.xlu1 %v753_v55, %s4869_s19  ;;  %794 = vrot.lane.b32.xlu0 %v730_v24, %s4867_s16 }
 0x348   : > { %828 = vrot.lane.b32.xlu1 %v746_v57, %s4868_s18  ;;  %1272 = vrot.lane.b32.xlu0 %v1229_v17, %s4865_s14 }
 0x34c   : > { %1284 = vrot.lane.b32.xlu0 %v730_v24, %s4867_s16  ;;  %779 = vrot.lane.b32.xlu1 %v723_v19, %s4865_s14 }
 0x350   : > { %1302 = vrot.lane.b32.xlu1 %v739_v1, %s4866_s15  ;;  %971 = vrot.lane.b32.xlu0 %v715_v26, %s4862_s11 }
 0x354   : > { %1316 = vrot.lane.b32.xlu1 %v746_v57, %s4868_s18  ;;  %1358 = vrot.lane.b32.xlu0 %v1225_v22, %s4862_s11 }
 0x358   : > { %1270 = vrot.lane.b32.xlu1 %v723_v19, %s4865_s14 }
 0x35c   : > { %1286 = vrot.lane.b32.xlu1 %v1233_v28, %s4867_s16 }
 0x360   : > { %1342 = vrot.lane.b32.xlu1 %v753_v55, %s4869_s19 }
 0x364   : > { %1356 = vrot.lane.b32.xlu1 %v715_v26, %s4862_s11 }
 0x36a   : > { %v761_v35 = vpop.permute.xlu1 %760  ;;  %v800_v38 = vpop.permute.xlu0 %799 }
 0x36b   : > { %975 = vrot.lane.b32.xlu1 %v761_v35, %s4862_s11  ;;  %997 = vrot.lane.b32.xlu0 %v800_v38, %s4862_s11  ;;  %v767_v51 = vsel %vm766_vm4, %v4639_v4, %v761_v35 }
 0x36e   : > { %v1291_v41 = vpop.permute.xlu1 %1290  ;;  %v838_v2 = vpop.permute.xlu0 %837 }
 0x36f   : > { %1384 = vrot.lane.b32.xlu0 %v1291_v41, %s4862_s11 }
 0x372   : > { %v836_v45 = vpop.permute.xlu1 %835  ;;  %v1255_v47 = vpop.permute.xlu0 %1254 }
 0x373   : > { %1017 = vrot.lane.b32.xlu0 %v836_v45, %s4862_s11  ;;  %1362 = vrot.lane.b32.xlu1 %v1255_v47, %s4862_s11  ;;  %v844_v49 = vsel %vm843_vm5, %v836_v45, %v838_v2 }
 0x376   : > { %v1253_v16 = vpop.permute.xlu1 %1252  ;;  %v808_v48 = vpop.permute.xlu0 %807 }
 0x377   : > { %1019 = vrot.lane.b32.xlu1 %v844_v49, %s4862_s11  ;;  %973 = vrot.lane.b32.xlu0 %v767_v51, %s4862_s11  ;;  %v1260_v53 = vsel %vm766_vm4, %v1253_v16, %v1255_v47  ;;  %v4640_v47 = vunpack.i.h.bf16 %v5140_v58 }
 0x37a   : > { %v5319_v12 = vpop.permute.xlu1 %1324  ;;  %v851_v54 = vpop.permute.xlu0 %850 }
 0x37b   : > { %1360 = vrot.lane.b32.xlu0 %v1260_v53, %s4862_s11 }
 0x37e   : > { %v810_v6 = vpop.permute.xlu1 %809  ;;  %v825_v0 = vpop.permute.xlu0 %824 }
 0x37f   : > { %1001 = vrot.lane.b32.xlu0 %v808_v48, %s4862_s11  ;;  %v816_v20 = vsel %vm815_vm6, %v808_v48, %v810_v6 }
 0x382   : > { %v853_v21 = vpop.permute.xlu1 %852  ;;  %v776_v37 = vpop.permute.xlu0 %775 }
 0x383   : > { %983 = vrot.lane.b32.xlu1 %v776_v37, %s4862_s11  ;;  %1025 = vrot.lane.b32.xlu0 %v851_v54, %s4862_s11  ;;  %v859_v52 = vsel %vm858_vm7, %v851_v54, %v853_v21  ;;  %v782_v24 = vsel %vm781_vm8, %v5146_v61, %v776_v37  ;;  %v5385_v37 = vld [vmem:[%s7581_s5 + $0x8] ss:$12 sps:$4 sm:$0xff]  }
 0x384   : > { %4430 = vmatprep.mubr.msk.bf16.mxu0 %vm398_vm0, %v5385_v37 }
 0x386   : > { %v823_v50 = vpop.permute.xlu1 %822  ;;  %v791_v18 = vpop.permute.xlu0 %790 }
 0x387   : > { %991 = vrot.lane.b32.xlu1 %v791_v18, %s4862_s11  ;;  %1009 = vrot.lane.b32.xlu0 %v823_v50, %s4862_s11  ;;  %v831_v55 = vsel %vm830_vm9, %v823_v50, %v825_v0  ;;  %v797_v26 = vsel %vm796_vm10, %v5150_v63, %v791_v18 }
 0x38a   : > { %v1299_v11 = vpop.permute.xlu1 %1298  ;;  %v5328_v7 = vpop.permute.xlu0 %1268 }
 0x38b   : > { %1003 = vrot.lane.b32.xlu1 %v816_v20, %s4862_s11  ;;  %1388 = vrot.lane.b32.xlu0 %v1299_v11, %s4862_s11  ;;  %v1306_v19 = vsel %vm815_vm6, %v1299_v11, %v5144_v60 }
 0x38e   : > { %v1313_v13 = vpop.permute.xlu1 %1312  ;;  %v5333_v15 = vpop.permute.xlu0 %1282 }
 0x38f   : > { %1027 = vrot.lane.b32.xlu1 %v859_v52, %s4862_s11  ;;  %1396 = vrot.lane.b32.xlu0 %v1313_v13, %s4862_s11  ;;  %v1320_v35 = vsel %vm830_vm9, %v1313_v13, %v5152_v5 }
 0x392   : > { %v1267_v1 = vpop.permute.xlu1 %1266  ;;  %v5337_v36 = vpop.permute.xlu0 %1338 }
 0x393   : > { %1011 = vrot.lane.b32.xlu1 %v831_v55, %s4862_s11  ;;  %981 = vrot.lane.b32.xlu0 %v782_v24, %s4862_s11  ;;  %v1274_v61 = vsel %vm781_vm8, %v1267_v1, %v5328_v7  ;;  %v5404_v55 = vld [vmem:[%s7581_s5 + $0x4] ss:$12 sps:$4 sm:$0xff]  }
 0x394   : > { %1112 = vmatprep.mubr.bf16.mxu1 %v5404_v55 }
 0x396   : > { %v5344_v57 = vpop.permute.xlu1 %1280  ;;  %v5346_v17 = vpop.permute.xlu0 %1352 }
 0x397   : > { %1390 = vrot.lane.b32.xlu1 %v1306_v19, %s4862_s11  ;;  %989 = vrot.lane.b32.xlu0 %v797_v26, %s4862_s11 }
 0x39a   : > { %v5356_v22 = vpop.permute.xlu1 %967  ;;  %v765_v28 = vpop.permute.xlu0 %764 }
 0x39b   : > { %1398 = vrot.lane.b32.xlu1 %v1320_v35, %s4862_s11  ;;  %1368 = vrot.lane.b32.xlu0 %v1274_v61, %s4862_s11  ;;  %v768_v16 = vsel %vm766_vm4, %v4640_v47, %v765_v28  ;;  %v1288_v35 = vsel %vm796_vm10, %v5344_v57, %v5333_v15 }
 0x39e   : > { %v5362_v60 = vpop.permute.xlu1 %1354  ;;  %v1293_v63 = vpop.permute.xlu0 %1292 }
 0x3a2   : > { %v802_v38 = vpop.permute.xlu1 %801  ;;  %v842_v41 = vpop.permute.xlu0 %841 }
 0x3a3   : > { %999 = vrot.lane.b32.xlu1 %v802_v38, %s4862_s11 }
 0x3a6   : > { %v840_v2 = vpop.permute.xlu1 %839  ;;  %v1259_v45 = vpop.permute.xlu0 %1258 }
 0x3a7   : > { %979 = vrot.lane.b32.xlu1 %v765_v28, %s4862_s11  ;;  %1021 = vrot.lane.b32.xlu0 %v840_v2, %s4862_s11  ;;  %v845_v58 = vsel %vm843_vm5, %v840_v2, %v842_v41 }
 0x3aa   : > { %v1257_v5 = vpop.permute.xlu1 %1256  ;;  %v812_v4 = vpop.permute.xlu0 %811 }
 0x3ab   : > { %1386 = vrot.lane.b32.xlu1 %v1293_v63, %s4862_s11  ;;  %977 = vrot.lane.b32.xlu0 %v768_v16, %s4862_s11  ;;  %v1261_v48 = vsel %vm766_vm4, %v1257_v5, %v1259_v45 }
 0x3ae   : > { %v5372_v49 = vpop.permute.xlu1 %1328  ;;  %v855_v51 = vpop.permute.xlu0 %854 }
 0x3af   : > { %1366 = vrot.lane.b32.xlu1 %v1259_v45, %s4862_s11  ;;  %1364 = vrot.lane.b32.xlu0 %v1261_v48, %s4862_s11  ;;  %v4645_v45 = vunpack.i.h.bf16 %v5160_v10 }
 0x3b1   : > { %v1333_v47 = vsel %vm843_vm5, %v5372_v49, %v4645_v45 }
 0x3b2   : > { %v814_v53 = vpop.permute.xlu1 %813  ;;  %v827_v54 = vpop.permute.xlu0 %826 }
 0x3b3   : > { %1023 = vrot.lane.b32.xlu1 %v845_v58, %s4862_s11  ;;  %1005 = vrot.lane.b32.xlu0 %v812_v4, %s4862_s11  ;;  %v817_v50 = vsel %vm815_vm6, %v812_v4, %v814_v53  ;;  %v1346_v4 = vsel %vm858_vm7, %v5337_v36, %v5158_v9  ;;  %v5476_v9 = vld [vmem:[%s7580_s4] sm:$0xff] }
 0x3b6   : > { %v857_v6 = vpop.permute.xlu1 %856  ;;  %v795_v0 = vpop.permute.xlu0 %794 }
 0x3b7   : > { %1013 = vrot.lane.b32.xlu1 %v827_v54, %s4862_s11  ;;  %1029 = vrot.lane.b32.xlu0 %v855_v51, %s4862_s11  ;;  %v860_v20 = vsel %vm858_vm7, %v855_v51, %v857_v6  ;;  %v798_v61 = vsel %vm796_vm10, %v5154_v3, %v795_v0  ;;  %v4871_v6 = vmov 2  }
 0x3b8   : > { %4646 = vset.pattern.permute.xlu0 %v4871_v6  ;;  %4647 = vset.pattern.permute.xlu1 %v4871_v6 }
 0x3ba   : > { %v829_v21 = vpop.permute.xlu1 %828  ;;  %v1273_v13 = vpop.permute.xlu0 %1272 }
 0x3bb   : > { %995 = vrot.lane.b32.xlu1 %v795_v0, %s4862_s11  ;;  %v832_v52 = vsel %vm830_vm9, %v827_v54, %v829_v21  ;;  %v5490_v21 = vld [vmem:[%s7580_s4 + $0x10] sm:$0xff] }
 0x3be   : > { %v780_v18 = vpop.permute.xlu1 %779  ;;  %v1285_v24 = vpop.permute.xlu0 %1284 }
 0x3bf   : > { %1007 = vrot.lane.b32.xlu1 %v817_v50, %s4862_s11  ;;  %987 = vrot.lane.b32.xlu0 %v780_v18, %s4862_s11  ;;  %v783_v19 = vsel %vm781_vm8, %v5142_v59, %v780_v18  ;;  %v4644_v59 = vunpack.i.l.bf16 %v5160_v10  ;;  %v5495_v50 = vld [vmem:[%s7580_s4 + $0x18] sm:$0xff] }
 0x3c1   : > { %v1332_v63 = vsel %vm843_vm5, %v5319_v12, %v4644_v59 }
 0x3c2   : > { %v1303_v11 = vpop.permute.xlu1 %1302  ;;  %v5416_v28 = vpop.permute.xlu0 %971 }
 0x3c3   : > { %1031 = vrot.lane.b32.xlu1 %v860_v20, %s4862_s11  ;;  %1392 = vrot.lane.b32.xlu0 %v1303_v11, %s4862_s11  ;;  %v1307_v26 = vsel %vm815_vm6, %v1303_v11, %v5148_v62  ;;  %v5504_v11 = vld [vmem:[%s7580_s4 + $0x20] sm:$0xff] }
 0x3c6   : > { %v1317_v1 = vpop.permute.xlu1 %1316  ;;  %v5428_v62 = vpop.permute.xlu0 %1358 }
 0x3c7   : > { %1370 = vrot.lane.b32.xlu1 %v5328_v7, %s4862_s11  ;;  %1015 = vrot.lane.b32.xlu0 %v832_v52, %s4862_s11  ;;  %v1321_v41 = vsel %vm830_vm9, %v1317_v1, %v5156_v8  ;;  %v5509_v52 = vld [vmem:[%s7580_s4 + $0x28] sm:$0xff] }
 0x3ca   : > { %v1271_v7 = vpop.permute.xlu1 %1270 }
 0x3cb   : > { %1374 = vrot.lane.b32.xlu1 %v1273_v13, %s4862_s11  ;;  %1400 = vrot.lane.b32.xlu0 %v1317_v1, %s4862_s11  ;;  %v1275_v3 = vsel %vm781_vm8, %v1271_v7, %v1273_v13  ;;  %v5516_v1 = vld [vmem:[%s7580_s4 + $0x30] sm:$0xff] }
 0x3ce   : > { %v1287_v38 = vpop.permute.xlu1 %1286 }
 0x3cf   : > { %985 = vrot.lane.b32.xlu1 %v783_v19, %s4862_s11  ;;  %1404 = vrot.lane.b32.xlu0 %v5319_v12, %s4862_s11  ;;  %v1034_v12 = vsel %vm1033_vm11, %v5168_v29, %v5356_v22  ;;  %v1289_v29 = vsel %vm796_vm10, %v1285_v24, %v1287_v38  ;;  %v5522_v19 = vld [vmem:[%s7580_s4 + $0x38] sm:$0xff] }
 0x3d2   : > { %v1343_v57 = vpop.permute.xlu1 %1342 }
 0x3d3   : > { %1394 = vrot.lane.b32.xlu1 %v1307_v26, %s4862_s11  ;;  %993 = vrot.lane.b32.xlu0 %v798_v61, %s4862_s11 }
 0x3d6   : > { %v5447_v5 = vpop.permute.xlu1 %1356 }
 0x3d7   : > { %1406 = vrot.lane.b32.xlu1 %v1332_v63, %s4862_s11  ;;  %1376 = vrot.lane.b32.xlu0 %v1288_v35, %s4862_s11 }
 0x3db   : > { %1402 = vrot.lane.b32.xlu1 %v1321_v41, %s4862_s11  ;;  %1372 = vrot.lane.b32.xlu0 %v1275_v3, %s4862_s11  ;;  %v1035_v41 = vsel %vm1033_vm11, %v5162_v14, %v5416_v28 }
 0x3dd   : > { %v998_v2 = vpop.permute.xlu0 %997 }
 0x3de   : > { %4116 = vmatprep.subr.bf16.mxu1 %v998_v2 }
 0x3df   : > { %4117 = vmatpush3.bf16.msra.mxu1 %v1034_v12  ;;  %1378 = vrot.lane.b32.xlu1 %v5333_v15, %s4862_s11  ;;  %v976_v15 = vpop.permute.xlu1 %975 }
 0x3e0   : > { %1408 = vrot.lane.b32.xlu0 %v5372_v49, %s4862_s11  ;;  %v1347_v49 = vsel %vm858_vm7, %v1343_v57, %v5172_v40 }
 0x3e1   : > { %v5443_v8 = vpop.permute.xlu0 %1384 }
 0x3e3   : > { %1410 = vrot.lane.b32.xlu1 %v1333_v47, %s4862_s11 }
 0x3e4   : > { %1380 = vrot.lane.b32.xlu0 %v1289_v29, %s4862_s11 }
 0x3e5   : > { %v5452_v22 = vpop.permute.xlu0 %1017  ;;  %v5460_v16 = vpop.permute.xlu1 %1362 }
 0x3e7   : > { %1382 = vrot.lane.b32.xlu1 %v1287_v38, %s4862_s11 }
 0x3e8   : > { %1412 = vrot.lane.b32.xlu0 %v5337_v36, %s4862_s11  ;;  %v5481_v36 = vld [vmem:[%s7580_s4 + $0x8] sm:$0xff] }
 0x3e9   : > { %v974_v10 = vpop.permute.xlu0 %973  ;;  %v5469_v51 = vpop.permute.xlu1 %1019 }
 0x3ea   : > { %v1036_v45 = vsel %vm1033_vm11, %v974_v10, %v976_v15 }
 0x3eb   : > { %1414 = vrot.lane.b32.xlu1 %v1346_v4, %s4862_s11 }
 0x3ec   : > { %1416 = vrot.lane.b32.xlu0 %v1343_v57, %s4862_s11 }
 0x3ed   : > { %v5464_v48 = vpop.permute.xlu0 %1360 }
 0x3ef   : > { %1418 = vrot.lane.b32.xlu1 %v1347_v49, %s4862_s11 }
 0x3f0   : > { %863 = vperm.xlu0 %4646, %v5476_v9  }
 0x3f1   : > { %v1002_v53 = vpop.permute.xlu0 %1001 }
 0x3f3   : > { %868 = vperm.xlu1 %4647, %v5481_v36  }
 0x3f4   : > { %878 = vperm.xlu0 %4646, %v5495_v50  }
 0x3f5   : > { %v5471_v58 = vpop.permute.xlu1 %983  ;;  %v1026_v54 = vpop.permute.xlu0 %1025 }
 0x3f7   : > { %873 = vperm.xlu1 %4647, %v5490_v21  }
 0x3f8   : > { %888 = vperm.xlu0 %4646, %v5509_v52  }
 0x3f9   : > { %v5485_v40 = vpop.permute.xlu1 %991  ;;  %v1010_v0 = vpop.permute.xlu0 %1009 }
 0x3fb   : > { %883 = vperm.xlu1 %4647, %v5504_v11  }
 0x3fc   : > { %898 = vperm.xlu0 %4646, %v5522_v19  }
 0x3fd   : > { %v1004_v18 = vpop.permute.xlu1 %1003  ;;  %v5499_v20 = vpop.permute.xlu0 %1388 }
 0x3fe   : > { %v1042_v57 = vsel %vm1033_vm11, %v1002_v53, %v1004_v18 }
 0x3ff   : > { %893 = vperm.xlu1 %4647, %v5516_v1  }
 0x400   : > { %4649 = vset.pattern.permute.xlu0 %v7585_v56 }
 0x401   : > { %v1028_v13 = vpop.permute.xlu1 %1027  ;;  %v5524_v7 = vpop.permute.xlu0 %1396 }
 0x402   : > { %v1048_v24 = vsel %vm1033_vm11, %v1026_v54, %v1028_v13 }
 0x403   : > { %4426 = vmatprep.subr.bf16.mxu0 %v1048_v24  ;;  %4648 = vset.pattern.permute.xlu1 %v7585_v56  ;;  %v5552_v56 = vld [vmem:[%s7581_s5 + $0x20] ss:$12 sps:$4 sm:$0xff]  }
 0x404   : > { %4427 = vmatpush3.bf16.msra.mxu0 %v1048_v24 }
 0x405   : > { %v1012_v26 = vpop.permute.xlu1 %1011  ;;  %v982_v61 = vpop.permute.xlu0 %981 }
 0x406   : > { %v1044_v15 = vsel %vm1033_vm11, %v1010_v0, %v1012_v26  ;;  %v5557_v0 = vld [vmem:[%s7581_s5 + $0x38] ss:$12 sps:$4 sm:$0xff]  }
 0x409   : > { %v1391_v59 = vpop.permute.xlu1 %1390  ;;  %v5530_v35 = vpop.permute.xlu0 %989 }
 0x40d   : > { %v5532_v63 = vpop.permute.xlu1 %1398  ;;  %v5534_v38 = vpop.permute.xlu0 %1368 }
 0x415   : > { %v1000_v3 = vpop.permute.xlu1 %999 }
 0x416   : > { %4118 = vmatprep.subr.bf16.mxu1 %v1000_v3 }
 0x417   : > { %4119 = vmatpush3.bf16.msra.mxu1 %v1035_v41 }
 0x418   : > { %4120 = vmatprep.subr.bf16.mxu1 %v1042_v57 }
 0x419   : > { %v980_v2 = vpop.permute.xlu1 %979  ;;  %v5540_v12 = vpop.permute.xlu0 %1021 }
 0x41b   : > { %4121 = vmatpush3.bf16.msra.mxu1 %v1036_v45  ;;  %v1038_v45 = vsel %vm1033_vm11, %v982_v61, %v5471_v58  ;;  %v1420_v58 = vsel %vm1033_vm11, %v5346_v17, %v5362_v60  ;;  %v1428_v17 = vsel %vm1033_vm11, %v5499_v20, %v1391_v59  ;;  %v1040_v59 = vsel %vm1033_vm11, %v5530_v35, %v5485_v40  ;;  %v4681_v35 = vld [vmem:[%s7581_s5] ss:$12 sps:$4 sm:$0xff]  }
 0x41d   : > { %v1387_v47 = vpop.permute.xlu1 %1386  ;;  %v978_v29 = vpop.permute.xlu0 %977 }
 0x41e   : > { %v1037_v18 = vsel %vm1033_vm11, %v978_v29, %v980_v2 }
 0x421   : > { %v1367_v4 = vpop.permute.xlu1 %1366  ;;  %v1365_v49 = vpop.permute.xlu0 %1364 }
 0x425   : > { %v1024_v54 = vpop.permute.xlu1 %1023  ;;  %v1006_v6 = vpop.permute.xlu0 %1005 }
 0x429   : > { %v1014_v13 = vpop.permute.xlu1 %1013  ;;  %v1030_v24 = vpop.permute.xlu0 %1029 }
 0x42d   : > { %v996_v14 = vpop.permute.xlu1 %995 }
 0x431   : > { %v1008_v28 = vpop.permute.xlu1 %1007  ;;  %v988_v3 = vpop.permute.xlu0 %987 }
 0x432   : > { %v1043_v53 = vsel %vm1033_vm11, %v1006_v6, %v1008_v28 }
 0x433   : > { %4122 = vmatprep.subr.bf16.mxu1 %v1043_v53 }
 0x434   : > { %4123 = vmatpush3.bf16.msra.mxu1 %v1037_v18 }
 0x435   : > { %v1032_v10 = vpop.permute.xlu1 %1031  ;;  %4124 = vmatprep.subr.bf16.mxu1 %v1044_v15  ;;  %v1393_v41 = vpop.permute.xlu0 %1392  ;;  %v4687_v15 = vld [vmem:[%s7581_s5 + $0x18] ss:$12 sps:$4 sm:$0xff]  }
 0x436   : > { %v1049_v57 = vsel %vm1033_vm11, %v1030_v24, %v1032_v10  ;;  %v4689_v10 = vld [vmem:[%s7581_s5 + $0x34] ss:$12 sps:$4 sm:$0xff]  }
 0x437   : > { %4428 = vmatprep.subr.bf16.mxu0 %v1049_v57 }
 0x438   : > { %4125 = vmatpush3.bf16.msra.mxu1 %v1038_v45  ;;  %4429 = vmatpush3.bf16.msra.mxu0 %v1049_v57 }
 0x439   : > { %v1371_v26 = vpop.permute.xlu1 %1370  ;;  %4162 = vmatprep.subr.bf16.mxu0 %v5443_v8  ;;  %v1016_v2 = vpop.permute.xlu0 %1015  ;;  %v1421_v8 = vsel %vm1033_vm11, %v5447_v5, %v5428_v62  ;;  %v1046_v62 = vsel %vm1033_vm11, %v5452_v22, %v5469_v51  ;;  %v1047_v22 = vsel %vm1033_vm11, %v5540_v12, %v1024_v54  ;;  %v1430_v51 = vsel %vm1033_vm11, %v5524_v7, %v5532_v63  ;;  %v4684_v12 = vld [vmem:[%s7581_s5 + $0x1c] ss:$12 sps:$4 sm:$0xff]  }
 0x43a   : > { %v1045_v29 = vsel %vm1033_vm11, %v1014_v13, %v1016_v2  ;;  %v5574_v13 = vld [vmem:[%s7581_s5 + $0x50] ss:$12 sps:$4 sm:$0xff]  }
 0x43b   : > { %4126 = vmatprep.subr.bf16.mxu1 %v1045_v29  ;;  %4431 = vmatmul.mubr.msk.bf16.vlgmr.msra.gmra.mrb[0].mxu0 %vm398_vm0, %v5552_v56  ;;  %v4691_v29 = vld [vmem:[%s7581_s5 + $0x30] ss:$12 sps:$4 sm:$0xff]  }
 0x43c   : > { %4163 = vmatpush3.bf16.msra.mxu0 %v1420_v58  ;;  %4434 = vmatprep.mubr.msk.bf16.mxu0 %vm398_vm0, %v5557_v0 }
 0x43d   : > { %v1375_v61 = vpop.permute.xlu1 %1374  ;;  %4164 = vmatprep.subr.bf16.mxu0 %v1387_v47  ;;  %v1401_v6 = vpop.permute.xlu0 %1400  ;;  %v1422_v47 = vsel %vm1033_vm11, %v5464_v48, %v5460_v16  ;;  %v1423_v48 = vsel %vm1033_vm11, %v1365_v49, %v1367_v4  ;;  %v1424_v4 = vsel %vm1033_vm11, %v5534_v38, %v1371_v26 }
 0x440   : > { %4165 = vmatpush3.bf16.msra.mxu0 %v1421_v8 }
 0x441   : > { %v986_v60 = vpop.permute.xlu1 %985  ;;  %4166 = vmatprep.subr.bf16.mxu0 %v1428_v17  ;;  %v1405_v24 = vpop.permute.xlu0 %1404 }
 0x442   : > { %v1039_v28 = vsel %vm1033_vm11, %v986_v60, %v988_v3 }
 0x443   : > { %4127 = vmatpush3.bf16.msra.mxu1 %v1039_v28  ;;  %4435 = vmatmul.mubr.msk.bf16.gmra.mrb[4].mxu0 %vm398_vm0, %v5574_v13  ;;  %v4694_v28 = vld [vmem:[%s7581_s5 + $0x48] ss:$12 sps:$4 sm:$0xff]  }
 0x444   : > { %4128 = vmatprep.subr.bf16.mxu1 %v1046_v62  ;;  %4167 = vmatpush3.bf16.msra.mxu0 %v1422_v47 }
 0x445   : > { %v1395_v5 = vpop.permute.xlu1 %1394  ;;  %v994_v20 = vpop.permute.xlu0 %993  ;;  %1486 = vmatprep.mubr.bf16.mxu0 %v5404_v55 }
 0x446   : > { %v1429_v16 = vsel %vm1033_vm11, %v1393_v41, %v1395_v5  ;;  %v1041_v40 = vsel %vm1033_vm11, %v994_v20, %v996_v14 }
 0x447   : > { %4129 = vmatpush3.bf16.msra.mxu1 %v1040_v59  ;;  %4168 = vmatprep.subr.bf16.mxu0 %v1429_v16 }
 0x448   : > { %4130 = vmatprep.subr.bf16.mxu1 %v1047_v22  ;;  %4169 = vmatpush3.bf16.msra.mxu0 %v1423_v48 }
 0x449   : > { %v1407_v55 = vpop.permute.xlu1 %1406  ;;  %4170 = vmatprep.subr.bf16.mxu0 %v1430_v51  ;;  %v1377_v3 = vpop.permute.xlu0 %1376 }
 0x44a   : > { %v1432_v14 = vsel %vm1033_vm11, %v1405_v24, %v1407_v55 }
 0x44b   : > { %4131 = vmatpush3.bf16.msra.mxu1 %v1041_v40 }
 0x44c   : > { %4171 = vmatpush3.bf16.msra.mxu0 %v1424_v4 }
 0x44d   : > { %v1403_v49 = vpop.permute.xlu1 %1402  ;;  %v1373_v7 = vpop.permute.xlu0 %1372 }
 0x44e   : > { %v1425_v63 = vsel %vm1033_vm11, %v1373_v7, %v1375_v61  ;;  %1113 = vmatmul.mubr.bf16.vlgmr.msra.gmra.mrb[4].mxu1 %v4681_v35  ;;  %v1431_v54 = vsel %vm1033_vm11, %v1401_v6, %v1403_v49  ;;  %v4692_v61 = vld [vmem:[%s7581_s5 + $0x4c] ss:$12 sps:$4 sm:$0xff]  }
 0x44f   : > { %4172 = vmatprep.subr.bf16.mxu0 %v1431_v54  ;;  %1120 = vmatprep.mubr.bf16.mxu1 %v4684_v12 }
 0x450   : > { %4173 = vmatpush3.bf16.msra.mxu0 %v1425_v63 }
 0x451   : > { %v1379_v53 = vpop.permute.xlu1 %1378  ;;  %4174 = vmatprep.subr.bf16.mxu0 %v1432_v14 }
 0x452   : > { %v1426_v38 = vsel %vm1033_vm11, %v1377_v3, %v1379_v53  ;;  %v1409_v18 = vpop.permute.xlu0 %1408 }
 0x454   : > { %4175 = vmatpush3.bf16.msra.mxu0 %v1426_v38 }
 0x455   : > { %v1411_v41 = vpop.permute.xlu1 %1410 }
 0x456   : > { %v1381_v57 = vpop.permute.xlu0 %1380  ;;  %1121 = vmatmul.mubr.bf16.gmra.mrb[8].mxu1 %v4687_v15  ;;  %v1433_v45 = vsel %vm1033_vm11, %v1409_v18, %v1411_v41 }
 0x457   : > { %4176 = vmatprep.subr.bf16.mxu0 %v1433_v45  ;;  %1128 = vmatprep.mubr.bf16.mxu1 %v4689_v10 }
 0x459   : > { %v1383_v26 = vpop.permute.xlu1 %1382 }
 0x45a   : > { %v1427_v2 = vsel %vm1033_vm11, %v1381_v57, %v1383_v26  ;;  %v1413_v58 = vpop.permute.xlu0 %1412 }
 0x45b   : > { %4177 = vmatpush3.bf16.msra.mxu0 %v1427_v2 }
 0x45d   : > { %v1415_v6 = vpop.permute.xlu1 %1414 }
 0x45e   : > { %1129 = vmatmul.mubr.bf16.gmra.mrb[12].mxu1 %v4691_v29  ;;  %1487 = vmatmul.mubr.bf16.vlgmr.msra.gmra.mrb[8].mxu0 %v4681_v35  ;;  %v1434_v8 = vsel %vm1033_vm11, %v1413_v58, %v1415_v6  ;;  %v1417_v17 = vpop.permute.xlu0 %1416 }
 0x45f   : > { %4438 = vmatprep.subr.bf16.mxu1 %v1434_v8  ;;  %1136 = vmatprep.mubr.bf16.mxu1 %v4692_v61 }
 0x460   : > { %4439 = vmatpush3.bf16.msra.mxu1 %v1434_v8  ;;  %1494 = vmatprep.mubr.bf16.mxu0 %v4684_v12 }
 0x461   : > { %v1419_v60 = vpop.permute.xlu1 %1418 }
 0x462   : > { %v1435_v24 = vsel %vm1033_vm11, %v1417_v17, %v1419_v60 }
 0x463   : > { %4440 = vmatprep.subr.bf16.mxu1 %v1435_v24 }
 0x464   : > { %4441 = vmatpush3.bf16.msra.mxu1 %v1435_v24 }
 0x466   : > { %1137 = vmatmul.mubr.bf16.gmra.mrb[16].mxu1 %v4694_v28  ;;  %1495 = vmatmul.mubr.bf16.gmra.mrb[12].mxu0 %v4687_v15 }
 0x467   : > { %1502 = vmatprep.mubr.bf16.mxu0 %v4689_v10  ;;  %4442 = vmatprep.mubr.msk.bf16.mxu1 %vm398_vm0, %v5385_v37 }
 0x46e   : > { %1503 = vmatmul.mubr.bf16.gmra.mrb[16].mxu0 %v4691_v29  ;;  %4443 = vmatmul.mubr.msk.bf16.vlgmr.msra.gmra.mrb[20].mxu1 %vm398_vm0, %v5552_v56 }
 0x46f   : > { %1510 = vmatprep.mubr.bf16.mxu0 %v4692_v61  ;;  %4446 = vmatprep.mubr.msk.bf16.mxu1 %vm398_vm0, %v5557_v0  ;;  %v864_v55 = vpop.permute.xlu0 %863 }
 0x472   : > { %v5638_v35 = vpop.permute.xlu1 %868 }
 0x473   : > { %v879_v18 = vpop.permute.xlu0 %878 }
 0x476   : > { %1511 = vmatmul.mubr.bf16.gmra.mrb[20].mxu0 %v4694_v28  ;;  %4447 = vmatmul.mubr.msk.bf16.gmra.mrb[24].mxu1 %vm398_vm0, %v5574_v13  ;;  %v874_v54 = vpop.permute.xlu1 %873 }
 0x477   : > { %v5649_v26 = vpop.permute.xlu0 %888 }
 0x47a   : > { %v5647_v45 = vpop.permute.xlu1 %883 }
 0x50e   : > { %v4432_v47 = vpop.f32.mrb[0].mxu0 }
 0x50f   : > { %v1179_v62 = vpop.f32.mrb[1].mxu0 }
 0x510   : > { %v4433_v5 = vpop.f32.mrb[2].mxu0 }
 0x511   : > { %v1182_v20 = vpop.f32.mrb[3].mxu0 }
 0x516   : > { %v4436_v59 = vpop.f32.mrb[4].mxu0 }
 0x517   : > { %v1195_v16 = vpop.f32.mrb[5].mxu0 }
 0x518   : > { %v4437_v48 = vpop.f32.mrb[6].mxu0 }
 0x519   : > { %v1198_v37 = vpop.f32.mrb[7].mxu0 }
 0x521   : > { %v4132_v22 = vpop.f32.mrb[4].mxu1 }
 0x522   : > { %v4133_v51 = vpop.f32.mrb[5].mxu1 }
 0x523   : > { %v4134_v56 = vadd.f32 %v4133_v51, %v4132_v22  ;;  %v4135_v3 = vpop.f32.mrb[6].mxu1 }
 0x524   : > { %v4136_v40 = vpop.f32.mrb[7].mxu1 }
 0x525   : > { %v4137_v0 = vadd.f32 %v4136_v40, %v4135_v3  ;;  %v1115_v4 = vadd.f32 %v4134_v56, %v864_v55  ;;  %v5657_v3 = vpop.permute.xlu0 %898 }
 0x527   : > { %v5640_v12 = vadd.f32 %v1179_v62, %v1115_v4  ;;  %v1118_v13 = vadd.f32 %v4137_v0, %v5638_v35 }
 0x529   : > { %v5643_v49 = vadd.f32 %v1182_v20, %v1118_v13  ;;  %v4138_v7 = vpop.f32.mrb[8].mxu1 }
 0x52a   : > { %v4139_v63 = vpop.f32.mrb[9].mxu1 }
 0x52b   : > { %v4140_v14 = vadd.f32 %v4139_v63, %v4138_v7  ;;  %v4141_v53 = vpop.f32.mrb[10].mxu1 }
 0x52c   : > { %v4142_v38 = vpop.f32.mrb[11].mxu1 }
 0x52d   : > { %v1123_v15 = vadd.f32 %v4140_v14, %v874_v54  ;;  %v4143_v10 = vadd.f32 %v4142_v38, %v4141_v53 }
 0x52f   : > { %v5645_v41 = vadd.f32 %v4432_v47, %v1123_v15  ;;  %v1126_v57 = vadd.f32 %v4143_v10, %v879_v18 }
 0x531   : > { %v5651_v2 = vadd.f32 %v4433_v5, %v1126_v57  ;;  %v4144_v29 = vpop.f32.mrb[12].mxu1  ;;  %v4178_v58 = vpop.f32.mrb[8].mxu0 }
 0x532   : > { %v4145_v61 = vpop.f32.mrb[13].mxu1  ;;  %v4179_v6 = vpop.f32.mrb[9].mxu0 }
 0x533   : > { %v4146_v8 = vadd.f32 %v4145_v61, %v4144_v29  ;;  %v4147_v17 = vpop.f32.mrb[14].mxu1  ;;  %v4180_v60 = vadd.f32 %v4179_v6, %v4178_v58  ;;  %v4181_v24 = vpop.f32.mrb[10].mxu0 }
 0x534   : > { %v4148_v28 = vpop.f32.mrb[15].mxu1  ;;  %v4182_v62 = vpop.f32.mrb[11].mxu0 }
 0x535   : > { %v1131_v47 = vadd.f32 %v4146_v8, %v5647_v45  ;;  %v4149_v20 = vadd.f32 %v4148_v28, %v4147_v17  ;;  %v4183_v22 = vadd.f32 %v4182_v62, %v4181_v24  ;;  %v894_v5 = vpop.permute.xlu1 %893  ;;  %v1489_v24 = vadd.f32 %v4180_v60, %v864_v55 }
 0x537   : > { %v5654_v51 = vadd.f32 %v1195_v16, %v1131_v47  ;;  %v1134_v56 = vadd.f32 %v4149_v20, %v5649_v26 }
 0x539   : > { %v5659_v40 = vadd.f32 %v1198_v37, %v1134_v56  ;;  %v4150_v0 = vpop.f32.mrb[16].mxu1  ;;  %v4184_v4 = vpop.f32.mrb[12].mxu0 }
 0x53a   : > { %v4151_v13 = vpop.f32.mrb[17].mxu1  ;;  %v4185_v7 = vpop.f32.mrb[13].mxu0 }
 0x53b   : > { %v4152_v63 = vadd.f32 %v4151_v13, %v4150_v0  ;;  %v4153_v14 = vpop.f32.mrb[18].mxu1  ;;  %v4186_v53 = vadd.f32 %v4185_v7, %v4184_v4  ;;  %v4187_v38 = vpop.f32.mrb[14].mxu0 }
 0x53c   : > { %v4154_v15 = vpop.f32.mrb[19].mxu1  ;;  %v4188_v10 = vpop.f32.mrb[15].mxu0 }
 0x53d   : > { %v1139_v57 = vadd.f32 %v4152_v63, %v894_v5  ;;  %v4155_v16 = vadd.f32 %v4154_v15, %v4153_v14  ;;  %v4189_v29 = vadd.f32 %v4188_v10, %v4187_v38  ;;  %v1497_v58 = vadd.f32 %v4186_v53, %v874_v54 }
 0x53f   : > { %v5661_v61 = vadd.f32 %v4436_v59, %v1139_v57  ;;  %v1142_v6 = vadd.f32 %v4155_v16, %v5657_v3  ;;  %v1500_v20 = vadd.f32 %v4189_v29, %v879_v18  ;;  %v1492_v59 = vadd.f32 %v4183_v22, %v5638_v35 }
 0x540   : > { %v1644_v29 = vmul.f32 %v5645_v41, %v5645_v41 }
 0x541   : > { %v5664_v37 = vadd.f32 %v4437_v48, %v1142_v6  ;;  %v4190_v8 = vpop.f32.mrb[16].mxu0  ;;  %v4444_v17 = vpop.f32.mrb[20].mxu1 }
 0x542   : > { %v5666_v28 = vadd.f32 %v4444_v17, %v1497_v58  ;;  %v4191_v62 = vpop.f32.mrb[17].mxu0  ;;  %v1553_v47 = vpop.f32.mrb[21].mxu1 }
 0x543   : > { %v4192_v56 = vadd.f32 %v4191_v62, %v4190_v8  ;;  %v5668_v0 = vadd.f32 %v1553_v47, %v1489_v24  ;;  %v4193_v4 = vpop.f32.mrb[18].mxu0  ;;  %v4445_v13 = vpop.f32.mrb[22].mxu1 }
 0x544   : > { %v5671_v54 = vadd.f32 %v4445_v13, %v1500_v20  ;;  %v4194_v7 = vpop.f32.mrb[19].mxu0  ;;  %v1556_v48 = vpop.f32.mrb[23].mxu1  ;;  %v1622_v63 = vadd.f32 %v5666_v28, %v5645_v41  ;;  %v1645_v14 = vmul.f32 %v5666_v28, %v5666_v28  ;;  %v1640_v20 = vmul.f32 %v5640_v12, %v5640_v12 }
 0x545   : > { %v4195_v55 = vadd.f32 %v4194_v7, %v4193_v4  ;;  %v5675_v60 = vadd.f32 %v1556_v48, %v1492_v59  ;;  %v1616_v35 = vadd.f32 %v5668_v0, %v5640_v12  ;;  %v1505_v38 = vadd.f32 %v4192_v56, %v5647_v45 }
 0x546   : > { %1623 = vadd.xlane.f32.xlu1 %v1622_v63  ;;  %v1625_v18 = vadd.f32 %v5671_v54, %v5651_v2  ;;  %v1641_v15 = vmul.f32 %v5668_v0, %v5668_v0  ;;  %v1662_v47 = vadd.f32 %v1645_v14, %v1644_v29  ;;  %v1647_v59 = vmul.f32 %v5671_v54, %v5671_v54 }
 0x547   : > { %v1619_v16 = vadd.f32 %v5675_v60, %v5643_v49  ;;  %v1508_v24 = vadd.f32 %v4195_v55, %v5649_v26  ;;  %v1646_v55 = vmul.f32 %v5651_v2, %v5651_v2 }
 0x548   : > { %1626 = vadd.xlane.f32.xlu0 %v1625_v18  ;;  %v1656_v7 = vadd.f32 %v1641_v15, %v1640_v20  ;;  %v1643_v18 = vmul.f32 %v5675_v60, %v5675_v60  ;;  %v1608_v20 = vld [vmem:[%s7578_s2] sm:$0xff] }
 0x549   : > { %v4196_v22 = vpop.f32.mrb[20].mxu0  ;;  %v4448_v53 = vpop.f32.mrb[24].mxu1  ;;  %v1665_v14 = vadd.f32 %v1647_v59, %v1646_v55  ;;  %4466 = vmatprep.mubr.msk.f32.mxu0 %vm1688_vm12, %v1608_v20 }
 0x54a   : > { %v4197_v10 = vpop.f32.mrb[21].mxu0  ;;  %v1569_v57 = vpop.f32.mrb[25].mxu1  ;;  %1617 = vadd.xlane.f32.xlu1 %v1616_v35 }
 0x54b   : > { %v4198_v58 = vadd.f32 %v4197_v10, %v4196_v22  ;;  %v5690_v6 = vadd.f32 %v1569_v57, %v1505_v38  ;;  %v4199_v8 = vpop.f32.mrb[22].mxu0  ;;  %v4449_v17 = vpop.f32.mrb[26].mxu1  ;;  %v1642_v22 = vmul.f32 %v5643_v49, %v5643_v49  ;;  %v1648_v38 = vmul.f32 %v5654_v51, %v5654_v51 }
 0x54c   : > { %v4200_v45 = vpop.f32.mrb[23].mxu0  ;;  %v1572_v62 = vpop.f32.mrb[27].mxu1  ;;  %1620 = vadd.xlane.f32.xlu0 %v1619_v16  ;;  %v1652_v16 = vmul.f32 %v5661_v61, %v5661_v61 }
 0x54d   : > { %v1513_v56 = vadd.f32 %v4198_v58, %v894_v5  ;;  %v4201_v4 = vadd.f32 %v4200_v45, %v4199_v8  ;;  %v5695_v13 = vadd.f32 %v1572_v62, %v1508_v24  ;;  %v1628_v63 = vadd.f32 %v5690_v6, %v5654_v51 }
 0x54e   : > { %1663 = vadd.xlane.f32.xlu1 %v1662_v47  ;;  %v1649_v35 = vmul.f32 %v5690_v6, %v5690_v6  ;;  %v1654_v62 = vmul.f32 %v5664_v37, %v5664_v37 }
 0x54f   : > { %v5699_v48 = vadd.f32 %v4448_v53, %v1513_v56  ;;  %v1516_v26 = vadd.f32 %v4201_v4, %v5657_v3  ;;  %v1659_v53 = vadd.f32 %v1643_v18, %v1642_v22  ;;  %v1631_v57 = vadd.f32 %v5695_v13, %v5659_v40 }
 0x550   : > { %1657 = vadd.xlane.f32.xlu0 %v1656_v7  ;;  %v1668_v15 = vadd.f32 %v1649_v35, %v1648_v38  ;;  %v1651_v58 = vmul.f32 %v5695_v13, %v5695_v13  ;;  %v7587_v56 = vmov 3  }
 0x551   : > { %v5706_v5 = vadd.f32 %v4449_v17, %v1516_v26  ;;  %v1634_v3 = vadd.f32 %v5699_v48, %v5661_v61  ;;  %v1653_v10 = vmul.f32 %v5699_v48, %v5699_v48  ;;  %v1650_v17 = vmul.f32 %v5659_v40, %v5659_v40 }
 0x552   : > { %1629 = vadd.xlane.f32.xlu1 %v1628_v63 }
 0x553   : > { %v1674_v29 = vadd.f32 %v1653_v10, %v1652_v16  ;;  %v1637_v8 = vadd.f32 %v5706_v5, %v5664_v37  ;;  %v1671_v24 = vadd.f32 %v1651_v58, %v1650_v17  ;;  %v1655_v45 = vmul.f32 %v5706_v5, %v5706_v5  ;;  %v1610_v10 = vld [vmem:[%s7578_s2 + $0x10] sm:$0xff]  ;;  %v1612_v16 = vld [vmem:[%s7578_s2 + $0x20] sm:$0xff] }
 0x554   : > { %1666 = vadd.xlane.f32.xlu0 %v1665_v14  ;;  %v1614_v58 = vld [vmem:[%s7578_s2 + $0x30] sm:$0xff] }
 0x555   : > { %v1677_v47 = vadd.f32 %v1655_v45, %v1654_v62 }
 0x556   : > { %1635 = vadd.xlane.f32.xlu1 %v1634_v3 }
 0x558   : > { %1660 = vadd.xlane.f32.xlu0 %v1659_v53 }
 0x55a   : > { %1669 = vadd.xlane.f32.xlu1 %v1668_v15 }
 0x55c   : > { %1632 = vadd.xlane.f32.xlu0 %v1631_v57  ;;  %v1611_v57 = vld [vmem:[%s7578_s2 + $0x18] sm:$0xff] }
 0x55e   : > { %1675 = vadd.xlane.f32.xlu1 %v1674_v29  ;;  %v1613_v29 = vld [vmem:[%s7578_s2 + $0x28] sm:$0xff] }
 0x560   : > { %1638 = vadd.xlane.f32.xlu0 %v1637_v8  ;;  %v1615_v8 = vld [vmem:[%s7578_s2 + $0x38] sm:$0xff] }
 0x564   : > { %1672 = vadd.xlane.f32.xlu0 %v1671_v24 }
 0x568   : > { %1678 = vadd.xlane.f32.xlu0 %v1677_v47 }
 0x56f   : > { %1948 = vrot.lane.b32.xlu1 %v5481_v36, %s4856_s17 }
 0x573   : > { %1952 = vrot.lane.b32.xlu1 %v5495_v50, %s4856_s17 }
 0x577   : > { %1956 = vrot.lane.b32.xlu1 %v5509_v52, %s4856_s17 }
 0x57b   : > { %1960 = vrot.lane.b32.xlu1 %v5522_v19, %s4856_s17 }
 0x57e   : > { %1946 = vrot.lane.b32.xlu0 %v5476_v9, %s4856_s17 }
 0x57f   : > { %2035 = vperm.xlu1 %4648, %v5476_v9  }
 0x582   : > { %1950 = vrot.lane.b32.xlu0 %v5490_v21, %s4856_s17 }
 0x583   : > { %2043 = vperm.xlu1 %4648, %v5490_v21  }
 0x586   : > { %1954 = vrot.lane.b32.xlu0 %v5504_v11, %s4856_s17 }
 0x587   : > { %2051 = vperm.xlu1 %4648, %v5504_v11  }
 0x58a   : > { %1958 = vrot.lane.b32.xlu0 %v5516_v1, %s4856_s17 }
 0x58b   : > { %2059 = vperm.xlu1 %4648, %v5516_v1  }
 0x58e   : > { %2039 = vperm.xlu0 %4649, %v5481_v36  }
 0x58f   : > { %4651 = vrot.lane.b32.xlu1 %v4857_v46, %s4861_s9 }
 0x590   : > { %4660 = vset.pattern.permute.xlu1 %v7587_v56 }
 0x592   : > { %2047 = vperm.xlu0 %4649, %v5495_v50  }
 0x593   : > { %2330 = vrot.lane.b32.xlu1 %v5090_v32, %s4865_s14 }
 0x596   : > { %2055 = vperm.xlu0 %4649, %v5509_v52  }
 0x597   : > { %2334 = vrot.lane.b32.xlu1 %v5090_v32, %s4865_s14 }
 0x59a   : > { %2063 = vperm.xlu0 %4649, %v5522_v19  }
 0x59b   : > { %2338 = vrot.lane.b32.xlu1 %v5090_v32, %s4865_s14 }
 0x59e   : > { %4656 = vrot.lane.b32.xlu0 %v4857_v46, %s4861_s9 }
 0x59f   : > { %2342 = vrot.lane.b32.xlu1 %v5090_v32, %s4865_s14  ;;  %4661 = vset.pattern.permute.xlu0 %v7587_v56 }
 0x5a2   : > { %2499 = vperm.xlu0 %4661, %v5481_v36  }
 0x5a3   : > { %2358 = vrot.lane.b32.xlu1 %v5100_v34, %s4867_s16 }
 0x5a6   : > { %2511 = vperm.xlu0 %4661, %v5504_v11  }
 0x5a7   : > { %2362 = vrot.lane.b32.xlu1 %v5100_v34, %s4867_s16 }
 0x5aa   : > { %2519 = vperm.xlu0 %4661, %v5516_v1  }
 0x5ab   : > { %2366 = vrot.lane.b32.xlu1 %v5100_v34, %s4867_s16 }
 0x5ae   : > { %2646 = vrot.lane.b32.xlu0 %v5125_v44, %s4862_s11 }
 0x5af   : > { %2370 = vrot.lane.b32.xlu1 %v5100_v34, %s4867_s16  ;;  %4672 = vset.pattern.permute.xlu0 %v4857_v46 }
 0x5b2   : > { %4663 = vrot.lane.b32.xlu0 %v4857_v46, %s4870_s20 }
 0x5b3   : > { %2495 = vperm.xlu1 %4660, %v5476_v9  }
 0x5b6   : > { %3370 = vrot.lane.b32.xlu0 %v5097_v33, %s4866_s15 }
 0x5b7   : > { %2503 = vperm.xlu1 %4660, %v5490_v21  }
 0x5ba   : > { %3382 = vrot.lane.b32.xlu0 %v5097_v33, %s4866_s15 }
 0x5bb   : > { %2507 = vperm.xlu1 %4660, %v5495_v50  }
 0x5be   : > { %3462 = vrot.lane.b32.xlu0 %v5118_v43, %s4869_s19 }
 0x5bf   : > { %2515 = vperm.xlu1 %4660, %v5509_v52  }
 0x5c2   : > { %3466 = vrot.lane.b32.xlu0 %v5118_v43, %s4869_s19 }
 0x5c3   : > { %3398 = vrot.lane.b32.xlu1 %v5112_v39, %s4868_s18 }
 0x5c4   : > { %4673 = vset.pattern.permute.xlu1 %v4857_v46 }
 0x5c7   : > { %2634 = vrot.lane.b32.xlu1 %v5125_v44, %s4862_s11 }
 0x5cb   : > { %3402 = vrot.lane.b32.xlu1 %v5112_v39, %s4868_s18 }
 0x5cf   : > { %2638 = vrot.lane.b32.xlu1 %v5125_v44, %s4862_s11 }
 0x5d3   : > { %v1624_v32 = vpop.xlane.xlu1 %1623  ;;  %3406 = vrot.lane.b32.xlu1 %v5112_v39, %s4868_s18 }
 0x5d5   : > { %v1627_v34 = vpop.xlane.xlu0 %1626 }
 0x5d7   : > { %2642 = vrot.lane.b32.xlu1 %v5125_v44, %s4862_s11  ;;  %v1618_v9 = vpop.xlane.xlu1 %1617 }
 0x5d9   : > { %v1621_v36 = vpop.xlane.xlu0 %1620 }
 0x5db   : > { %3410 = vrot.lane.b32.xlu1 %v5112_v39, %s4868_s18  ;;  %v1664_v21 = vpop.xlane.xlu1 %1663 }
 0x5dc   : > { %v1682_v39 = vsel %vm393_vm1, %v1624_v32, %v1664_v21 }
 0x5dd   : > { %v1658_v50 = vpop.xlane.xlu0 %1657 }
 0x5de   : > { %v1680_v19 = vsel %vm393_vm1, %v1618_v9, %v1658_v50 }
 0x5df   : > { %3374 = vrot.lane.b32.xlu1 %v5097_v33, %s4866_s15  ;;  %v1630_v11 = vpop.xlane.xlu1 %1629 }
 0x5e1   : > { %v1667_v52 = vpop.xlane.xlu0 %1666 }
 0x5e2   : > { %v1683_v44 = vsel %vm393_vm1, %v1627_v34, %v1667_v52 }
 0x5e3   : > { %3454 = vrot.lane.b32.xlu1 %v5118_v43, %s4869_s19  ;;  %v1636_v59 = vpop.xlane.xlu1 %1635  ;;  %v4546_v26 = vpack.c.bf16 %v1683_v44, %v1682_v39 }
 0x5e5   : > { %v1661_v1 = vpop.xlane.xlu0 %1660 }
 0x5e6   : > { %v1681_v4 = vsel %vm393_vm1, %v1621_v36, %v1661_v1 }
 0x5e7   : > { %v4542_v7 = vpack.c.bf16 %v1681_v4, %v1680_v19  ;;  %4668 = vrot.lane.b32.xlu1 %v4857_v46, %s4870_s20  ;;  %v1670_v55 = vpop.xlane.xlu1 %1669 }
 0x5e8   : > { %v1684_v35 = vsel %vm393_vm1, %v1630_v11, %v1670_v55 }
 0x5e9   : > { %4543 = vmatprep.subr.bf16.mxu0 %v4542_v7  ;;  %v1633_v63 = vpop.xlane.xlu0 %1632 }
 0x5ea   : > { %4545 = vmatpush3.bf16.msra.mxu0 %v4542_v7 }
 0x5eb   : > { %3378 = vrot.lane.b32.xlu1 %v5097_v33, %s4866_s15  ;;  %4547 = vmatprep.subr.bf16.mxu0 %v4546_v26  ;;  %v1676_v3 = vpop.xlane.xlu1 %1675 }
 0x5ec   : > { %v1686_v38 = vsel %vm393_vm1, %v1636_v59, %v1676_v3 }
 0x5ed   : > { %v1639_v18 = vpop.xlane.xlu0 %1638 }
 0x5ee   : > { %4549 = vmatpush3.bf16.msra.mxu0 %v4546_v26 }
 0x5ef   : > { %3458 = vrot.lane.b32.xlu1 %v5118_v43, %s4869_s19  ;;  %v1609_v43 = vld [vmem:[%s7578_s2 + $0x8] sm:$0xff]  ;;  %v5865_v17 = vpop.permute.xlu1 %1948 }
 0x5f1   : > { %v1673_v14 = vpop.xlane.xlu0 %1672 }
 0x5f2   : > { %v1685_v46 = vsel %vm393_vm1, %v1633_v63, %v1673_v14 }
 0x5f3   : > { %v4550_v22 = vpack.c.bf16 %v1685_v46, %v1684_v35  ;;  %v5867_v24 = vpop.permute.xlu1 %1952 }
 0x5f5   : > { %4551 = vmatprep.subr.bf16.mxu0 %v4550_v22  ;;  %v1679_v53 = vpop.xlane.xlu0 %1678 }
 0x5f6   : > { %v1687_v33 = vsel %vm393_vm1, %v1639_v18, %v1679_v53  ;;  %4553 = vmatpush3.bf16.msra.mxu0 %v4550_v22 }
 0x5f7   : > { %v4554_v15 = vpack.c.bf16 %v1687_v33, %v1686_v38  ;;  %v5869_v45 = vpop.permute.xlu1 %1956  ;;  %v7610_v38 = vmov 1  }
 0x5f9   : > { %4555 = vmatprep.subr.bf16.mxu0 %v4554_v15  ;;  %v5933_v22 = vpop.permute.xlu0 %1946 }
 0x5fa   : > { %4557 = vmatpush3.bf16.msra.mxu0 %v4554_v15 }
 0x5fb   : > { %v5871_v62 = vpop.permute.xlu1 %1960 }
 0x5fd   : > { %4467 = vmatmul.mubr.msk.f32.vlgmr.msra.gmra.mrb[24].mxu0 %vm1688_vm12, %v1609_v43  ;;  %v5943_v15 = vpop.permute.xlu0 %1950 }
 0x5fe   : > { %4469 = vmatprep.mubr.msk.f32.mxu0 %vm1688_vm12, %v1610_v10 }
 0x5ff   : > { %v5873_v47 = vpop.permute.xlu1 %2035 }
 0x601   : > { %4470 = vmatmul.mubr.msk.f32.gmra.mrb[26].mxu0 %vm1688_vm12, %v1611_v57  ;;  %v5948_v10 = vpop.permute.xlu0 %1954 }
 0x602   : > { %4472 = vmatprep.mubr.msk.f32.mxu0 %vm1688_vm12, %v1612_v16 }
 0x603   : > { %v5875_v20 = vpop.permute.xlu1 %2043 }
 0x605   : > { %4473 = vmatmul.mubr.msk.f32.gmra.mrb[28].mxu0 %vm1688_vm12, %v1613_v29  ;;  %v5957_v29 = vpop.permute.xlu0 %1958 }
 0x606   : > { %4475 = vmatprep.mubr.msk.f32.mxu0 %vm1688_vm12, %v1614_v58 }
 0x607   : > { %v5877_v32 = vpop.permute.xlu1 %2051 }
 0x609   : > { %4476 = vmatmul.mubr.msk.f32.gmra.mrb[30].mxu0 %vm1688_vm12, %v1615_v8 }
 0x60b   : > { %v5879_v34 = vpop.permute.xlu1 %2059 }
 0x60d   : > { %v5961_v8 = vpop.permute.xlu0 %2039 }
 0x60f   : > { %v5881_v9 = vpop.permute.xlu1 %4651 }
 0x610   : > { %7602 = vst [vmem:[#allocation4_spill] sm:$0xff] %v5881_v9 }
 0x613   : > { %v5883_v36 = vpop.permute.xlu1 %2330 }
 0x614   : > { %7603 = vst [vmem:[#allocation5_spill] sm:$0xff] %v5883_v36 }
 0x617   : > { %v5885_v21 = vpop.permute.xlu1 %2334 }
 0x618   : > { %7604 = vst [vmem:[#allocation6_spill] sm:$0xff] %v5885_v21 }
 0x61b   : > { %v5887_v50 = vpop.permute.xlu1 %2338 }
 0x61c   : > { %7605 = vst [vmem:[#allocation7_spill] sm:$0xff] %v5887_v50 }
 0x61f   : > { %v5901_v4 = vpop.permute.xlu1 %2342 }
 0x620   : > { %7606 = vst [vmem:[#allocation8_spill] sm:$0xff] %v5901_v4 }
 0x623   : > { %v5915_v63 = vpop.permute.xlu1 %2358 }
 0x624   : > { %7607 = vst [vmem:[#allocation9_spill] sm:$0xff] %v5915_v63 }
 0x627   : > { %v5925_v35 = vpop.permute.xlu1 %2362 }
 0x628   : > { %7608 = vst [vmem:[#allocation10_spill] sm:$0xff] %v5925_v35 }
 0x62b   : > { %v5937_v53 = vpop.permute.xlu1 %2366 }
 0x62c   : > { %7609 = vst [vmem:[#allocation11_spill] sm:$0xff] %v5937_v53 }
 0x62f   : > { %v5945_v43 = vpop.permute.xlu1 %2370 }
 0x630   : > { %7611 = vst [vmem:[#allocation12_spill] sm:$0xff] %v5945_v43 }
 0x633   : > { %v5953_v16 = vpop.permute.xlu1 %2495 }
 0x634   : > { %7612 = vst [vmem:[#allocation13_spill] sm:$0xff] %v5953_v16 }
 0x637   : > { %v5959_v58 = vpop.permute.xlu1 %2503 }
 0x638   : > { %7613 = vst [vmem:[#allocation14_spill] sm:$0xff] %v5959_v58 }
 0x6d0   : > { %v5889_v11 = vpop.f32.mrb[24].mxu0 }
 0x6d1   : > { %1881 = vperm.xlu0 %4672, %v5889_v11   ;;  %v5892_v52 = vpop.f32.mrb[25].mxu0  ;;  %v1819_v1 = vmul.f32 %v5889_v11, %v5889_v11 }
 0x6d2   : > { %1876 = vperm.xlu1 %4673, %v5892_v52   ;;  %v1818_v19 = vmul.f32 %v5892_v52, %v5892_v52 }
 0x6d4   : > { %v5899_v44 = vpop.f32.mrb[26].mxu0 }
 0x6d5   : > { %1836 = vrot.lane.b32.xlu0 %v1819_v1, %s4856_s17  ;;  %v5904_v59 = vpop.f32.mrb[27].mxu0  ;;  %v1821_v14 = vmul.f32 %v5899_v44, %v5899_v44  ;;  %v5963_v1 = vpop.permute.xlu1 %2507 }
 0x6d6   : > { %1834 = vrot.lane.b32.xlu1 %v1818_v19, %s4856_s17  ;;  %v1820_v46 = vmul.f32 %v5904_v59, %v5904_v59  ;;  %7614 = vst [vmem:[#allocation15_spill] sm:$0xff] %v5963_v1  ;;  %v5965_v19 = vpop.permute.xlu0 %2047 }
 0x6d8   : > { %v5907_v7 = vpop.f32.mrb[28].mxu0 }
 0x6d9   : > { %v5909_v39 = vpop.f32.mrb[29].mxu0  ;;  %v1823_v26 = vmul.f32 %v5907_v7, %v5907_v7 }
 0x6da   : > { %1891 = vperm.xlu1 %4673, %v5899_v44   ;;  %1896 = vperm.xlu0 %4672, %v5909_v39   ;;  %v1822_v33 = vmul.f32 %v5909_v39, %v5909_v39 }
 0x6dc   : > { %v5917_v55 = vpop.f32.mrb[30].mxu0 }
 0x6dd   : > { %v5919_v18 = vpop.f32.mrb[31].mxu0  ;;  %v1825_v3 = vmul.f32 %v5917_v55, %v5917_v55 }
 0x6de   : > { %1886 = vperm.xlu1 %4673, %v5904_v59   ;;  %1844 = vrot.lane.b32.xlu0 %v1823_v26, %s4856_s17  ;;  %v1824_v57 = vmul.f32 %v5919_v18, %v5919_v18  ;;  %v5967_v26 = vpop.permute.xlu1 %2515 }
 0x6df   : > { %7615 = vst [vmem:[#allocation16_spill] sm:$0xff] %v5967_v26 }
 0x6e2   : > { %1840 = vrot.lane.b32.xlu1 %v1821_v14, %s4856_s17  ;;  %1906 = vperm.xlu0 %4672, %v5919_v18   ;;  %v5969_v14 = vpop.permute.xlu0 %2055 }
 0x6e6   : > { %1838 = vrot.lane.b32.xlu1 %v1820_v46, %s4856_s17  ;;  %1848 = vrot.lane.b32.xlu0 %v1825_v3, %s4856_s17  ;;  %v5971_v46 = vpop.permute.xlu1 %3398  ;;  %v5973_v3 = vpop.permute.xlu0 %2063 }
 0x6e7   : > { %4675 = vset.pattern.permute.xlu0 %v7610_v38  ;;  %7616 = vst [vmem:[#allocation17_spill] sm:$0xff] %v5971_v46  ;;  %7617 = vst [vmem:[#allocation18_spill] sm:$0xff] %v5973_v3 }
 0x6ea   : > { %1901 = vperm.xlu1 %4673, %v5907_v7  }
 0x6ee   : > { %1842 = vrot.lane.b32.xlu1 %v1822_v33, %s4856_s17  ;;  %v5975_v33 = vpop.permute.xlu1 %2634 }
 0x6ef   : > { %7618 = vst [vmem:[#allocation19_spill] sm:$0xff] %v5975_v33 }
 0x6f2   : > { %1911 = vperm.xlu1 %4673, %v5917_v55  }
 0x6f6   : > { %1846 = vrot.lane.b32.xlu1 %v1824_v57, %s4856_s17  ;;  %v5979_v57 = vpop.permute.xlu1 %3402 }
 0x6f7   : > { %4674 = vset.pattern.permute.xlu1 %v7610_v38  ;;  %v5977_v38 = vpop.permute.xlu0 %4656  ;;  %7620 = vst [vmem:[#allocation21_spill] sm:$0xff] %v5979_v57 }
 0x6f8   : > { %7619 = vst [vmem:[#allocation20_spill] sm:$0xff] %v5977_v38 }
 0x6fa   : > { %v5983_v58 = vpop.permute.xlu1 %2638 }
 0x6fb   : > { %v5981_v56 = vpop.permute.xlu0 %2499  ;;  %7622 = vst [vmem:[#allocation23_spill] sm:$0xff] %v5983_v58 }
 0x6fc   : > { %7621 = vst [vmem:[#allocation22_spill] sm:$0xff] %v5981_v56 }
 0x6fe   : > { %v5987_v16 = vpop.permute.xlu1 %3406 }
 0x6ff   : > { %v5985_v1 = vpop.permute.xlu0 %2511  ;;  %7624 = vst [vmem:[#allocation25_spill] sm:$0xff] %v5987_v16 }
 0x700   : > { %7623 = vst [vmem:[#allocation24_spill] sm:$0xff] %v5985_v1 }
 0x702   : > { %v5991_v4 = vpop.permute.xlu1 %2642 }
 0x703   : > { %v5989_v26 = vpop.permute.xlu0 %2519  ;;  %7626 = vst [vmem:[#allocation27_spill] sm:$0xff] %v5991_v4 }
 0x704   : > { %7625 = vst [vmem:[#allocation26_spill] sm:$0xff] %v5989_v26 }
 0x706   : > { %v5995_v53 = vpop.permute.xlu1 %3410 }
 0x707   : > { %v5993_v46 = vpop.permute.xlu0 %2646  ;;  %7628 = vst [vmem:[#allocation29_spill] sm:$0xff] %v5995_v53 }
 0x708   : > { %7627 = vst [vmem:[#allocation28_spill] sm:$0xff] %v5993_v46 }
 0x70a   : > { %v5999_v43 = vpop.permute.xlu1 %3374 }
 0x70b   : > { %v5997_v33 = vpop.permute.xlu0 %4663  ;;  %7630 = vst [vmem:[#allocation31_spill] sm:$0xff] %v5999_v43 }
 0x70c   : > { %7629 = vst [vmem:[#allocation30_spill] sm:$0xff] %v5997_v33 }
 0x70e   : > { %v6003_v56 = vpop.permute.xlu1 %3454 }
 0x70f   : > { %v6001_v50 = vpop.permute.xlu0 %3370  ;;  %7632 = vst [vmem:[#allocation33_spill] sm:$0xff] %v6003_v56 }
 0x710   : > { %7631 = vst [vmem:[#allocation32_spill] sm:$0xff] %v6001_v50 }
 0x712   : > { %v6007_v1 = vpop.permute.xlu1 %4668 }
 0x713   : > { %v6005_v58 = vpop.permute.xlu0 %3382  ;;  %7634 = vst [vmem:[#allocation35_spill] sm:$0xff] %v6007_v1 }
 0x714   : > { %7633 = vst [vmem:[#allocation34_spill] sm:$0xff] %v6005_v58 }
 0x716   : > { %v6011_v26 = vpop.permute.xlu1 %3378 }
 0x717   : > { %v6009_v16 = vpop.permute.xlu0 %3462  ;;  %7636 = vst [vmem:[#allocation37_spill] sm:$0xff] %v6011_v26 }
 0x718   : > { %7635 = vst [vmem:[#allocation36_spill] sm:$0xff] %v6009_v16 }
 0x71a   : > { %v6015_v46 = vpop.permute.xlu1 %3458 }
 0x71b   : > { %v6013_v4 = vpop.permute.xlu0 %3466  ;;  %7638 = vst [vmem:[#allocation39_spill] sm:$0xff] %v6015_v46 }
 0x71c   : > { %7637 = vst [vmem:[#allocation38_spill] sm:$0xff] %v6013_v4 }
 0x750   : > { %v6017_v53 = vpop.permute.xlu0 %1881 }
 0x751   : > { %v6019_v33 = vpop.permute.xlu1 %1876 }
 0x754   : > { %v1837_v43 = vpop.permute.xlu0 %1836 }
 0x755   : > { %v1859_v50 = vsub.f32 %v5889_v11, %v1837_v43  ;;  %v1835_v56 = vpop.permute.xlu1 %1834 }
 0x756   : > { %v1858_v58 = vsub.f32 %v5892_v52, %v1835_v56 }
 0x757   : > { %v1867_v57 = vmax.f32 %v1859_v50, 0.0 }
 0x758   : > { %v1866_v1 = vmax.f32 %v1858_v58, 0.0 }
 0x759   : > { %v1931_v35 = vadd.f32 1e-05, %v1867_v57  ;;  %v6023_v16 = vpop.permute.xlu1 %1891  ;;  %v6025_v26 = vpop.permute.xlu0 %1896 }
 0x75a   : > { %v1930_v4 = vadd.f32 1e-05, %v1866_v1 }
 0x75b   : > { %4767 = vrsqrt.f32 %v1931_v35 }
 0x75c   : > { %4769 = vrsqrt.f32 %v1930_v4 }
 0x75d   : > { %v6027_v46 = vpop.permute.xlu1 %1886  ;;  %v1845_v38 = vpop.permute.xlu0 %1844 }
 0x75e   : > { %v1863_v21 = vsub.f32 %v5907_v7, %v1845_v38 }
 0x760   : > { %v1871_v36 = vmax.f32 %v1863_v21, 0.0 }
 0x761   : > { %v1841_v11 = vpop.permute.xlu1 %1840  ;;  %v6030_v43 = vpop.permute.xlu0 %1906 }
 0x762   : > { %v1861_v56 = vsub.f32 %v5899_v44, %v1841_v11  ;;  %v1935_v58 = vadd.f32 1e-05, %v1871_v36 }
 0x764   : > { %v1869_v50 = vmax.f32 %v1861_v56, 0.0 }
 0x765   : > { %v4768_v52 = vpop.eup %4767  ;;  %v1839_v57 = vpop.permute.xlu1 %1838 }
 0x766   : > { %v1849_v63 = vpop.permute.xlu0 %1848  ;;  %v4770_v9 = vpop.eup %4769  ;;  %v1933_v1 = vadd.f32 1e-05, %v1869_v50  ;;  %v1860_v4 = vsub.f32 %v5904_v59, %v1839_v57  ;;  %v1971_v3 = vmul.f32 %v4768_v52, %v5865_v17 }
 0x767   : > { %v1865_v35 = vsub.f32 %v5917_v55, %v1849_v63  ;;  %v1970_v21 = vmul.f32 %v4770_v9, %v5933_v22 }
 0x768   : > { %4771 = vrsqrt.f32 %v1933_v1  ;;  %v1868_v7 = vmax.f32 %v1860_v4, 0.0  ;;  %1985 = vperm.xlu1 %4674, %v1971_v3  }
 0x769   : > { %v1873_v38 = vmax.f32 %v1865_v35, 0.0  ;;  %v6037_v44 = vpop.permute.xlu1 %1901  ;;  %1980 = vperm.xlu0 %4675, %v1970_v21   ;;  %4773 = vrsqrt.f32 %v1935_v58 }
 0x76a   : > { %v1932_v36 = vadd.f32 1e-05, %v1868_v7 }
 0x76b   : > { %v1937_v11 = vadd.f32 1e-05, %v1873_v38 }
 0x76c   : > { %4775 = vrsqrt.f32 %v1932_v36  ;;  %v1917_v36 = vsub.f32 %v5675_v60, %v6017_v53 }
 0x76d   : > { %v1843_v56 = vpop.permute.xlu1 %1842  ;;  %4777 = vrsqrt.f32 %v1937_v11  ;;  %v1915_v11 = vsub.f32 %v5668_v0, %v6019_v33 }
 0x76e   : > { %v1862_v59 = vsub.f32 %v5909_v39, %v1843_v56 }
 0x770   : > { %v1870_v63 = vmax.f32 %v1862_v59, 0.0 }
 0x771   : > { %v6040_v55 = vpop.permute.xlu1 %1911 }
 0x772   : > { %v4772_v17 = vpop.eup %4771  ;;  %v1934_v9 = vadd.f32 1e-05, %v1870_v63 }
 0x773   : > { %v1973_v22 = vmul.f32 %v4772_v17, %v5867_v24  ;;  %v4774_v50 = vpop.eup %4773 }
 0x774   : > { %4779 = vrsqrt.f32 %v1934_v9  ;;  %v1975_v1 = vmul.f32 %v4774_v50, %v5869_v45  ;;  %v1916_v45 = vsub.f32 %v5643_v49, %v6017_v53 }
 0x775   : > { %v1847_v3 = vpop.permute.xlu1 %1846  ;;  %1995 = vperm.xlu0 %4675, %v1973_v22  }
 0x776   : > { %v4776_v52 = vpop.eup %4775  ;;  %v1864_v58 = vsub.f32 %v5919_v18, %v1847_v3 }
 0x777   : > { %v1972_v57 = vmul.f32 %v4776_v52, %v5943_v15  ;;  %v4778_v4 = vpop.eup %4777  ;;  %v7639_v15 = vmov 3  }
 0x778   : > { %v1872_v39 = vmax.f32 %v1864_v58, 0.0  ;;  %v1977_v21 = vmul.f32 %v4778_v4, %v5871_v62  ;;  %v1914_v62 = vsub.f32 %v5640_v12, %v6019_v33 }
 0x779   : > { %1990 = vperm.xlu1 %4674, %v1972_v57   ;;  %2005 = vperm.xlu0 %4675, %v1975_v1  }
 0x77a   : > { %v1936_v35 = vadd.f32 1e-05, %v1872_v39 }
 0x77c   : > { %4781 = vrsqrt.f32 %v1936_v35 }
 0x77d   : > { %2015 = vperm.xlu0 %4675, %v1977_v21  }
 0x77e   : > { %v4780_v24 = vpop.eup %4779 }
 0x77f   : > { %v1974_v7 = vmul.f32 %v4780_v24, %v5948_v10 }
 0x781   : > { %2000 = vperm.xlu1 %4674, %v1974_v7  }
 0x786   : > { %v4782_v38 = vpop.eup %4781 }
 0x787   : > { %v1976_v18 = vmul.f32 %v4782_v38, %v5957_v29 }
 0x789   : > { %2010 = vperm.xlu1 %4674, %v1976_v18   ;;  %v1918_v18 = vsub.f32 %v5645_v41, %v6027_v46 }
 0x78d   : > { %4676 = vset.pattern.permute.xlu1 %v7639_v15 }
 0x7e7   : > { %v1986_v10 = vpop.permute.xlu1 %1985 }
 0x7e8   : > { %v2020_v56 = vmul.f32 %v1986_v10, %v1916_v45  ;;  %v2021_v59 = vmul.f32 %v1986_v10, %v1917_v36  ;;  %v1981_v63 = vpop.permute.xlu0 %1980 }
 0x7e9   : > { %v2018_v29 = vmul.f32 %v1981_v63, %v1914_v62  ;;  %v2019_v17 = vmul.f32 %v1981_v63, %v1915_v11  ;;  %v1920_v11 = vsub.f32 %v5651_v2, %v6023_v16 }
 0x7ea   : > { %v2068_v9 = vadd.f32 %v5961_v8, %v2020_v56  ;;  %v2069_v22 = vadd.f32 %v5961_v8, %v2021_v59 }
 0x7eb   : > { %v2066_v49 = vadd.f32 %v5873_v47, %v2018_v29  ;;  %v2067_v60 = vadd.f32 %v5873_v47, %v2019_v17 }
 0x7ec   : > { %v2084_v53 = vsub.f32 0.0, %v2068_v9  ;;  %v2085_v50 = vsub.f32 0.0, %v2069_v22 }
 0x7ed   : > { %v2082_v12 = vsub.f32 0.0, %v2066_v49  ;;  %v2083_v3 = vsub.f32 0.0, %v2067_v60 }
 0x7ee   : > { %v2102_v52 = vmul.f32 1.442695, %v2084_v53  ;;  %v2104_v0 = vmul.f32 1.442695, %v2085_v50 }
 0x7ef   : > { %v2098_v33 = vmul.f32 1.442695, %v2082_v12  ;;  %v2100_v58 = vmul.f32 1.442695, %v2083_v3 }
 0x7f0   : > { %4783 = vpow2.f32 %v2102_v52 }
 0x7f1   : > { %4785 = vpow2.f32 %v2104_v0 }
 0x7f2   : > { %4787 = vpow2.f32 %v2098_v33 }
 0x7f3   : > { %4789 = vpow2.f32 %v2100_v58 }
 0x7f4   : > { %v1996_v36 = vpop.permute.xlu0 %1995 }
 0x7f5   : > { %v2024_v17 = vmul.f32 %v1996_v36, %v1920_v11 }
 0x7f7   : > { %v6078_v2 = vadd.f32 %v5965_v19, %v2024_v17 }
 0x7f8   : > { %v1991_v7 = vpop.permute.xlu1 %1990 }
 0x7f9   : > { %v2022_v56 = vmul.f32 %v1991_v7, %v1918_v18 }
 0x7fa   : > { %v4784_v57 = vpop.eup %4783 }
 0x7fb   : > { %v4786_v1 = vpop.eup %4785  ;;  %v2132_v4 = vadd.f32 1.0, %v4784_v57  ;;  %v6069_v53 = vadd.f32 %v5875_v20, %v2022_v56  ;;  %v2006_v56 = vpop.permute.xlu0 %2005 }
 0x7fc   : > { %v4788_v8 = vpop.eup %4787  ;;  %v2133_v39 = vadd.f32 1.0, %v4786_v1 }
 0x7fd   : > { %v4790_v35 = vpop.eup %4789  ;;  %4791 = vrcp.f32 %v2132_v4  ;;  %v2130_v47 = vadd.f32 1.0, %v4788_v8 }
 0x7fe   : > { %4793 = vrcp.f32 %v2133_v39  ;;  %v2131_v21 = vadd.f32 1.0, %v4790_v35 }
 0x7ff   : > { %4795 = vrcp.f32 %v2130_v47 }
 0x800   : > { %4797 = vrcp.f32 %v2131_v21 }
 0x807   : > { %v4792_v24 = vpop.eup %4791 }
 0x808   : > { %v4794_v38 = vpop.eup %4793  ;;  %v2164_v15 = vmul.f32 %v4792_v24, %v2068_v9  ;;  %v2086_v9 = vsub.f32 0.0, %v6069_v53 }
 0x809   : > { %v4796_v45 = vpop.eup %4795  ;;  %v2165_v59 = vmul.f32 %v4794_v38, %v2069_v22  ;;  %v1919_v22 = vsub.f32 %v5666_v28, %v6027_v46 }
 0x80a   : > { %v4798_v62 = vpop.eup %4797  ;;  %v2162_v10 = vmul.f32 %v4796_v45, %v2066_v49  ;;  %v2088_v49 = vsub.f32 0.0, %v6078_v2  ;;  %v2106_v12 = vmul.f32 1.442695, %v2086_v9 }
 0x80b   : > { %v2163_v63 = vmul.f32 %v4798_v62, %v2067_v60  ;;  %v1921_v60 = vsub.f32 %v5671_v54, %v6023_v16  ;;  %v2023_v50 = vmul.f32 %v1991_v7, %v1919_v22  ;;  %v1922_v62 = vsub.f32 %v5654_v51, %v6025_v26 }
 0x80c   : > { %v6066_v29 = vpack.c.bf16 %v2164_v15, %v2162_v10  ;;  %v2110_v52 = vmul.f32 1.442695, %v2088_v49  ;;  %4799 = vpow2.f32 %v2106_v12 }
 0x80d   : > { %v6075_v41 = vpack.c.bf16 %v2165_v59, %v2163_v63  ;;  %v2025_v3 = vmul.f32 %v1996_v36, %v1921_v60  ;;  %v6097_v28 = vadd.f32 %v5875_v20, %v2023_v50  ;;  %v2001_v36 = vpop.permute.xlu1 %2000  ;;  %v1924_v59 = vsub.f32 %v5659_v40, %v6037_v44 }
 0x80e   : > { %2378 = vrot.lane.b32.xlu1 %v6066_v29, %s4864_s13  ;;  %2304 = vrot.lane.b32.xlu0 %v6066_v29, %s4861_s9  ;;  %v2251_v0 = vmul.bf16 %v6066_v29, %v5085_v30  ;;  %4801 = vpow2.f32 %v2110_v52  ;;  %v2259_v16 = vmul.bf16 %v6066_v29, %v5087_v31  ;;  %v2270_v33 = vmul.bf16 %v6066_v29, %v5076_v23 }
 0x80f   : > { %v6103_v54 = vadd.f32 %v5965_v19, %v2025_v3  ;;  %v2087_v46 = vsub.f32 0.0, %v6097_v28  ;;  %v2271_v19 = vmul.bf16 %v6075_v41, %v5076_v23  ;;  %v2278_v4 = vmul.bf16 %v6066_v29, %v5080_v25 }
 0x810   : > { %v2279_v8 = vmul.bf16 %v6075_v41, %v5080_v25  ;;  %v2286_v47 = vmul.bf16 %v6066_v29, %v5082_v27  ;;  %v2287_v21 = vmul.bf16 %v6075_v41, %v5082_v27  ;;  %v3221_v7 = vmul.bf16 %v6075_v41, %v5085_v30 }
 0x811   : > { %v2089_v20 = vsub.f32 0.0, %v6103_v54  ;;  %v2108_v58 = vmul.f32 1.442695, %v2087_v46  ;;  %v3229_v18 = vmul.bf16 %v6075_v41, %v5087_v31  ;;  %v2026_v63 = vmul.f32 %v2001_v36, %v1922_v62  ;;  %v2011_v62 = vpop.permute.xlu1 %2010 }
 0x812   : > { %2446 = vrot.lane.b32.xlu1 %v6066_v29, %s4870_s20  ;;  %2448 = vrot.lane.b32.xlu0 %v6075_v41, %s4870_s20  ;;  %v2028_v22 = vmul.f32 %v2006_v56, %v1924_v59  ;;  %v2243_v49 = vmul.bf16 %v6066_v29, %v5115_v42 }
 0x813   : > { %v2112_v1 = vmul.f32 1.442695, %v2089_v20  ;;  %4803 = vpow2.f32 %v2108_v58  ;;  %v6149_v60 = vadd.f32 %v5877_v32, %v2026_v63  ;;  %v1925_v20 = vsub.f32 %v5695_v13, %v6037_v44 }
 0x814   : > { %v6156_v50 = vadd.f32 %v5969_v14, %v2028_v22 }
 0x815   : > { %4805 = vpow2.f32 %v2112_v1  ;;  %v2029_v58 = vmul.f32 %v2006_v56, %v1925_v20 }
 0x816   : > { %3276 = vrot.lane.b32.xlu1 %v6066_v29, %s4861_s9  ;;  %3278 = vrot.lane.b32.xlu0 %v6075_v41, %s4861_s9  ;;  %v4800_v57 = vpop.eup %4799  ;;  %v2092_v29 = vsub.f32 0.0, %v6156_v50 }
 0x817   : > { %v2134_v35 = vadd.f32 1.0, %v4800_v57  ;;  %v6188_v13 = vadd.f32 %v5969_v14, %v2029_v58 }
 0x818   : > { %v4802_v39 = vpop.eup %4801  ;;  %v2118_v46 = vmul.f32 1.442695, %v2092_v29 }
 0x819   : > { %v2136_v24 = vadd.f32 1.0, %v4802_v39  ;;  %4807 = vrcp.f32 %v2134_v35 }
 0x81a   : > { %3352 = vrot.lane.b32.xlu1 %v6075_v41, %s4864_s13  ;;  %2332 = vrot.lane.b32.xlu0 %v2251_v0, %s4865_s14 }
 0x81b   : > { %4809 = vrcp.f32 %v2136_v24 }
 0x81d   : > { %v4804_v38 = vpop.eup %4803 }
 0x81e   : > { %3424 = vrot.lane.b32.xlu1 %v6075_v41, %s4870_s20  ;;  %2360 = vrot.lane.b32.xlu0 %v2259_v16, %s4867_s16  ;;  %v2135_v45 = vadd.f32 1.0, %v4804_v38 }
 0x81f   : > { %v4806_v15 = vpop.eup %4805 }
 0x820   : > { %v2137_v10 = vadd.f32 1.0, %v4806_v15  ;;  %4811 = vrcp.f32 %v2135_v45 }
 0x822   : > { %2394 = vrot.lane.b32.xlu1 %v2270_v33, %s4866_s15  ;;  %2396 = vrot.lane.b32.xlu0 %v2271_v19, %s4866_s15  ;;  %4813 = vrcp.f32 %v2137_v10 }
 0x823   : > { %v4808_v11 = vpop.eup %4807 }
 0x824   : > { %v2166_v9 = vmul.f32 %v4808_v11, %v6069_v53  ;;  %v2090_v53 = vsub.f32 0.0, %v6149_v60  ;;  %v1926_v11 = vsub.f32 %v5661_v61, %v6030_v43  ;;  %v1927_v61 = vsub.f32 %v5699_v48, %v6030_v43  ;;  %v7640_v43 = vld [vmem:[#allocation18_spill] sm:$0xff] }
 0x825   : > { %v4810_v17 = vpop.eup %4809 }
 0x826   : > { %2422 = vrot.lane.b32.xlu1 %v2278_v4, %s4868_s18  ;;  %2424 = vrot.lane.b32.xlu0 %v2279_v8, %s4868_s18  ;;  %v2168_v51 = vmul.f32 %v4810_v17, %v6078_v2  ;;  %v3213_v2 = vmul.bf16 %v6075_v41, %v5115_v42  ;;  %v2114_v3 = vmul.f32 1.442695, %v2090_v53  ;;  %v2016_v17 = vpop.permute.xlu0 %2015 }
 0x828   : > { %v6153_v40 = vpack.c.bf16 %v2168_v51, %v2166_v9  ;;  %4815 = vpow2.f32 %v2114_v3  ;;  %v1928_v9 = vsub.f32 %v5664_v37, %v6040_v55  ;;  %v1929_v37 = vsub.f32 %v5706_v5, %v6040_v55 }
 0x829   : > { %4817 = vpow2.f32 %v2118_v46 }
 0x82a   : > { %2474 = vrot.lane.b32.xlu1 %v2286_v47, %s4869_s19  ;;  %2476 = vrot.lane.b32.xlu0 %v2287_v21, %s4869_s19  ;;  %v4812_v12 = vpop.eup %4811  ;;  %v2261_v39 = vmul.bf16 %v6153_v40, %v5087_v31  ;;  %v2288_v47 = vmul.bf16 %v6153_v40, %v5082_v27  ;;  %v2245_v59 = vmul.bf16 %v6153_v40, %v5115_v42 }
 0x82b   : > { %v2032_v51 = vmul.f32 %v2016_v17, %v1928_v9  ;;  %v2033_v48 = vmul.f32 %v2016_v17, %v1929_v37 }
 0x82c   : > { %v4814_v52 = vpop.eup %4813 }
 0x82d   : > { %v2169_v33 = vmul.f32 %v4814_v52, %v6103_v54  ;;  %v2253_v54 = vmul.bf16 %v6153_v40, %v5085_v30  ;;  %v6249_v29 = vadd.f32 %v7640_v43, %v2032_v51  ;;  %v6259_v5 = vadd.f32 %v7640_v43, %v2033_v48 }
 0x82e   : > { %3304 = vrot.lane.b32.xlu1 %v2251_v0, %s4865_s14  ;;  %3306 = vrot.lane.b32.xlu0 %v3221_v7, %s4865_s14  ;;  %v1923_v0 = vsub.f32 %v5690_v6, %v6025_v26 }
 0x82f   : > { %v2096_v55 = vsub.f32 0.0, %v6249_v29 }
 0x830   : > { %v2027_v41 = vmul.f32 %v2001_v36, %v1923_v0 }
 0x831   : > { %v2126_v46 = vmul.f32 1.442695, %v2096_v55 }
 0x832   : > { %3332 = vrot.lane.b32.xlu1 %v2259_v16, %s4867_s16  ;;  %3334 = vrot.lane.b32.xlu0 %v3229_v18, %s4867_s16  ;;  %v2167_v16 = vmul.f32 %v4812_v12, %v6097_v28  ;;  %v6181_v6 = vadd.f32 %v5877_v32, %v2027_v41  ;;  %v4816_v44 = vpop.eup %4815  ;;  %v2093_v32 = vsub.f32 0.0, %v6188_v13  ;;  %v2272_v28 = vmul.bf16 %v6153_v40, %v5076_v23 }
 0x833   : > { %v4818_v57 = vpop.eup %4817  ;;  %v2138_v1 = vadd.f32 1.0, %v4816_v44 }
 0x834   : > { %v2091_v26 = vsub.f32 0.0, %v6181_v6  ;;  %v2120_v4 = vmul.f32 1.442695, %v2093_v32  ;;  %v2140_v35 = vadd.f32 1.0, %v4818_v57 }
 0x836   : > { %3368 = vrot.lane.b32.xlu1 %v2271_v19, %s4866_s15  ;;  %3396 = vrot.lane.b32.xlu0 %v2279_v8, %s4868_s18  ;;  %v6178_v19 = vpack.c.bf16 %v2169_v33, %v2167_v16  ;;  %v2116_v14 = vmul.f32 1.442695, %v2091_v26  ;;  %v2280_v8 = vmul.bf16 %v6153_v40, %v5080_v25  ;;  %v2097_v16 = vsub.f32 0.0, %v6259_v5 }
 0x838   : > { %4819 = vpow2.f32 %v2116_v14  ;;  %v2281_v24 = vmul.bf16 %v6178_v19, %v5080_v25  ;;  %v2289_v38 = vmul.bf16 %v6178_v19, %v5082_v27  ;;  %v3223_v56 = vmul.bf16 %v6178_v19, %v5085_v30 }
 0x839   : > { %4821 = vrcp.f32 %v2138_v1  ;;  %v2128_v58 = vmul.f32 1.442695, %v2097_v16 }
 0x83a   : > { %3480 = vrot.lane.b32.xlu1 %v2243_v49, %s4862_s11  ;;  %2636 = vrot.lane.b32.xlu0 %v2243_v49, %s4862_s11  ;;  %4823 = vpow2.f32 %v2120_v4  ;;  %v2030_v49 = vmul.f32 %v2011_v62, %v1926_v11 }
 0x83b   : > { %4825 = vrcp.f32 %v2140_v35 }
 0x83c   : > { %v6243_v53 = vadd.f32 %v5879_v34, %v2030_v49 }
 0x83e   : > { %3452 = vrot.lane.b32.xlu0 %v2287_v21, %s4869_s19  ;;  %2308 = vrot.lane.b32.xlu1 %v6153_v40, %s4861_s9  ;;  %v2273_v21 = vmul.bf16 %v6178_v19, %v5076_v23  ;;  %v2094_v12 = vsub.f32 0.0, %v6243_v53 }
 0x840   : > { %v2122_v0 = vmul.f32 1.442695, %v2094_v12 }
 0x842   : > { %3482 = vrot.lane.b32.xlu0 %v3213_v2, %s4862_s11  ;;  %2450 = vrot.lane.b32.xlu1 %v6153_v40, %s4870_s20  ;;  %v4820_v7 = vpop.eup %4819 }
 0x843   : > { %v4822_v18 = vpop.eup %4821  ;;  %v2139_v36 = vadd.f32 1.0, %v4820_v7 }
 0x844   : > { %v4824_v15 = vpop.eup %4823  ;;  %v2170_v10 = vmul.f32 %v4822_v18, %v6149_v60 }
 0x845   : > { %v4826_v45 = vpop.eup %4825  ;;  %v2141_v63 = vadd.f32 1.0, %v4824_v15  ;;  %4827 = vrcp.f32 %v2139_v36 }
 0x846   : > { %2380 = vrot.lane.b32.xlu0 %v6153_v40, %s4864_s13  ;;  %3280 = vrot.lane.b32.xlu1 %v6153_v40, %s4861_s9  ;;  %v2172_v22 = vmul.f32 %v4826_v45, %v6156_v50  ;;  %v3231_v40 = vmul.bf16 %v6178_v19, %v5087_v31  ;;  %v2031_v50 = vmul.f32 %v2011_v62, %v1927_v61 }
 0x847   : > { %4829 = vrcp.f32 %v2141_v63 }
 0x848   : > { %v6236_v60 = vpack.c.bf16 %v2172_v22, %v2170_v10  ;;  %v6252_v2 = vadd.f32 %v5879_v34, %v2031_v50  ;;  %4831 = vpow2.f32 %v2122_v0 }
 0x849   : > { %4833 = vpow2.f32 %v2126_v46 }
 0x84a   : > { %2452 = vrot.lane.b32.xlu0 %v6178_v19, %s4870_s20  ;;  %3354 = vrot.lane.b32.xlu1 %v6178_v19, %s4864_s13  ;;  %v2095_v52 = vsub.f32 0.0, %v6252_v2  ;;  %v2255_v7 = vmul.bf16 %v6236_v60, %v5085_v30  ;;  %v2263_v45 = vmul.bf16 %v6236_v60, %v5087_v31  ;;  %v2247_v22 = vmul.bf16 %v6236_v60, %v5115_v42 }
 0x84c   : > { %v2124_v41 = vmul.f32 1.442695, %v2095_v52 }
 0x84e   : > { %3282 = vrot.lane.b32.xlu0 %v6178_v19, %s4861_s9  ;;  %3428 = vrot.lane.b32.xlu1 %v6178_v19, %s4870_s20  ;;  %4835 = vpow2.f32 %v2124_v41 }
 0x84f   : > { %v4828_v3 = vpop.eup %4827  ;;  %4837 = vpow2.f32 %v2128_v58 }
 0x850   : > { %v2171_v20 = vmul.f32 %v4828_v3, %v6181_v6  ;;  %v3215_v6 = vmul.bf16 %v6178_v19, %v5115_v42 }
 0x851   : > { %v4830_v34 = vpop.eup %4829 }
 0x852   : > { %2398 = vrot.lane.b32.xlu1 %v2272_v28, %s4866_s15  ;;  %2336 = vrot.lane.b32.xlu0 %v2253_v54, %s4865_s14  ;;  %v2173_v33 = vmul.f32 %v4830_v34, %v6188_v13  ;;  %v2274_v13 = vmul.bf16 %v6236_v60, %v5076_v23  ;;  %v4832_v44 = vpop.eup %4831 }
 0x853   : > { %v4834_v57 = vpop.eup %4833  ;;  %v2142_v19 = vadd.f32 1.0, %v4832_v44 }
 0x854   : > { %v6272_v26 = vpack.c.bf16 %v2173_v33, %v2171_v20 }
 0x855   : > { %4839 = vrcp.f32 %v2142_v19 }
 0x856   : > { %2426 = vrot.lane.b32.xlu1 %v2280_v8, %s4868_s18  ;;  %2364 = vrot.lane.b32.xlu0 %v2261_v39, %s4867_s16  ;;  %v2290_v8 = vmul.bf16 %v6236_v60, %v5082_v27  ;;  %v2291_v11 = vmul.bf16 %v6272_v26, %v5082_v27  ;;  %v2275_v9 = vmul.bf16 %v6272_v26, %v5076_v23 }
 0x857   : > { %v2283_v48 = vmul.bf16 %v6272_v26, %v5080_v25  ;;  %v3233_v34 = vmul.bf16 %v6272_v26, %v5087_v31 }
 0x858   : > { %v4836_v14 = vpop.eup %4835 }
 0x859   : > { %v4838_v35 = vpop.eup %4837 }
 0x85a   : > { %2478 = vrot.lane.b32.xlu1 %v2288_v47, %s4869_s19  ;;  %2400 = vrot.lane.b32.xlu0 %v2273_v21, %s4866_s15  ;;  %v2143_v47 = vadd.f32 1.0, %v4836_v14  ;;  %v3217_v14 = vmul.bf16 %v6272_v26, %v5115_v42 }
 0x85e   : > { %3308 = vrot.lane.b32.xlu1 %v2253_v54, %s4865_s14  ;;  %2428 = vrot.lane.b32.xlu0 %v2281_v24, %s4868_s18  ;;  %v2282_v54 = vmul.bf16 %v6236_v60, %v5080_v25 }
 0x85f   : > { %v4840_v10 = vpop.eup %4839 }
 0x862   : > { %3336 = vrot.lane.b32.xlu1 %v2261_v39, %s4867_s16  ;;  %2480 = vrot.lane.b32.xlu0 %v2289_v38, %s4869_s19  ;;  %v2144_v39 = vadd.f32 1.0, %v4834_v57 }
 0x864   : > { %4841 = vrcp.f32 %v2144_v39 }
 0x865   : > { %4843 = vrcp.f32 %v2143_v47 }
 0x866   : > { %3310 = vrot.lane.b32.xlu0 %v3223_v56, %s4865_s14  ;;  %3484 = vrot.lane.b32.xlu1 %v2245_v59, %s4862_s11 }
 0x86a   : > { %3338 = vrot.lane.b32.xlu0 %v3231_v40, %s4867_s16  ;;  %2312 = vrot.lane.b32.xlu1 %v6236_v60, %s4861_s9 }
 0x86e   : > { %3400 = vrot.lane.b32.xlu0 %v2281_v24, %s4868_s18  ;;  %2382 = vrot.lane.b32.xlu1 %v6236_v60, %s4864_s13  ;;  %v4842_v56 = vpop.eup %4841 }
 0x86f   : > { %v4844_v49 = vpop.eup %4843  ;;  %v2176_v61 = vmul.f32 %v4842_v56, %v6249_v29 }
 0x870   : > { %v2175_v40 = vmul.f32 %v4844_v49, %v6252_v2 }
 0x872   : > { %2640 = vrot.lane.b32.xlu0 %v2245_v59, %s4862_s11  ;;  %2454 = vrot.lane.b32.xlu1 %v6236_v60, %s4870_s20  ;;  %v2174_v59 = vmul.f32 %v4840_v10, %v6243_v53 }
 0x874   : > { %v2184_v37 = vpack.c.bf16 %v2176_v61, %v2174_v59  ;;  %v7642_v59 = vld [vmem:[#allocation4_spill] sm:$0xff] }
 0x876   : > { %3372 = vrot.lane.b32.xlu0 %v2273_v21, %s4866_s15  ;;  %3284 = vrot.lane.b32.xlu1 %v6236_v60, %s4861_s9  ;;  %v2276_v3 = vmul.bf16 %v2184_v37, %v5076_v23  ;;  %v2284_v16 = vmul.bf16 %v2184_v37, %v5080_v25  ;;  %v2292_v33 = vmul.bf16 %v2184_v37, %v5082_v27 }
 0x87a   : > { %3456 = vrot.lane.b32.xlu0 %v2289_v38, %s4869_s19  ;;  %3356 = vrot.lane.b32.xlu1 %v6272_v26, %s4864_s13  ;;  %v2145_v38 = vadd.f32 1.0, %v4838_v35 }
 0x87c   : > { %4845 = vrcp.f32 %v2145_v38 }
 0x87e   : > { %3486 = vrot.lane.b32.xlu0 %v3215_v6, %s4862_s11  ;;  %2402 = vrot.lane.b32.xlu1 %v2274_v13, %s4866_s15  ;;  %v2257_v6 = vmul.bf16 %v2184_v37, %v5085_v30 }
 0x880   : > { %v6283_v32 = vpop.permute.xlu1 %2378  ;;  %v6285_v28 = vpop.permute.xlu0 %2304 }
 0x882   : > { %2456 = vrot.lane.b32.xlu0 %v6272_v26, %s4870_s20  ;;  %2430 = vrot.lane.b32.xlu1 %v2282_v54, %s4868_s18  ;;  %v2265_v54 = vmul.bf16 %v2184_v37, %v5087_v31 }
 0x884   : > { %v6292_v1 = vpop.permute.xlu1 %2446  ;;  %v6294_v4 = vpop.permute.xlu0 %2448 }
 0x886   : > { %3286 = vrot.lane.b32.xlu0 %v6272_v26, %s4861_s9  ;;  %2482 = vrot.lane.b32.xlu1 %v2290_v8, %s4869_s19  ;;  %v4846_v51 = vpop.eup %4845  ;;  %v2249_v8 = vmul.bf16 %v2184_v37, %v5115_v42 }
 0x887   : > { %v2177_v60 = vmul.f32 %v4846_v51, %v6259_v5  ;;  %v3225_v5 = vmul.bf16 %v6272_v26, %v5085_v30 }
 0x888   : > { %v6301_v21 = vpop.permute.xlu1 %3276  ;;  %v6303_v24 = vpop.permute.xlu0 %3278 }
 0x889   : > { %v6348_v43 = vpack.c.bf16 %v2177_v60, %v2175_v40  ;;  %v3292_v40 = vsel %vm766_vm4, %v6301_v21, %v6303_v24 }
 0x88a   : > { %3432 = vrot.lane.b32.xlu0 %v6272_v26, %s4870_s20  ;;  %3312 = vrot.lane.b32.xlu1 %v2255_v7, %s4865_s14 }
 0x88b   : > { %v2277_v47 = vmul.bf16 %v6348_v43, %v5076_v23  ;;  %v2293_v38 = vmul.bf16 %v6348_v43, %v5082_v27 }
 0x88c   : > { %v6310_v18 = vpop.permute.xlu1 %3352  ;;  %v6312_v15 = vpop.permute.xlu0 %2332 }
 0x88e   : > { %3340 = vrot.lane.b32.xlu1 %v2263_v45, %s4867_s16  ;;  %2340 = vrot.lane.b32.xlu0 %v2255_v7, %s4865_s14 }
 0x890   : > { %v6318_v36 = vpop.permute.xlu1 %3424  ;;  %v6320_v62 = vpop.permute.xlu0 %2360 }
 0x892   : > { %3460 = vrot.lane.b32.xlu1 %v2291_v11, %s4869_s19  ;;  %2368 = vrot.lane.b32.xlu0 %v2263_v45, %s4867_s16 }
 0x894   : > { %v6327_v63 = vpop.permute.xlu1 %2394  ;;  %v6329_v17 = vpop.permute.xlu0 %2396 }
 0x896   : > { %2404 = vrot.lane.b32.xlu0 %v2275_v9, %s4866_s15  ;;  %3488 = vrot.lane.b32.xlu1 %v2247_v22, %s4862_s11 }
 0x898   : > { %v6339_v50 = vpop.permute.xlu1 %2422  ;;  %v6341_v53 = vpop.permute.xlu0 %2424 }
 0x89a   : > { %2432 = vrot.lane.b32.xlu0 %v2283_v48, %s4868_s18  ;;  %2458 = vrot.lane.b32.xlu1 %v2184_v37, %s4870_s20 }
 0x89c   : > { %v6350_v29 = vpop.permute.xlu1 %2474  ;;  %v6352_v12 = vpop.permute.xlu0 %2476 }
 0x89e   : > { %2484 = vrot.lane.b32.xlu0 %v2291_v11, %s4869_s19  ;;  %3290 = vrot.lane.b32.xlu1 %v6348_v43, %s4861_s9 }
 0x8a0   : > { %v6357_v2 = vpop.permute.xlu1 %3304  ;;  %v6359_v55 = vpop.permute.xlu0 %3306 }
 0x8a2   : > { %3314 = vrot.lane.b32.xlu0 %v3225_v5, %s4865_s14  ;;  %2406 = vrot.lane.b32.xlu1 %v2276_v3, %s4866_s15 }
 0x8a4   : > { %v6366_v52 = vpop.permute.xlu1 %3332  ;;  %v6368_v0 = vpop.permute.xlu0 %3334 }
 0x8a6   : > { %3342 = vrot.lane.b32.xlu0 %v3233_v34, %s4867_s16  ;;  %2434 = vrot.lane.b32.xlu1 %v2284_v16, %s4868_s18  ;;  %v2285_v34 = vmul.bf16 %v6348_v43, %v5080_v25  ;;  %v3227_v25 = vmul.bf16 %v6348_v43, %v5085_v30 }
 0x8a8   : > { %v6375_v46 = vpop.permute.xlu1 %3368  ;;  %v6377_v20 = vpop.permute.xlu0 %3396 }
 0x8aa   : > { %3404 = vrot.lane.b32.xlu0 %v2283_v48, %s4868_s18  ;;  %2486 = vrot.lane.b32.xlu1 %v2292_v33, %s4869_s19 }
 0x8ac   : > { %v6382_v41 = vpop.permute.xlu1 %3480  ;;  %v6384_v58 = vpop.permute.xlu0 %2636 }
 0x8ad   : > { %7641 = vst [vmem:[#allocation18_spill] sm:$0xff] %v6382_v41 }
 0x8ae   : > { %2644 = vrot.lane.b32.xlu0 %v2247_v22, %s4862_s11  ;;  %3316 = vrot.lane.b32.xlu1 %v2257_v6, %s4865_s14 }
 0x8b0   : > { %v6389_v13 = vpop.permute.xlu1 %2308  ;;  %v6391_v44 = vpop.permute.xlu0 %3452 }
 0x8b2   : > { %3376 = vrot.lane.b32.xlu0 %v2275_v9, %s4866_s15  ;;  %3344 = vrot.lane.b32.xlu1 %v2265_v54, %s4867_s16  ;;  %v4653_v9 = vunpack.i.l.bf16 %v7642_v59 }
 0x8b4   : > { %v6396_v57 = vpop.permute.xlu1 %2450  ;;  %v6398_v19 = vpop.permute.xlu0 %3482  ;;  %v2318_v61 = vsel %vm766_vm4, %v4653_v9, %v6285_v28  ;;  %v7644_v9 = vld [vmem:[#allocation9_spill] sm:$0xff] }
 0x8b6   : > { %3490 = vrot.lane.b32.xlu0 %v3217_v14, %s4862_s11  ;;  %2648 = vrot.lane.b32.xlu1 %v2249_v8, %s4862_s11  ;;  %v2410_v14 = vsel %vm815_vm6, %v6327_v63, %v6329_v17 }
 0x8b8   : > { %v6405_v39 = vpop.permute.xlu1 %3280  ;;  %v6407_v35 = vpop.permute.xlu0 %2380 }
 0x8ba   : > { %2316 = vrot.lane.b32.xlu0 %v2184_v37, %s4861_s9  ;;  %3380 = vrot.lane.b32.xlu1 %v2277_v47, %s4866_s15 }
 0x8bc   : > { %v6413_v7 = vpop.permute.xlu1 %3354  ;;  %v6415_v26 = vpop.permute.xlu0 %2452 }
 0x8be   : > { %2384 = vrot.lane.b32.xlu0 %v2184_v37, %s4864_s13  ;;  %3464 = vrot.lane.b32.xlu1 %v2293_v38, %s4869_s19 }
 0x8c0   : > { %v6421_v45 = vpop.permute.xlu1 %3428  ;;  %v6423_v11 = vpop.permute.xlu0 %3282 }
 0x8c2   : > { %2460 = vrot.lane.b32.xlu0 %v6348_v43, %s4870_s20  ;;  %3492 = vrot.lane.b32.xlu1 %v2249_v8, %s4862_s11 }
 0x8c4   : > { %v6428_v23 = vpop.permute.xlu1 %2398  ;;  %v6430_v10 = vpop.permute.xlu0 %2336 }
 0x8c6   : > { %3288 = vrot.lane.b32.xlu0 %v2184_v37, %s4861_s9  ;;  %2698 = vrot.lane.b32.xlu1 %v6283_v32, %s4862_s11 }
 0x8c8   : > { %v6435_v27 = vpop.permute.xlu1 %2426  ;;  %v6437_v56 = vpop.permute.xlu0 %2364 }
 0x8ca   : > { %3358 = vrot.lane.b32.xlu0 %v6348_v43, %s4864_s13  ;;  %2738 = vrot.lane.b32.xlu1 %v6292_v1, %s4862_s11 }
 0x8cc   : > { %v6444_v22 = vpop.permute.xlu1 %2478  ;;  %v6446_v49 = vpop.permute.xlu0 %2400 }
 0x8ce   : > { %3436 = vrot.lane.b32.xlu0 %v6348_v43, %s4870_s20  ;;  %2650 = vrot.lane.b32.xlu1 %v2318_v61, %s4862_s11  ;;  %v2374_v61 = vsel %vm796_vm10, %v7644_v9, %v6320_v62 }
 0x8d0   : > { %v6453_v32 = vpop.permute.xlu1 %3308  ;;  %v6455_v51 = vpop.permute.xlu0 %2428 }
 0x8d2   : > { %2344 = vrot.lane.b32.xlu0 %v2257_v6, %s4865_s14  ;;  %3496 = vrot.lane.b32.xlu1 %v3292_v40, %s4862_s11  ;;  %v3348_v40 = vsel %vm796_vm10, %v6366_v52, %v6368_v0  ;;  %v2463_v52 = vsel %vm843_vm5, %v6396_v57, %v6415_v26 }
 0x8d4   : > { %v6462_v37 = vpop.permute.xlu1 %3336  ;;  %v6464_v48 = vpop.permute.xlu0 %2480 }
 0x8d6   : > { %2372 = vrot.lane.b32.xlu0 %v2265_v54, %s4867_s16  ;;  %2722 = vrot.lane.b32.xlu1 %v6339_v50, %s4862_s11 }
 0x8d8   : > { %v6469_v60 = vpop.permute.xlu1 %3484  ;;  %v6471_v5 = vpop.permute.xlu0 %3310 }
 0x8d9   : > { %7643 = vst [vmem:[#allocation4_spill] sm:$0xff] %v6469_v60 }
 0x8da   : > { %2408 = vrot.lane.b32.xlu0 %v2277_v47, %s4866_s15  ;;  %2668 = vrot.lane.b32.xlu1 %v6312_v15, %s4862_s11 }
 0x8dc   : > { %v6476_v21 = vpop.permute.xlu1 %2312  ;;  %v6478_v3 = vpop.permute.xlu0 %3338 }
 0x8de   : > { %2436 = vrot.lane.b32.xlu0 %v2285_v34, %s4868_s18  ;;  %3514 = vrot.lane.b32.xlu1 %v6359_v55, %s4862_s11 }
 0x8e0   : > { %v6485_v16 = vpop.permute.xlu1 %2382  ;;  %v6487_v33 = vpop.permute.xlu0 %3400 }
 0x8e2   : > { %2488 = vrot.lane.b32.xlu0 %v2293_v38, %s4869_s19  ;;  %2754 = vrot.lane.b32.xlu1 %v6350_v29, %s4862_s11  ;;  %v3235_v38 = vmul.bf16 %v6348_v43, %v5087_v31 }
 0x8e4   : > { %v6492_v6 = vpop.permute.xlu1 %2454  ;;  %v6494_v54 = vpop.permute.xlu0 %2640 }
 0x8e6   : > { %3318 = vrot.lane.b32.xlu0 %v3227_v25, %s4865_s14  ;;  %2708 = vrot.lane.b32.xlu1 %v2410_v14, %s4862_s11  ;;  %v3219_v14 = vmul.bf16 %v6348_v43, %v5115_v42  ;;  %v3293_v43 = vsel %vm766_vm4, %v6405_v39, %v6423_v11 }
 0x8e8   : > { %v6503_v8 = vpop.permute.xlu1 %3284  ;;  %v6505_v47 = vpop.permute.xlu0 %3372 }
 0x8ea   : > { %3346 = vrot.lane.b32.xlu0 %v3235_v38, %s4867_s16  ;;  %2682 = vrot.lane.b32.xlu1 %v2374_v61, %s4862_s11 }
 0x8ec   : > { %v6514_v30 = vpop.permute.xlu1 %3356  ;;  %v6516_v17 = vpop.permute.xlu0 %3456 }
 0x8ee   : > { %3408 = vrot.lane.b32.xlu0 %v2285_v34, %s4868_s18  ;;  %3528 = vrot.lane.b32.xlu1 %v3348_v40, %s4862_s11 }
 0x8f0   : > { %v6523_v31 = vpop.permute.xlu1 %2402  ;;  %v6525_v25 = vpop.permute.xlu0 %3486 }
 0x8f1   : > { %7645 = vst [vmem:[#allocation9_spill] sm:$0xff] %v6525_v25 }
 0x8f2   : > { %3494 = vrot.lane.b32.xlu0 %v3219_v14, %s4862_s11  ;;  %2656 = vrot.lane.b32.xlu1 %v6389_v13, %s4862_s11 }
 0x8f4   : > { %v6532_v38 = vpop.permute.xlu1 %2430  ;;  %v6534_v9 = vpop.permute.xlu0 %2456 }
 0x8f6   : > { %2652 = vrot.lane.b32.xlu0 %v6285_v28, %s4862_s11  ;;  %2744 = vrot.lane.b32.xlu1 %v2463_v52, %s4862_s11  ;;  %v2462_v28 = vsel %vm843_vm5, %v6292_v1, %v6294_v4 }
 0x8f8   : > { %v6542_v34 = vpop.permute.xlu1 %2482  ;;  %v6544_v42 = vpop.permute.xlu0 %3286 }
 0x8fa   : > { %3498 = vrot.lane.b32.xlu0 %v6303_v24, %s4862_s11  ;;  %3500 = vrot.lane.b32.xlu1 %v3293_v43, %s4862_s11  ;;  %v2439_v43 = vsel %vm830_vm9, %v6435_v27, %v6455_v51 }
 0x8fc   : > { %v6552_v61 = vpop.permute.xlu1 %3312  ;;  %v6554_v26 = vpop.permute.xlu0 %3432 }
 0x8fe   : > { %2740 = vrot.lane.b32.xlu0 %v2462_v28, %s4862_s11  ;;  %2672 = vrot.lane.b32.xlu1 %v6430_v10, %s4862_s11 }
 0x900   : > { %v6562_v40 = vpop.permute.xlu1 %3340  ;;  %v6564_v39 = vpop.permute.xlu0 %2340 }
 0x902   : > { %2706 = vrot.lane.b32.xlu0 %v6327_v63, %s4862_s11  ;;  %2710 = vrot.lane.b32.xlu1 %v6428_v23, %s4862_s11 }
 0x904   : > { %v6570_v24 = vpop.permute.xlu1 %3460  ;;  %v6572_v14 = vpop.permute.xlu0 %2368 }
 0x906   : > { %2684 = vrot.lane.b32.xlu0 %v6320_v62, %s4862_s11  ;;  %2688 = vrot.lane.b32.xlu1 %v6437_v56, %s4862_s11  ;;  %v2438_v62 = vsel %vm830_vm9, %v6339_v50, %v6341_v53  ;;  %v3321_v50 = vsel %vm781_vm8, %v6453_v32, %v6471_v5 }
 0x908   : > { %v6578_v1 = vpop.permute.xlu1 %3488  ;;  %v6580_v4 = vpop.permute.xlu0 %2404 }
 0x909   : > { %7646 = vst [vmem:[#allocation40_spill] sm:$0xff] %v6578_v1  ;;  %v7647_v1 = vld [vmem:[#allocation5_spill] sm:$0xff] }
 0x90a   : > { %3530 = vrot.lane.b32.xlu0 %v6368_v0, %s4862_s11  ;;  %2758 = vrot.lane.b32.xlu1 %v6444_v22, %s4862_s11  ;;  %v2346_v60 = vsel %vm781_vm8, %v7647_v1, %v6312_v15  ;;  %v3349_v15 = vsel %vm796_vm10, %v6462_v37, %v6478_v3  ;;  %v2490_v1 = vsel %vm858_vm7, %v6350_v29, %v6352_v12 }
 0x90b   : > { %v3294_v29 = vsel %vm766_vm4, %v6503_v8, %v6544_v42 }
 0x90c   : > { %v6586_v63 = vpop.permute.xlu1 %2458  ;;  %v6588_v52 = vpop.permute.xlu0 %2432 }
 0x90e   : > { %2724 = vrot.lane.b32.xlu0 %v2438_v62, %s4862_s11  ;;  %2728 = vrot.lane.b32.xlu1 %v2439_v43, %s4862_s11  ;;  %v3320_v62 = vsel %vm781_vm8, %v6357_v2, %v6359_v55 }
 0x910   : > { %v6598_v0 = vpop.permute.xlu1 %3290  ;;  %v6600_v28 = vpop.permute.xlu0 %2484 }
 0x912   : > { %2666 = vrot.lane.b32.xlu0 %v2346_v60, %s4862_s11  ;;  %3516 = vrot.lane.b32.xlu1 %v3321_v50, %s4862_s11 }
 0x914   : > { %v6610_v53 = vpop.permute.xlu1 %2406  ;;  %v6612_v51 = vpop.permute.xlu0 %3314 }
 0x916   : > { %3512 = vrot.lane.b32.xlu0 %v3320_v62, %s4862_s11  ;;  %3532 = vrot.lane.b32.xlu1 %v3349_v15, %s4862_s11 }
 0x918   : > { %v6622_v32 = vpop.permute.xlu1 %2434  ;;  %v6624_v60 = vpop.permute.xlu0 %3342 }
 0x91a   : > { %2756 = vrot.lane.b32.xlu0 %v2490_v1, %s4862_s11  ;;  %2746 = vrot.lane.b32.xlu1 %v6492_v6, %s4862_s11 }
 0x91c   : > { %v6632_v2 = vpop.permute.xlu1 %2486  ;;  %v6634_v55 = vpop.permute.xlu0 %3404 }
 0x91e   : > { %2700 = vrot.lane.b32.xlu0 %v6407_v35, %s4862_s11  ;;  %2660 = vrot.lane.b32.xlu1 %v6476_v21, %s4862_s11  ;;  %v4654_v35 = vunpack.i.h.bf16 %v7642_v59 }
 0x920   : > { %v6640_v37 = vpop.permute.xlu1 %3316  ;;  %v6642_v43 = vpop.permute.xlu0 %2644 }
 0x922   : > { %2742 = vrot.lane.b32.xlu0 %v6396_v57, %s4862_s11  ;;  %3504 = vrot.lane.b32.xlu1 %v3294_v29, %s4862_s11  ;;  %v2319_v57 = vsel %vm766_vm4, %v4654_v35, %v6389_v13 }
 0x924   : > { %v6650_v12 = vpop.permute.xlu1 %3344  ;;  %v6652_v50 = vpop.permute.xlu0 %3376 }
 0x926   : > { %3502 = vrot.lane.b32.xlu0 %v6423_v11, %s4862_s11  ;;  %2730 = vrot.lane.b32.xlu1 %v6532_v38, %s4862_s11 }
 0x928   : > { %v6659_v62 = vpop.permute.xlu1 %2648  ;;  %v6661_v8 = vpop.permute.xlu0 %3490 }
 0x929   : > { %7648 = vst [vmem:[#allocation5_spill] sm:$0xff] %v6661_v8 }
 0x92a   : > { %2654 = vrot.lane.b32.xlu0 %v2319_v57, %s4862_s11  ;;  %2676 = vrot.lane.b32.xlu1 %v6564_v39, %s4862_s11 }
 0x92c   : > { %v6668_v15 = vpop.permute.xlu1 %3380  ;;  %v6670_v11 = vpop.permute.xlu0 %2316 }
 0x92e   : > { %2726 = vrot.lane.b32.xlu0 %v6435_v27, %s4862_s11  ;;  %2714 = vrot.lane.b32.xlu1 %v6523_v31, %s4862_s11  ;;  %v3322_v27 = vsel %vm781_vm8, %v6552_v61, %v6612_v51 }
 0x930   : > { %v6676_v59 = vpop.permute.xlu1 %3464  ;;  %v6678_v1 = vpop.permute.xlu0 %2384 }
 0x932   : > { %3518 = vrot.lane.b32.xlu0 %v6471_v5, %s4862_s11  ;;  %2692 = vrot.lane.b32.xlu1 %v6572_v14, %s4862_s11  ;;  %v7650_v5 = vld [vmem:[#allocation6_spill] sm:$0xff] }
 0x933   : > { %v2347_v8 = vsel %vm781_vm8, %v7650_v5, %v6430_v10  ;;  %v7651_v10 = vld [vmem:[#allocation20_spill] sm:$0xff]  ;;  %v7652_v5 = vld [vmem:[#allocation10_spill] sm:$0xff] }
 0x934   : > { %v6684_v13 = vpop.permute.xlu1 %3492  ;;  %v2461_v29 = vpop.permute.xlu0 %2460  ;;  %v2375_v41 = vsel %vm796_vm10, %v7652_v5, %v6437_v56  ;;  %v4658_v5 = vunpack.i.l.bf16 %v7651_v10 }
 0x935   : > { %7649 = vst [vmem:[#allocation41_spill] sm:$0xff] %v6684_v13  ;;  %v3350_v13 = vsel %vm796_vm10, %v6562_v40, %v6624_v60  ;;  %v2465_v25 = vsel %vm843_vm5, %v6586_v63, %v2461_v29  ;;  %v4659_v40 = vunpack.i.h.bf16 %v7651_v10  ;;  %v2491_v29 = vsel %vm858_vm7, %v6444_v22, %v6464_v48 }
 0x936   : > { %3534 = vrot.lane.b32.xlu0 %v6478_v3, %s4862_s11  ;;  %3520 = vrot.lane.b32.xlu1 %v3322_v27, %s4862_s11  ;;  %v2411_v27 = vsel %vm815_vm6, %v6428_v23, %v6446_v49 }
 0x937   : > { %v2321_v23 = vsel %vm766_vm4, %v4659_v40, %v6670_v11 }
 0x938   : > { %v6692_v35 = vpop.permute.xlu1 %2698  ;;  %v3289_v57 = vpop.permute.xlu0 %3288 }
 0x93a   : > { %2670 = vrot.lane.b32.xlu0 %v2347_v8, %s4862_s11  ;;  %3536 = vrot.lane.b32.xlu1 %v3350_v13, %s4862_s11 }
 0x93c   : > { %v6702_v61 = vpop.permute.xlu1 %2738  ;;  %v6704_v3 = vpop.permute.xlu0 %3358 }
 0x93e   : > { %2712 = vrot.lane.b32.xlu0 %v2411_v27, %s4862_s11  ;;  %2752 = vrot.lane.b32.xlu1 %v2465_v25, %s4862_s11  ;;  %v3295_v27 = vsel %vm766_vm4, %v3289_v57, %v6598_v0 }
 0x940   : > { %v6714_v8 = vpop.permute.xlu1 %2650  ;;  %v6716_v13 = vpop.permute.xlu0 %3436 }
 0x942   : > { %2686 = vrot.lane.b32.xlu0 %v2375_v41, %s4862_s11  ;;  %2662 = vrot.lane.b32.xlu1 %v2321_v23, %s4862_s11 }
 0x944   : > { %v6725_v49 = vpop.permute.xlu1 %3496  ;;  %v6727_v25 = vpop.permute.xlu0 %2344 }
 0x945   : > { %7653 = vst [vmem:[#allocation6_spill] sm:$0xff] %v6725_v49 }
 0x946   : > { %2760 = vrot.lane.b32.xlu0 %v2491_v29, %s4862_s11  ;;  %3508 = vrot.lane.b32.xlu1 %v3295_v27, %s4862_s11  ;;  %v2320_v29 = vsel %vm766_vm4, %v4658_v5, %v6476_v21  ;;  %v2440_v5 = vsel %vm830_vm9, %v6532_v38, %v6588_v52 }
 0x948   : > { %v6736_v56 = vpop.permute.xlu1 %2722  ;;  %v6738_v41 = vpop.permute.xlu0 %2372 }
 0x94a   : > { %2702 = vrot.lane.b32.xlu0 %v6485_v16, %s4862_s11  ;;  %2734 = vrot.lane.b32.xlu1 %v6622_v32, %s4862_s11  ;;  %v2464_v16 = vsel %vm843_vm5, %v6492_v6, %v6534_v9 }
 0x94c   : > { %v6744_v40 = vpop.permute.xlu1 %2668  ;;  %v2409_v22 = vpop.permute.xlu0 %2408 }
 0x94e   : > { %3506 = vrot.lane.b32.xlu0 %v6544_v42, %s4862_s11  ;;  %2680 = vrot.lane.b32.xlu1 %v6727_v25, %s4862_s11 }
 0x950   : > { %v6750_v48 = vpop.permute.xlu1 %3514  ;;  %v6752_v57 = vpop.permute.xlu0 %2436 }
 0x952   : > { %2748 = vrot.lane.b32.xlu0 %v2464_v16, %s4862_s11  ;;  %2762 = vrot.lane.b32.xlu1 %v6542_v34, %s4862_s11 }
 0x954   : > { %v6761_v23 = vpop.permute.xlu1 %2754  ;;  %v6763_v42 = vpop.permute.xlu0 %2488 }
 0x955   : > { %7654 = vst [vmem:[#allocation20_spill] sm:$0xff] %v6761_v23 }
 0x956   : > { %3568 = vrot.lane.b32.xlu1 %v6377_v20, %s4862_s11  ;;  %2658 = vrot.lane.b32.xlu0 %v2320_v29, %s4862_s11  ;;  %v7656_v29 = vld [vmem:[#allocation21_spill] sm:$0xff] }
 0x958   : > { %v6770_v6 = vpop.permute.xlu1 %2708  ;;  %v3319_v9 = vpop.permute.xlu0 %3318 }
 0x95a   : > { %2766 = vrot.lane.b32.xlu1 %v6632_v2, %s4862_s11  ;;  %3522 = vrot.lane.b32.xlu0 %v6612_v51, %s4862_s11  ;;  %v3413_v51 = vsel %vm830_vm9, %v6487_v33, %v7656_v29  ;;  %v7660_v29 = vld [vmem:[#allocation11_spill] sm:$0xff] }
 0x95c   : > { %v6776_v10 = vpop.permute.xlu1 %2682  ;;  %v3347_v27 = vpop.permute.xlu0 %3346 }
 0x95e   : > { %3544 = vrot.lane.b32.xlu1 %v6310_v18, %s4862_s11  ;;  %3538 = vrot.lane.b32.xlu0 %v6624_v60, %s4862_s11  ;;  %v2413_v60 = vsel %vm815_vm6, %v6610_v53, %v2409_v22 }
 0x960   : > { %v6782_v21 = vpop.permute.xlu1 %3528  ;;  %v6784_v16 = vpop.permute.xlu0 %3408 }
 0x961   : > { %7655 = vst [vmem:[#allocation10_spill] sm:$0xff] %v6782_v21  ;;  %v7657_v21 = vld [vmem:[#allocation7_spill] sm:$0xff] }
 0x962   : > { %3574 = vrot.lane.b32.xlu1 %v3413_v51, %s4862_s11  ;;  %2732 = vrot.lane.b32.xlu0 %v2440_v5, %s4862_s11  ;;  %v2348_v23 = vsel %vm781_vm8, %v7657_v21, %v6564_v39  ;;  %v2412_v5 = vsel %vm815_vm6, %v6523_v31, %v6580_v4  ;;  %v7659_v21 = vld [vmem:[#allocation12_spill] sm:$0xff]  ;;  %v2376_v51 = vsel %vm796_vm10, %v7660_v29, %v6572_v14 }
 0x963   : > { %v3323_v14 = vsel %vm781_vm8, %v6640_v37, %v3319_v9 }
 0x964   : > { %v6794_v18 = vpop.permute.xlu1 %2656  ;;  %v6796_v49 = vpop.permute.xlu0 %3494 }
 0x966   : > { %2720 = vrot.lane.b32.xlu1 %v2413_v60, %s4862_s11  ;;  %2674 = vrot.lane.b32.xlu0 %v2348_v23, %s4862_s11  ;;  %v2377_v23 = vsel %vm796_vm10, %v7659_v21, %v6738_v41 }
 0x968   : > { %v6805_v38 = vpop.permute.xlu1 %2744  ;;  %v6807_v52 = vpop.permute.xlu0 %2652 }
 0x96a   : > { %3576 = vrot.lane.b32.xlu1 %v6634_v55, %s4862_s11  ;;  %2716 = vrot.lane.b32.xlu0 %v2412_v5, %s4862_s11 }
 0x96c   : > { %v6815_v22 = vpop.permute.xlu1 %3500  ;;  %v6817_v39 = vpop.permute.xlu0 %3498 }
 0x96d   : > { %7658 = vst [vmem:[#allocation21_spill] sm:$0xff] %v6815_v22 }
 0x96e   : > { %2694 = vrot.lane.b32.xlu1 %v2377_v23, %s4862_s11  ;;  %2690 = vrot.lane.b32.xlu0 %v2376_v51, %s4862_s11 }
 0x970   : > { %v6827_v31 = vpop.permute.xlu1 %2672  ;;  %v6829_v4 = vpop.permute.xlu0 %2740 }
 0x972   : > { %3548 = vrot.lane.b32.xlu1 %v6514_v30, %s4862_s11  ;;  %2704 = vrot.lane.b32.xlu0 %v6678_v1, %s4862_s11 }
 0x974   : > { %v6835_v60 = vpop.permute.xlu1 %2710  ;;  %v6837_v5 = vpop.permute.xlu0 %2706 }
 0x976   : > { %3524 = vrot.lane.b32.xlu1 %v3323_v14, %s4862_s11  ;;  %2750 = vrot.lane.b32.xlu0 %v6586_v63, %s4862_s11  ;;  %v3351_v14 = vsel %vm796_vm10, %v6650_v12, %v3347_v27 }
 0x978   : > { %v6844_v21 = vpop.permute.xlu1 %2688  ;;  %v6846_v23 = vpop.permute.xlu0 %2684 }
 0x97a   : > { %3584 = vrot.lane.b32.xlu1 %v6318_v36, %s4862_s11  ;;  %2664 = vrot.lane.b32.xlu0 %v6670_v11, %s4862_s11 }
 0x97c   : > { %v6852_v30 = vpop.permute.xlu1 %2758  ;;  %v6854_v1 = vpop.permute.xlu0 %3530 }
 0x97e   : > { %3552 = vrot.lane.b32.xlu1 %v6375_v46, %s4862_s11  ;;  %2718 = vrot.lane.b32.xlu0 %v6610_v53, %s4862_s11 }
 0x980   : > { %v2729_v63 = vpop.permute.xlu1 %2728  ;;  %v2725_v37 = vpop.permute.xlu0 %2724 }
 0x981   : > { %v2790_v29 = vsel %vm1033_vm11, %v6736_v56, %v2725_v37  ;;  %v7661_v56 = vld [vmem:[#allocation19_spill] sm:$0xff] }
 0x982   : > { %4264 = vmatprep.subr.bf16.mxu0 %v2790_v29  ;;  %3588 = vrot.lane.b32.xlu1 %v6421_v45, %s4862_s11  ;;  %v2770_v37 = vsel %vm1033_vm11, %v7661_v56, %v6384_v58  ;;  %v2441_v58 = vsel %vm830_vm9, %v6622_v32, %v6752_v57  ;;  %v6909_v57 = vld [vmem:[%s7582_s6 + $0xc] ss:$20 sps:$4 sm:$0xff]  }
 0x983   : > { %2696 = vrot.lane.b32.xlu0 %v6738_v41, %s4862_s11  ;;  %4265 = vmatpush3.bf16.msra.mxu0 %v6692_v35  ;;  %7663 = vst [vmem:[#allocation7_spill] sm:$0xff] %v6909_v57 }
 0x984   : > { %v6867_v11 = vpop.permute.xlu1 %3516  ;;  %v2667_v51 = vpop.permute.xlu0 %2666  ;;  %2947 = vmatprep.mubr.bf16.mxu0 %v6909_v57 }
 0x985   : > { %v2778_v53 = vsel %vm1033_vm11, %v2667_v51, %v6744_v40 }
 0x986   : > { %4224 = vmatprep.subr.bf16.mxu1 %v2778_v53  ;;  %3540 = vrot.lane.b32.xlu1 %v3351_v14, %s4862_s11  ;;  %v7662_v53 = vld [vmem:[#allocation29_spill] sm:$0xff]  ;;  %v7664_v14 = vld [vmem:[#allocation8_spill] sm:$0xff] }
 0x987   : > { %3526 = vrot.lane.b32.xlu0 %v3319_v9, %s4862_s11  ;;  %4225 = vmatpush3.bf16.msra.mxu1 %v2770_v37  ;;  %v3415_v32 = vsel %vm830_vm9, %v6784_v16, %v7662_v53  ;;  %v2349_v56 = vsel %vm781_vm8, %v7664_v14, %v6727_v25  ;;  %v7666_v14 = vld [vmem:[#allocation17_spill] sm:$0xff] }
 0x988   : > { %v3533_v35 = vpop.permute.xlu1 %3532  ;;  %v6878_v41 = vpop.permute.xlu0 %3512 }
 0x98a   : > { %3556 = vrot.lane.b32.xlu1 %v6505_v47, %s4862_s11 }
 0x98b   : > { %3542 = vrot.lane.b32.xlu0 %v3347_v27, %s4862_s11 }
 0x98c   : > { %v6883_v40 = vpop.permute.xlu1 %2746  ;;  %v6885_v12 = vpop.permute.xlu0 %2756 }
 0x98e   : > { %3600 = vrot.lane.b32.xlu1 %v6391_v44, %s4862_s11 }
 0x98f   : > { %2736 = vrot.lane.b32.xlu0 %v2441_v58, %s4862_s11  ;;  %v2492_v58 = vsel %vm858_vm7, %v6542_v34, %v6600_v28  ;;  %v3412_v34 = vsel %vm830_vm9, %v6377_v20, %v7666_v14 }
 0x990   : > { %v6893_v9 = vpop.permute.xlu1 %2660  ;;  %v2701_v29 = vpop.permute.xlu0 %2700 }
 0x992   : > { %3592 = vrot.lane.b32.xlu1 %v6554_v26, %s4862_s11 }
 0x993   : > { %3510 = vrot.lane.b32.xlu0 %v6598_v0, %s4862_s11 }
 0x994   : > { %v6899_v27 = vpop.permute.xlu1 %3504  ;;  %v6901_v51 = vpop.permute.xlu0 %2742 }
 0x996   : > { %3582 = vrot.lane.b32.xlu1 %v3415_v32, %s4862_s11  ;;  %v6934_v32 = vld [vmem:[%s7582_s6 + $0x4] ss:$20 sps:$4 sm:$0xff]  }
 0x997   : > { %2678 = vrot.lane.b32.xlu0 %v2349_v56, %s4862_s11  ;;  %7665 = vst [vmem:[#allocation12_spill] sm:$0xff] %v6934_v32  ;;  %2882 = vmatprep.mubr.bf16.mxu1 %v6934_v32  ;;  %v7668_v32 = vld [vmem:[#allocation23_spill] sm:$0xff] }
 0x998   : > { %v6917_v0 = vpop.permute.xlu1 %2730  ;;  %v6919_v37 = vpop.permute.xlu0 %3502  ;;  %v2771_v22 = vsel %vm1033_vm11, %v7668_v32, %v6494_v54  ;;  %v7669_v54 = vld [vmem:[#allocation30_spill] sm:$0xff] }
 0x999   : > { %v4665_v32 = vunpack.i.l.bf16 %v7669_v54 }
 0x99a   : > { %3560 = vrot.lane.b32.xlu1 %v6652_v50, %s4862_s11 }
 0x99b   : > { %2764 = vrot.lane.b32.xlu0 %v2492_v58, %s4862_s11 }
 0x99c   : > { %v6927_v53 = vpop.permute.xlu1 %2676  ;;  %v6929_v25 = vpop.permute.xlu0 %2654 }
 0x99e   : > { %3604 = vrot.lane.b32.xlu1 %v6516_v17, %s4862_s11 }
 0x99f   : > { %3570 = vrot.lane.b32.xlu0 %v3412_v34, %s4862_s11 }
 0x9a0   : > { %v6943_v28 = vpop.permute.xlu1 %2714  ;;  %v2727_v56 = vpop.permute.xlu0 %2726 }
 0x9a1   : > { %v2791_v58 = vsel %vm1033_vm11, %v2727_v56, %v2729_v63 }
 0x9a2   : > { %4266 = vmatprep.subr.bf16.mxu0 %v2791_v58  ;;  %3596 = vrot.lane.b32.xlu1 %v6716_v13, %s4862_s11 }
 0x9a3   : > { %3572 = vrot.lane.b32.xlu0 %v6487_v33, %s4862_s11  ;;  %4267 = vmatpush3.bf16.msra.mxu0 %v2701_v29  ;;  %v7667_v33 = vld [vmem:[#allocation25_spill] sm:$0xff] }
 0x9a4   : > { %v6950_v57 = vpop.permute.xlu1 %2692  ;;  %v6952_v20 = vpop.permute.xlu0 %3518  ;;  %v3414_v29 = vsel %vm830_vm9, %v6634_v55, %v7667_v33 }
 0x9a6   : > { %3564 = vrot.lane.b32.xlu1 %v6668_v15, %s4862_s11 }
 0x9a7   : > { %3546 = vrot.lane.b32.xlu0 %v6413_v7, %s4862_s11 }
 0x9a8   : > { %v6958_v14 = vpop.permute.xlu1 %3520  ;;  %v3535_v63 = vpop.permute.xlu0 %3534 }
 0x9a9   : > { %v6961_v34 = vsel %vm1033_vm11, %v3533_v35, %v3535_v63 }
 0x9aa   : > { %3608 = vrot.lane.b32.xlu1 %v6570_v24, %s4862_s11 }
 0x9ab   : > { %3578 = vrot.lane.b32.xlu0 %v3414_v29, %s4862_s11 }
 0x9ac   : > { %v3537_v56 = vpop.permute.xlu1 %3536  ;;  %v2671_v58 = vpop.permute.xlu0 %2670 }
 0x9ad   : > { %v2779_v7 = vsel %vm1033_vm11, %v2671_v58, %v6827_v31  ;;  %v4847_v31 = vld [vmem:[%s7580_s4 + $0x38] sm:$0xff] }
 0x9ae   : > { %4226 = vmatprep.subr.bf16.mxu1 %v2779_v7  ;;  %3612 = vrot.lane.b32.xlu1 %v6676_v59, %s4862_s11 }
 0x9af   : > { %3580 = vrot.lane.b32.xlu0 %v6784_v16, %s4862_s11  ;;  %4227 = vmatpush3.bf16.msra.mxu1 %v2771_v22  ;;  %v3440_v22 = vsel %vm843_vm5, %v6318_v36, %v4665_v32 }
 0x9b0   : > { %v2713_v55 = vpop.permute.xlu0 %2712  ;;  %v6978_v35 = vpop.permute.xlu1 %2752 }
 0x9b1   : > { %v6982_v63 = vsel %vm1033_vm11, %v6835_v60, %v2713_v55 }
 0x9b2   : > { %2523 = vperm.xlu1 %4676, %v4847_v31  }
 0x9b3   : > { %3550 = vrot.lane.b32.xlu0 %v6704_v3, %s4862_s11  ;;  %v7670_v3 = vld [vmem:[#allocation32_spill] sm:$0xff] }
 0x9b4   : > { %v2687_v33 = vpop.permute.xlu0 %2686  ;;  %v6996_v60 = vpop.permute.xlu1 %2662  ;;  %v3384_v7 = vsel %vm815_vm6, %v6375_v46, %v7670_v3 }
 0x9b5   : > { %v6992_v16 = vsel %vm1033_vm11, %v2687_v33, %v6844_v21  ;;  %v4666_v21 = vunpack.i.h.bf16 %v7669_v54  ;;  %v7671_v33 = vld [vmem:[#allocation31_spill] sm:$0xff] }
 0x9b6   : > { %v3385_v46 = vsel %vm815_vm6, %v6505_v47, %v7671_v33 }
 0x9b7   : > { %3586 = vrot.lane.b32.xlu0 %v3440_v22, %s4862_s11  ;;  %v3441_v36 = vsel %vm843_vm5, %v6421_v45, %v4666_v21  ;;  %v2493_v45 = vsel %vm858_vm7, %v6632_v2, %v6763_v42 }
 0x9b8   : > { %v2761_v29 = vpop.permute.xlu0 %2760  ;;  %v7008_v31 = vpop.permute.xlu1 %3508 }
 0x9b9   : > { %v7001_v58 = vsel %vm1033_vm11, %v6852_v30, %v2761_v29 }
 0x9bb   : > { %3554 = vrot.lane.b32.xlu0 %v3384_v7, %s4862_s11  ;;  %v7672_v7 = vld [vmem:[#allocation33_spill] sm:$0xff] }
 0x9bc   : > { %v2703_v55 = vpop.permute.xlu0 %2702  ;;  %v7020_v22 = vpop.permute.xlu1 %2734  ;;  %v3468_v21 = vsel %vm858_vm7, %v6391_v44, %v7672_v7 }
 0x9bf   : > { %3590 = vrot.lane.b32.xlu0 %v3441_v36, %s4862_s11 }
 0x9c0   : > { %v3507_v32 = vpop.permute.xlu0 %3506  ;;  %v7031_v3 = vpop.permute.xlu1 %2680 }
 0x9c1   : > { %v7015_v30 = vsel %vm1033_vm11, %v6899_v27, %v3507_v32 }
 0x9c3   : > { %3558 = vrot.lane.b32.xlu0 %v3385_v46, %s4862_s11  ;;  %v7674_v46 = vld [vmem:[#allocation37_spill] sm:$0xff] }
 0x9c4   : > { %v2749_v54 = vpop.permute.xlu0 %2748  ;;  %v7046_v42 = vpop.permute.xlu1 %2762  ;;  %v3386_v44 = vsel %vm815_vm6, %v6652_v50, %v7674_v46  ;;  %v7678_v46 = vld [vmem:[#allocation36_spill] sm:$0xff] }
 0x9c5   : > { %v7025_v29 = vsel %vm1033_vm11, %v6883_v40, %v2749_v54  ;;  %v7673_v40 = vld [vmem:[#allocation35_spill] sm:$0xff] }
 0x9c6   : > { %v4670_v36 = vunpack.i.l.bf16 %v7673_v40 }
 0x9c7   : > { %2768 = vrot.lane.b32.xlu0 %v2493_v45, %s4862_s11 }
 0x9c8   : > { %v2659_v27 = vpop.permute.xlu0 %2658  ;;  %v3442_v2 = vsel %vm843_vm5, %v6554_v26, %v4670_v36  ;;  %v7056_v45 = vpop.permute.xlu1 %3568  ;;  %v7676_v36 = vld [vmem:[#allocation27_spill] sm:$0xff] }
 0x9c9   : > { %v7035_v47 = vsel %vm1033_vm11, %v2659_v27, %v6893_v9  ;;  %v7675_v27 = vld [vmem:[#allocation39_spill] sm:$0xff] }
 0x9ca   : > { %v3469_v7 = vsel %vm858_vm7, %v6516_v17, %v7675_v27 }
 0x9cb   : > { %3602 = vrot.lane.b32.xlu0 %v3468_v21, %s4862_s11 }
 0x9cc   : > { %v7042_v32 = vpop.permute.xlu0 %3522 }
 0x9cf   : > { %3594 = vrot.lane.b32.xlu0 %v3442_v2, %s4862_s11  ;;  %v2772_v2 = vsel %vm1033_vm11, %v7676_v36, %v6642_v43 }
 0x9d0   : > { %v3539_v33 = vpop.permute.xlu0 %3538 }
 0x9d1   : > { %v7050_v9 = vsel %vm1033_vm11, %v3537_v56, %v3539_v33  ;;  %v4671_v56 = vunpack.i.h.bf16 %v7673_v40  ;;  %v7072_v33 = vpop.permute.xlu1 %2766 }
 0x9d3   : > { %3562 = vrot.lane.b32.xlu0 %v3386_v44, %s4862_s11 }
 0x9d4   : > { %v2733_v54 = vpop.permute.xlu0 %2732 }
 0x9d5   : > { %v2792_v26 = vsel %vm1033_vm11, %v6917_v0, %v2733_v54  ;;  %v3443_v0 = vsel %vm843_vm5, %v6716_v13, %v4671_v56  ;;  %v7083_v43 = vpop.permute.xlu1 %3544  ;;  %v3470_v13 = vsel %vm858_vm7, %v6570_v24, %v7678_v46  ;;  %v7679_v54 = vld [vmem:[#allocation38_spill] sm:$0xff]  ;;  %v2194_v24 = vld [vmem:[%s7580_s4] sm:$0xff]  ;;  %v2197_v46 = vld [vmem:[%s7580_s4 + $0x18] sm:$0xff] }
 0x9d6   : > { %4268 = vmatprep.subr.bf16.mxu0 %v2792_v26  ;;  %v3471_v26 = vsel %vm858_vm7, %v6676_v59, %v7679_v54  ;;  %v2195_v59 = vld [vmem:[%s7580_s4 + $0x8] sm:$0xff] }
 0x9d7   : > { %3606 = vrot.lane.b32.xlu0 %v3469_v7, %s4862_s11  ;;  %4269 = vmatpush3.bf16.msra.mxu0 %v2703_v55  ;;  %v7677_v55 = vld [vmem:[#allocation34_spill] sm:$0xff] }
 0x9d8   : > { %v2675_v21 = vpop.permute.xlu0 %2674  ;;  %v3387_v40 = vsel %vm815_vm6, %v6668_v15, %v7677_v55  ;;  %v4873_v55 = vmov 4  }
 0x9d9   : > { %v2780_v50 = vsel %vm1033_vm11, %v2675_v21, %v6927_v53  ;;  %v7092_v27 = vpop.permute.xlu1 %3574  ;;  %4677 = vset.pattern.permute.xlu0 %v4873_v55  ;;  %4678 = vset.pattern.permute.xlu1 %v4873_v55 }
 0x9da   : > { %4228 = vmatprep.subr.bf16.mxu1 %v2780_v50  ;;  %3058 = vperm.xlu1 %4678, %v2195_v59  }
 0x9db   : > { %3598 = vrot.lane.b32.xlu0 %v3443_v0, %s4862_s11  ;;  %4229 = vmatpush3.bf16.msra.mxu1 %v2772_v2 }
 0x9dc   : > { %v7075_v17 = vpop.permute.xlu0 %2716 }
 0x9dd   : > { %v2721_v56 = vpop.permute.xlu1 %2720 }
 0x9df   : > { %3566 = vrot.lane.b32.xlu0 %v3387_v40, %s4862_s11  ;;  %v2196_v40 = vld [vmem:[%s7580_s4 + $0x10] sm:$0xff] }
 0x9e0   : > { %v7081_v53 = vpop.permute.xlu0 %2690  ;;  %3063 = vperm.xlu1 %4678, %v2196_v40   ;;  %v2200_v40 = vld [vmem:[%s7580_s4 + $0x30] sm:$0xff] }
 0x9e1   : > { %v7097_v50 = vpop.permute.xlu1 %3576 }
 0x9e2   : > { %7680 = vst [vmem:[#allocation11_spill] sm:$0xff] %v7097_v50 }
 0x9e3   : > { %3610 = vrot.lane.b32.xlu0 %v3470_v13, %s4862_s11 }
 0x9e4   : > { %v2705_v44 = vpop.permute.xlu0 %2704 }
 0x9e5   : > { %v7107_v2 = vpop.permute.xlu1 %2694 }
 0x9e7   : > { %3614 = vrot.lane.b32.xlu0 %v3471_v26, %s4862_s11  ;;  %v2198_v26 = vld [vmem:[%s7580_s4 + $0x20] sm:$0xff] }
 0x9e8   : > { %v2751_v15 = vpop.permute.xlu0 %2750  ;;  %3073 = vperm.xlu1 %4678, %v2198_v26   ;;  %v2786_v26 = vsel %vm1033_vm11, %v6837_v5, %v6770_v6  ;;  %v2782_v6 = vsel %vm1033_vm11, %v6776_v10, %v6846_v23  ;;  %v2774_v5 = vsel %vm1033_vm11, %v6714_v8, %v6807_v52  ;;  %v2775_v8 = vsel %vm1033_vm11, %v6929_v25, %v6794_v18  ;;  %v7182_v23 = vld [vmem:[%s7582_s6 + $0x8] ss:$20 sps:$4 sm:$0xff]  }
 0x9e9   : > { %v7119_v54 = vpop.permute.xlu1 %3548  ;;  %v7195_v25 = vld [vmem:[%s7582_s6 + $0x34] ss:$20 sps:$4 sm:$0xff]  }
 0x9ea   : > { %7681 = vst [vmem:[#allocation19_spill] sm:$0xff] %v7119_v54  ;;  %v2794_v54 = vsel %vm1033_vm11, %v6702_v61, %v6829_v4  ;;  %v7682_v4 = vld [vmem:[#allocation28_spill] sm:$0xff] }
 0x9eb   : > { %3053 = vperm.xlu0 %4677, %v2194_v24   ;;  %v2199_v24 = vld [vmem:[%s7580_s4 + $0x28] sm:$0xff] }
 0x9ec   : > { %v7095_v7 = vpop.permute.xlu0 %2664  ;;  %3083 = vperm.xlu1 %4678, %v2200_v40  }
 0x9ed   : > { %v7138_v50 = vpop.permute.xlu1 %3524 }
 0x9ef   : > { %3068 = vperm.xlu0 %4677, %v2197_v46   ;;  %v2201_v46 = vld [vmem:[%s7580_s4 + $0x38] sm:$0xff] }
 0x9f0   : > { %v2719_v21 = vpop.permute.xlu0 %2718 }
 0x9f1   : > { %v2789_v52 = vsel %vm1033_vm11, %v2719_v21, %v2721_v56 }
 0x9f3   : > { %3078 = vperm.xlu0 %4677, %v2199_v24  }
 0x9f5   : > { %v7099_v36 = vpop.permute.xlu0 %2696 }
 0x9f7   : > { %3088 = vperm.xlu0 %4677, %v2201_v46   ;;  %v7689_v46 = vld [vmem:[#allocation41_spill] sm:$0xff] }
 0x9f9   : > { %v7109_v0 = vpop.permute.xlu0 %3526 }
 0x9fd   : > { %v7117_v13 = vpop.permute.xlu0 %3542 }
 0xa01   : > { %v2737_v59 = vpop.permute.xlu0 %2736 }
 0xa02   : > { %v2793_v55 = vsel %vm1033_vm11, %v7020_v22, %v2737_v59  ;;  %v7153_v59 = vpop.permute.xlu1 %3584 }
 0xa03   : > { %4270 = vmatprep.subr.bf16.mxu0 %v2793_v55  ;;  %v7688_v55 = vld [vmem:[#allocation40_spill] sm:$0xff] }
 0xa04   : > { %4271 = vmatpush3.bf16.msra.mxu0 %v2705_v44  ;;  %v2795_v44 = vsel %vm1033_vm11, %v6901_v51, %v6805_v38  ;;  %v2797_v51 = vsel %vm1033_vm11, %v2751_v15, %v6978_v35  ;;  %v3624_v35 = vsel %vm1033_vm11, %v6878_v41, %v6750_v48  ;;  %v2785_v48 = vsel %vm1033_vm11, %v7107_v2, %v7099_v36  ;;  %v7222_v15 = vld [vmem:[%s7582_s6] ss:$20 sps:$4 sm:$0xff]   ;;  %v7245_v2 = vld [vmem:[%s7582_s6 + $0x5c] ss:$20 sps:$4 sm:$0xff]  }
 0xa05   : > { %4272 = vmatprep.subr.bf16.mxu0 %v2794_v54  ;;  %v7140_v22 = vpop.permute.xlu0 %3510  ;;  %v2773_v54 = vsel %vm1033_vm11, %v7682_v4, %v6659_v62  ;;  %v2788_v62 = vsel %vm1033_vm11, %v6943_v28, %v7075_v17  ;;  %v2784_v28 = vsel %vm1033_vm11, %v7081_v53, %v6950_v57  ;;  %v3625_v41 = vsel %vm1033_vm11, %v6867_v11, %v6952_v20  ;;  %v7685_v17 = vld [vmem:[#allocation4_spill] sm:$0xff] }
 0xa06   : > { %v7227_v11 = vld [vmem:[%s7582_s6 + $0x30] ss:$20 sps:$4 sm:$0xff]   ;;  %v7240_v36 = vld [vmem:[%s7582_s6 + $0x2c] ss:$20 sps:$4 sm:$0xff]  }
 0xa07   : > { %v7686_v20 = vld [vmem:[#allocation20_spill] sm:$0xff] }
 0xa08   : > { %4273 = vmatpush3.bf16.msra.mxu0 %v2786_v26  ;;  %v2798_v56 = vsel %vm1033_vm11, %v7686_v20, %v6885_v12  ;;  %v7687_v12 = vld [vmem:[#allocation5_spill] sm:$0xff]  ;;  %v3619_v26 = vsel %vm1033_vm11, %v7689_v46, %v6796_v49  ;;  %v7690_v49 = vld [vmem:[#allocation10_spill] sm:$0xff] }
 0xa09   : > { %4274 = vmatprep.subr.bf16.mxu0 %v2795_v44  ;;  %v2679_v24 = vpop.permute.xlu0 %2678  ;;  %v3618_v40 = vsel %vm1033_vm11, %v7688_v55, %v7687_v12  ;;  %v7379_v20 = vld [vmem:[%s7582_s6 + $0x60] ss:$20 sps:$4 sm:$0xff]  }
 0xa0a   : > { %v2781_v61 = vsel %vm1033_vm11, %v2679_v24, %v7031_v3  ;;  %v7268_v24 = vld [vmem:[%s7582_s6 + $0x28] ss:$20 sps:$4 sm:$0xff]   ;;  %v7404_v55 = vld [vmem:[%s7583_s7] sm:$0xff]  }
 0xa0b   : > { %4230 = vmatprep.subr.bf16.mxu1 %v2781_v61  ;;  %v3628_v61 = vsel %vm1033_vm11, %v7690_v49, %v6854_v1  ;;  %v4725_v49 = vld [vmem:[%s7583_s7 + $0x10] sm:$0xff]  }
 0xa0c   : > { %4231 = vmatpush3.bf16.msra.mxu1 %v2773_v54  ;;  %4275 = vmatpush3.bf16.msra.mxu0 %v6982_v63  ;;  %v7170_v63 = vpop.permute.xlu1 %3552  ;;  %v7287_v54 = vld [vmem:[%s7582_s6 + $0x54] ss:$20 sps:$4 sm:$0xff]  }
 0xa0d   : > { %4232 = vmatprep.subr.bf16.mxu1 %v2782_v6  ;;  %4276 = vmatprep.subr.bf16.mxu0 %v7025_v29  ;;  %v7160_v38 = vpop.permute.xlu0 %2764 }
 0xa10   : > { %4233 = vmatpush3.bf16.msra.mxu1 %v2774_v5  ;;  %4277 = vmatpush3.bf16.msra.mxu0 %v2788_v62  ;;  %v7200_v3 = vpop.permute.xlu1 %3588  ;;  %v7692_v5 = vld [vmem:[#allocation21_spill] sm:$0xff]  ;;  %v7312_v62 = vld [vmem:[%s7582_s6 + $0x50] ss:$20 sps:$4 sm:$0xff]  }
 0xa11   : > { %4234 = vmatprep.subr.bf16.mxu1 %v6992_v16  ;;  %4278 = vmatprep.subr.bf16.mxu0 %v2797_v51  ;;  %v7173_v10 = vpop.permute.xlu0 %3570  ;;  %v7683_v16 = vld [vmem:[#allocation18_spill] sm:$0xff] }
 0xa12   : > { %v3616_v29 = vsel %vm1033_vm11, %v7683_v16, %v6398_v19  ;;  %v7684_v19 = vld [vmem:[#allocation9_spill] sm:$0xff]  ;;  %v7317_v51 = vld [vmem:[%s7582_s6 + $0x80] ss:$20 sps:$4 sm:$0xff]  }
 0xa13   : > { %v3617_v53 = vsel %vm1033_vm11, %v7685_v17, %v7684_v19  ;;  %v7342_v16 = vld [vmem:[%s7582_s6 + $0x78] ss:$20 sps:$4 sm:$0xff]   ;;  %v3047_v17 = vld [vmem:[%s4933_s10 + $0x20] sm:$0xff] }
 0xa14   : > { %4235 = vmatpush3.bf16.msra.mxu1 %v2775_v8  ;;  %4279 = vmatpush3.bf16.msra.mxu0 %v2789_v52 }
 0xa15   : > { %4236 = vmatprep.subr.bf16.mxu1 %v2784_v28  ;;  %4318 = vmatprep.subr.bf16.mxu0 %v3624_v35  ;;  %v7190_v18 = vpop.permute.xlu0 %3572  ;;  %v3623_v35 = vsel %vm1033_vm11, %v7008_v31, %v7140_v22  ;;  %v3045_v22 = vld [vmem:[%s4933_s10] sm:$0xff] }
 0xa17   : > { %2948 = vmatmul.mubr.bf16.vlgmr.msra.gmra.mrb[32].mxu0 %v7182_v23 }
 0xa18   : > { %4237 = vmatpush3.bf16.msra.mxu1 %v7035_v47  ;;  %4319 = vmatpush3.bf16.msra.mxu0 %v3616_v29  ;;  %v2777_v47 = vsel %vm1033_vm11, %v6996_v60, %v7095_v7  ;;  %v3626_v60 = vsel %vm1033_vm11, %v6958_v14, %v7042_v32  ;;  %v3541_v7 = vpop.permute.xlu1 %3540  ;;  %v3627_v14 = vsel %vm1033_vm11, %v7138_v50, %v7109_v0  ;;  %v7273_v50 = vld [vmem:[%s7582_s6 + $0x58] ss:$20 sps:$4 sm:$0xff]  }
 0xa19   : > { %4238 = vmatprep.subr.bf16.mxu1 %v2785_v48  ;;  %4320 = vmatprep.subr.bf16.mxu0 %v3625_v41  ;;  %v7210_v57 = vpop.permute.xlu0 %3546  ;;  %v2800_v0 = vsel %vm1033_vm11, %v7046_v42, %v7160_v38  ;;  %v7691_v42 = vld [vmem:[#allocation6_spill] sm:$0xff]  ;;  %v3631_v52 = vsel %vm1033_vm11, %v3541_v7, %v7117_v13 }
 0xa1a   : > { %2955 = vmatprep.mubr.bf16.mxu0 %v7195_v25  ;;  %v3620_v6 = vsel %vm1033_vm11, %v7691_v42, %v6817_v39  ;;  %v3621_v39 = vsel %vm1033_vm11, %v7692_v5, %v6919_v37  ;;  %v7350_v13 = vld [vmem:[%s7582_s6 + $0x10] ss:$20 sps:$4 sm:$0xff]  }
 0xa1b   : > { %v3046_v48 = vld [vmem:[%s4933_s10 + $0x10] sm:$0xff] }
 0xa1c   : > { %4239 = vmatpush3.bf16.msra.mxu1 %v2777_v47  ;;  %4321 = vmatpush3.bf16.msra.mxu0 %v3617_v53  ;;  %v7263_v44 = vpop.permute.xlu1 %3556  ;;  %v3049_v41 = vpack.c.bf16 %v3046_v48, %v3045_v22  ;;  %v3048_v53 = vld [vmem:[%s4933_s10 + $0x30] sm:$0xff] }
 0xa1d   : > { %4478 = vmatprep.subr.bf16.mxu1 %v2798_v56  ;;  %4322 = vmatprep.subr.bf16.mxu0 %v3626_v60  ;;  %v7235_v21 = vpop.permute.xlu0 %3578 }
 0xa1f   : > { %2883 = vmatmul.mubr.bf16.vlgmr.msra.gmra.mrb[28].mxu1 %v7222_v15  ;;  %2956 = vmatmul.mubr.bf16.gmra.mrb[36].mxu0 %v7227_v11 }
 0xa20   : > { %4479 = vmatpush3.bf16.msra.mxu1 %v2798_v56  ;;  %4323 = vmatpush3.bf16.msra.mxu0 %v3618_v40  ;;  %v7299_v1 = vpop.permute.xlu1 %3600 }
 0xa21   : > { %4480 = vmatprep.subr.bf16.mxu1 %v7001_v58  ;;  %4324 = vmatprep.subr.bf16.mxu0 %v3627_v14  ;;  %v7256_v32 = vpop.permute.xlu0 %3580 }
 0xa22   : > { %2890 = vmatprep.mubr.bf16.mxu1 %v7240_v36  ;;  %2963 = vmatprep.mubr.bf16.mxu0 %v7245_v2 }
 0xa24   : > { %4481 = vmatpush3.bf16.msra.mxu1 %v7001_v58  ;;  %4325 = vmatpush3.bf16.msra.mxu0 %v3619_v26  ;;  %v7292_v58 = vld [vmem:[%s7582_s6 + $0x84] ss:$20 sps:$4 sm:$0xff]   ;;  %v7327_v37 = vpop.permute.xlu1 %3592 }
 0xa25   : > { %4482 = vmatprep.subr.bf16.mxu1 %v2800_v0  ;;  %4326 = vmatprep.subr.bf16.mxu0 %v3628_v61  ;;  %v7282_v4 = vpop.permute.xlu0 %3550 }
 0xa27   : > { %2891 = vmatmul.mubr.bf16.gmra.mrb[32].mxu1 %v7268_v24  ;;  %2964 = vmatmul.mubr.bf16.gmra.mrb[40].mxu0 %v7273_v50 }
 0xa28   : > { %4483 = vmatpush3.bf16.msra.mxu1 %v2800_v0  ;;  %4327 = vmatpush3.bf16.msra.mxu0 %v3620_v6  ;;  %v3583_v29 = vpop.permute.xlu1 %3582  ;;  %v7696_v6 = vld [vmem:[#allocation7_spill] sm:$0xff] }
 0xa29   : > { %4328 = vmatprep.subr.bf16.mxu0 %v6961_v34  ;;  %v7302_v38 = vpop.permute.xlu0 %3586  ;;  %2898 = vmatprep.mubr.bf16.mxu1 %v7287_v54  ;;  %v7322_v34 = vld [vmem:[%s7582_s6 + $0x7c] ss:$20 sps:$4 sm:$0xff]   ;;  %v3639_v56 = vsel %vm1033_vm11, %v7256_v32, %v3583_v29 }
 0xa2a   : > { %2971 = vmatprep.mubr.bf16.mxu0 %v7292_v58 }
 0xa2c   : > { %4329 = vmatpush3.bf16.msra.mxu0 %v3621_v39  ;;  %v3561_v47 = vpop.permute.xlu1 %3560 }
 0xa2d   : > { %4330 = vmatprep.subr.bf16.mxu0 %v7050_v9  ;;  %v7325_v8 = vpop.permute.xlu0 %3554  ;;  %v7693_v9 = vld [vmem:[#allocation12_spill] sm:$0xff] }
 0xa2e   : > { %v3632_v32 = vsel %vm1033_vm11, %v7170_v63, %v7325_v8  ;;  %v4724_v63 = vld [vmem:[%s7583_s7 + $0x8] sm:$0xff]  }
 0xa2f   : > { %2899 = vmatmul.mubr.bf16.gmra.mrb[36].mxu1 %v7312_v62  ;;  %2972 = vmatmul.mubr.bf16.gmra.mrb[44].mxu0 %v7317_v51 }
 0xa30   : > { %4331 = vmatpush3.bf16.msra.mxu0 %v7015_v30  ;;  %2906 = vmatprep.mubr.bf16.mxu1 %v7322_v34  ;;  %v3636_v30 = vsel %vm1033_vm11, %v7056_v45, %v7173_v10  ;;  %v3637_v45 = vsel %vm1033_vm11, %v7190_v18, %v7092_v27  ;;  %v7694_v27 = vld [vmem:[#allocation11_spill] sm:$0xff]  ;;  %v3605_v60 = vpop.permute.xlu1 %3604 }
 0xa31   : > { %4332 = vmatprep.subr.bf16.mxu0 %v3631_v52  ;;  %v3591_v28 = vpop.permute.xlu0 %3590  ;;  %3716 = vmatprep.mubr.bf16.mxu0 %v7693_v9  ;;  %v3638_v18 = vsel %vm1033_vm11, %v7694_v27, %v7235_v21  ;;  %v7393_v21 = vld [vmem:[%s7582_s6 + $0x88] ss:$20 sps:$4 sm:$0xff]  }
 0xa32   : > { %v3881_v9 = vld [vmem:[%s4933_s10 + $0x28] sm:$0xff] }
 0xa34   : > { %4333 = vmatpush3.bf16.msra.mxu0 %v3623_v35  ;;  %v3597_v14 = vpop.permute.xlu1 %3596  ;;  %v3882_v35 = vld [vmem:[%s4933_s10 + $0x38] sm:$0xff] }
 0xa35   : > { %4358 = vmatprep.subr.bf16.mxu0 %v3636_v30  ;;  %v3559_v31 = vpop.permute.xlu0 %3558 }
 0xa36   : > { %v3633_v26 = vsel %vm1033_vm11, %v7263_v44, %v3559_v31 }
 0xa37   : > { %2907 = vmatmul.mubr.bf16.gmra.mrb[40].mxu1 %v7342_v16  ;;  %3717 = vmatmul.mubr.bf16.vlgmr.msra.gmra.mrb[48].mxu0 %v7222_v15 }
 0xa38   : > { %4359 = vmatpush3.bf16.msra.mxu0 %v7083_v43  ;;  %4486 = vmatprep.mubr.msk.bf16.mxu1 %vm1688_vm12, %v7350_v13  ;;  %v7370_v43 = vld [vmem:[%s7582_s6 + $0x38] ss:$20 sps:$4 sm:$0xff]   ;;  %v3565_v0 = vpop.permute.xlu1 %3564 }
 0xa39   : > { %4360 = vmatprep.subr.bf16.mxu0 %v3637_v45  ;;  %v2769_v10 = vpop.permute.xlu0 %2768  ;;  %3724 = vmatprep.mubr.bf16.mxu0 %v7240_v36  ;;  %v3640_v36 = vsel %vm1033_vm11, %v7153_v59, %v7302_v38  ;;  %v3641_v59 = vsel %vm1033_vm11, %v7200_v3, %v3591_v28  ;;  %v4726_v38 = vld [vmem:[%s7583_s7 + $0x18] sm:$0xff]  }
 0xa3a   : > { %v2801_v19 = vsel %vm1033_vm11, %v7072_v33, %v2769_v10  ;;  %v3050_v33 = vpack.c.bf16 %v3048_v53, %v3047_v17 }
 0xa3b   : > { %4484 = vmatprep.subr.bf16.mxu1 %v2801_v19 }
 0xa3c   : > { %4485 = vmatpush3.bf16.msra.mxu1 %v2801_v19  ;;  %4361 = vmatpush3.bf16.msra.mxu0 %v7210_v57  ;;  %v7695_v57 = vld [vmem:[#allocation19_spill] sm:$0xff]  ;;  %v7697_v19 = vld [vmem:[#allocation13_spill] sm:$0xff] }
 0xa3d   : > { %4362 = vmatprep.subr.bf16.mxu0 %v3638_v18  ;;  %v3603_v15 = vpop.permute.xlu0 %3602  ;;  %4494 = vmatprep.subr.bf16.mxu1 %v3049_v41 }
 0xa3e   : > { %v3644_v12 = vsel %vm1033_vm11, %v7299_v1, %v3603_v15  ;;  %v3609_v1 = vpop.permute.xlu1 %3608 }
 0xa3f   : > { %4487 = vmatmul.mubr.msk.bf16.vlgmr.msra.gmra.mrb[44].mxu1 %vm1688_vm12, %v7370_v43  ;;  %3725 = vmatmul.mubr.bf16.gmra.mrb[52].mxu0 %v7268_v24 }
 0xa40   : > { %4495 = vmatpush3.bf16.msra.mxu1 %v3049_v41  ;;  %4363 = vmatpush3.bf16.msra.mxu0 %v7695_v57 }
 0xa41   : > { %4364 = vmatprep.subr.bf16.mxu0 %v3639_v56  ;;  %v3595_v7 = vpop.permute.xlu0 %3594  ;;  %4496 = vmatprep.subr.bf16.mxu1 %v3050_v33 }
 0xa42   : > { %4490 = vmatprep.mubr.msk.bf16.mxu1 %vm1688_vm12, %v7379_v20  ;;  %3732 = vmatprep.mubr.bf16.mxu0 %v7287_v54  ;;  %v3642_v24 = vsel %vm1033_vm11, %v7327_v37, %v3595_v7  ;;  %v3613_v8 = vpop.permute.xlu1 %3612 }
 0xa44   : > { %4497 = vmatpush3.bf16.msra.mxu1 %v3050_v33  ;;  %4365 = vmatpush3.bf16.msra.mxu0 %v7282_v4 }
 0xa45   : > { %4366 = vmatprep.subr.bf16.mxu0 %v3640_v36  ;;  %4506 = vmatprep.subr.bf16.mxu1 %v3644_v12  ;;  %v3563_v40 = vpop.permute.xlu0 %3562 }
 0xa46   : > { %v3634_v61 = vsel %vm1033_vm11, %v3561_v47, %v3563_v40  ;;  %v7699_v40 = vld [vmem:[#allocation14_spill] sm:$0xff] }
 0xa47   : > { %4491 = vmatmul.mubr.msk.bf16.gmra.mrb[48].mxu1 %vm1688_vm12, %v7393_v21  ;;  %3733 = vmatmul.mubr.bf16.gmra.mrb[56].mxu0 %v7312_v62  ;;  %v3879_v62 = vld [vmem:[%s4933_s10 + $0x8] sm:$0xff] }
 0xa48   : > { %4367 = vmatpush3.bf16.msra.mxu0 %v3632_v32  ;;  %4498 = vmatprep.mubr.msk.bf16.mxu1 %vm398_vm0, %v7404_v55 }
 0xa49   : > { %4368 = vmatprep.subr.bf16.mxu0 %v3641_v59  ;;  %v3607_v46 = vpop.permute.xlu0 %3606  ;;  %3740 = vmatprep.mubr.bf16.mxu0 %v7322_v34  ;;  %v3880_v34 = vld [vmem:[%s4933_s10 + $0x18] sm:$0xff]  ;;  %s4107_s10 = sshll.u32 %s7705_s28, 7 }
 0xa4a   : > { %v3645_v44 = vsel %vm1033_vm11, %v3605_v60, %v3607_v46  ;;  %v3883_v28 = vpack.c.bf16 %v3880_v34, %v3879_v62  ;;  %v7700_v46 = vld [vmem:[#allocation15_spill] sm:$0xff]  ;;  %s7514_s24 = scalar_lea.vmem %s7584_s8, %s4107_s10 }
 0xa4c   : > { %4369 = vmatpush3.bf16.msra.mxu0 %v3633_v26 }
 0xa4d   : > { %4370 = vmatprep.subr.bf16.mxu0 %v3642_v24  ;;  %v3599_v3 = vpop.permute.xlu0 %3598 }
 0xa4e   : > { %v3643_v4 = vsel %vm1033_vm11, %v3597_v14, %v3599_v3 }
 0xa4f   : > { %4499 = vmatmul.mubr.msk.bf16.vlgmr.msra.gmra.mrb[44].mxu1 %vm398_vm0, %v4724_v63  ;;  %3741 = vmatmul.mubr.bf16.gmra.mrb[60].mxu0 %v7342_v16 }
 0xa50   : > { %4507 = vmatpush3.bf16.msra.mxu1 %v3644_v12  ;;  %4371 = vmatpush3.bf16.msra.mxu0 %v3634_v61 }
 0xa51   : > { %4508 = vmatprep.subr.bf16.mxu1 %v3645_v44  ;;  %4372 = vmatprep.subr.bf16.mxu0 %v3643_v4  ;;  %v3567_v54 = vpop.permute.xlu0 %3566 }
 0xa52   : > { %v3635_v42 = vsel %vm1033_vm11, %v3565_v0, %v3567_v54  ;;  %4502 = vmatprep.mubr.msk.bf16.mxu1 %vm398_vm0, %v4725_v49  ;;  %3781 = vmatprep.mubr.bf16.mxu0 %v7696_v6 }
 0xa54   : > { %4509 = vmatpush3.bf16.msra.mxu1 %v3645_v44  ;;  %4373 = vmatpush3.bf16.msra.mxu0 %v3635_v42 }
 0xa55   : > { %v3611_v5 = vpop.permute.xlu0 %3610 }
 0xa56   : > { %v3646_v39 = vsel %vm1033_vm11, %v3609_v1, %v3611_v5 }
 0xa57   : > { %4503 = vmatmul.mubr.msk.bf16.gmra.mrb[48].mxu1 %vm398_vm0, %v4726_v38  ;;  %3782 = vmatmul.mubr.bf16.vlgmr.msra.gmra.mrb[64].mxu0 %v7182_v23  ;;  %v3884_v23 = vpack.c.bf16 %v3882_v35, %v3881_v9 }
 0xa58   : > { %4510 = vmatprep.subr.bf16.mxu1 %v3646_v39  ;;  %3789 = vmatprep.mubr.bf16.mxu0 %v7195_v25 }
 0xa59   : > { %4511 = vmatpush3.bf16.msra.mxu1 %v3646_v39  ;;  %v3615_v37 = vpop.permute.xlu0 %3614  ;;  %4514 = vmatprep.mubr.msk.bf16.mxu1 %vm1688_vm12, %v7350_v13 }
 0xa5a   : > { %v3647_v52 = vsel %vm1033_vm11, %v3613_v8, %v3615_v37  ;;  %v7702_v8 = vld [vmem:[#allocation16_spill] sm:$0xff] }
 0xa5b   : > { %4512 = vmatprep.subr.bf16.mxu1 %v3647_v52 }
 0xa5d   : > { %4513 = vmatpush3.bf16.msra.mxu1 %v3647_v52 }
 0xa5e   : > { %4522 = vmatprep.subr.bf16.mxu1 %v3883_v28 }
 0xa5f   : > { %3790 = vmatmul.mubr.bf16.gmra.mrb[68].mxu0 %v7227_v11 }
 0xa60   : > { %4515 = vmatmul.mubr.msk.bf16.vlgmr.msra.gmra.mrb[52].mxu1 %vm1688_vm12, %v7370_v43  ;;  %3797 = vmatprep.mubr.bf16.mxu0 %v7245_v2  ;;  %v7698_v43 = vld [vmem:[#allocation22_spill] sm:$0xff] }
 0xa61   : > { %4518 = vmatprep.mubr.msk.bf16.mxu1 %vm1688_vm12, %v7379_v20  ;;  %4523 = vmatpush3.bf16.msra.mxu1 %v3883_v28 }
 0xa62   : > { %4524 = vmatprep.subr.bf16.mxu1 %v3884_v23 }
 0xa65   : > { %4525 = vmatpush3.bf16.msra.mxu1 %v3884_v23 }
 0xa67   : > { %3798 = vmatmul.mubr.bf16.gmra.mrb[72].mxu0 %v7273_v50 }
 0xa68   : > { %4519 = vmatmul.mubr.msk.bf16.gmra.mrb[56].mxu1 %vm1688_vm12, %v7393_v21  ;;  %3805 = vmatprep.mubr.bf16.mxu0 %v7292_v58 }
 0xa69   : > { %4526 = vmatprep.mubr.msk.bf16.mxu1 %vm398_vm0, %v7404_v55 }
 0xa6f   : > { %3806 = vmatmul.mubr.bf16.gmra.mrb[76].mxu0 %v7317_v51 }
 0xa70   : > { %4527 = vmatmul.mubr.msk.bf16.vlgmr.msra.gmra.mrb[52].mxu1 %vm398_vm0, %v4724_v63 }
 0xa71   : > { %4530 = vmatprep.mubr.msk.bf16.mxu1 %vm398_vm0, %v4725_v49 }
 0xa78   : > { %4531 = vmatmul.mubr.msk.bf16.gmra.mrb[56].mxu1 %vm398_vm0, %v4726_v38  ;;  %v7701_v38 = vld [vmem:[#allocation24_spill] sm:$0xff] }
 0xaea   : > { %v4280_v25 = vpop.f32.mrb[32].mxu0 }
 0xaeb   : > { %v4281_v11 = vpop.f32.mrb[33].mxu0 }
 0xaec   : > { %v4282_v2 = vadd.f32 %v4281_v11, %v4280_v25  ;;  %v4283_v50 = vpop.f32.mrb[34].mxu0 }
 0xaed   : > { %v4284_v16 = vpop.f32.mrb[35].mxu0 }
 0xaee   : > { %v4285_v30 = vadd.f32 %v4284_v16, %v4283_v50 }
 0xaf2   : > { %v4240_v13 = vpop.f32.mrb[28].mxu1  ;;  %v4286_v29 = vpop.f32.mrb[36].mxu0 }
 0xaf3   : > { %v4241_v58 = vpop.f32.mrb[29].mxu1  ;;  %v4287_v31 = vpop.f32.mrb[37].mxu0 }
 0xaf4   : > { %v4242_v22 = vadd.f32 %v4241_v58, %v4240_v13  ;;  %v4243_v48 = vpop.f32.mrb[30].mxu1  ;;  %v4288_v45 = vadd.f32 %v4287_v31, %v4286_v29  ;;  %v4289_v51 = vpop.f32.mrb[38].mxu0  ;;  %v7703_v13 = vld [vmem:[#allocation26_spill] sm:$0xff] }
 0xaf5   : > { %v4244_v10 = vpop.f32.mrb[31].mxu1  ;;  %v4290_v41 = vpop.f32.mrb[39].mxu0 }
 0xaf6   : > { %v2885_v17 = vadd.f32 %v4242_v22, %v7697_v19  ;;  %v4245_v53 = vadd.f32 %v4244_v10, %v4243_v48  ;;  %v4291_v47 = vadd.f32 %v4290_v41, %v4289_v51  ;;  %v7484_v22 = vpop.permute.xlu1 %2523 }
 0xaf8   : > { %v2888_v27 = vadd.f32 %v4245_v53, %v7698_v43  ;;  %v7467_v18 = vadd.f32 %v4282_v2, %v2885_v17 }
 0xafa   : > { %v7469_v15 = vadd.f32 %v4285_v30, %v2888_v27  ;;  %v4246_v33 = vpop.f32.mrb[32].mxu1  ;;  %v4292_v20 = vpop.f32.mrb[40].mxu0 }
 0xafb   : > { %v4247_v57 = vpop.f32.mrb[33].mxu1  ;;  %v4293_v56 = vpop.f32.mrb[41].mxu0 }
 0xafc   : > { %v4248_v60 = vadd.f32 %v4247_v57, %v4246_v33  ;;  %v4249_v7 = vpop.f32.mrb[34].mxu1  ;;  %v4294_v21 = vadd.f32 %v4293_v56, %v4292_v20  ;;  %v4295_v36 = vpop.f32.mrb[42].mxu0 }
 0xafd   : > { %v4250_v12 = vpop.f32.mrb[35].mxu1  ;;  %v4296_v55 = vpop.f32.mrb[43].mxu0 }
 0xafe   : > { %v2893_v14 = vadd.f32 %v4248_v60, %v7699_v40  ;;  %v4251_v32 = vadd.f32 %v4250_v12, %v4249_v7  ;;  %v4297_v59 = vadd.f32 %v4296_v55, %v4295_v36  ;;  %v7491_v33 = vpop.permute.xlu1 %3058  ;;  %v7493_v20 = vpop.permute.xlu0 %3053 }
 0xb00   : > { %v2896_v26 = vadd.f32 %v4251_v32, %v7700_v46  ;;  %v2958_v63 = vadd.f32 %v4288_v45, %v2893_v14 }
 0xb02   : > { %v2961_v24 = vadd.f32 %v4291_v47, %v2896_v26  ;;  %v4252_v0 = vpop.f32.mrb[36].mxu1  ;;  %v4298_v3 = vpop.f32.mrb[44].mxu0  ;;  %v4560_v26 = vadd.f32 %v7493_v20, %v7467_v18 }
 0xb03   : > { %v4253_v49 = vpop.f32.mrb[37].mxu1  ;;  %v4299_v61 = vpop.f32.mrb[45].mxu0 }
 0xb04   : > { %v4254_v44 = vadd.f32 %v4253_v49, %v4252_v0  ;;  %v4255_v4 = vpop.f32.mrb[38].mxu1  ;;  %v4300_v54 = vadd.f32 %v4299_v61, %v4298_v3  ;;  %v4301_v42 = vpop.f32.mrb[46].mxu0 }
 0xb05   : > { %v4256_v6 = vpop.f32.mrb[39].mxu1  ;;  %v4302_v1 = vpop.f32.mrb[47].mxu0 }
 0xb06   : > { %v2901_v5 = vadd.f32 %v4254_v44, %v7701_v38  ;;  %v4257_v39 = vadd.f32 %v4256_v6, %v4255_v4  ;;  %v4303_v62 = vadd.f32 %v4302_v1, %v4301_v42  ;;  %v7495_v60 = vpop.permute.xlu1 %3063  ;;  %v7499_v36 = vpop.permute.xlu0 %3068  ;;  %v4564_v4 = vadd.f32 %v7491_v33, %v7469_v15 }
 0xb07   : > { %v4558_v14 = vadd.f32 %v7495_v60, %v2958_v63  ;;  %v4562_v49 = vadd.f32 %v7499_v36, %v2961_v24 }
 0xb08   : > { %v7474_v34 = vadd.f32 %v4294_v21, %v2901_v5  ;;  %v2904_v37 = vadd.f32 %v4257_v39, %v7702_v8 }
 0xb0a   : > { %v7477_v52 = vadd.f32 %v4297_v59, %v2904_v37  ;;  %v4258_v28 = vpop.f32.mrb[40].mxu1  ;;  %v4334_v9 = vpop.f32.mrb[48].mxu0 }
 0xb0b   : > { %v4259_v35 = vpop.f32.mrb[41].mxu1  ;;  %v4335_v23 = vpop.f32.mrb[49].mxu0 }
 0xb0c   : > { %v4260_v25 = vadd.f32 %v4259_v35, %v4258_v28  ;;  %v7479_v11 = vadd.f32 %v4335_v23, %v4334_v9  ;;  %v4337_v2 = vpop.f32.mrb[50].mxu0  ;;  %v4261_v50 = vpop.f32.mrb[42].mxu1 }
 0xb0d   : > { %v4338_v16 = vpop.f32.mrb[51].mxu0  ;;  %v4262_v30 = vpop.f32.mrb[43].mxu1 }
 0xb0e   : > { %v2909_v29 = vadd.f32 %v4260_v25, %v7703_v13  ;;  %v7482_v58 = vadd.f32 %v4338_v16, %v4337_v2  ;;  %v4263_v31 = vadd.f32 %v4262_v30, %v4261_v50  ;;  %v7505_v32 = vpop.permute.xlu1 %3073  ;;  %v7507_v59 = vpop.permute.xlu0 %3078  ;;  %v3719_v30 = vadd.f32 %v7479_v11, %v7697_v19 }
 0xb0f   : > { %v4568_v9 = vadd.f32 %v7505_v32, %v7474_v34 }
 0xb10   : > { %v2974_v48 = vadd.f32 %v4300_v54, %v2909_v29  ;;  %v2912_v45 = vadd.f32 %v4263_v31, %v7484_v22  ;;  %v4572_v29 = vadd.f32 %v7507_v59, %v7477_v52 }
 0xb12   : > { %v4340_v51 = vpop.f32.mrb[52].mxu0  ;;  %v2977_v10 = vadd.f32 %v4303_v62, %v2912_v45  ;;  %v7522_v62 = vpop.permute.xlu1 %3083 }
 0xb13   : > { %v4341_v41 = vpop.f32.mrb[53].mxu0  ;;  %v7528_v28 = vpop.permute.xlu0 %3088  ;;  %v4566_v15 = vadd.f32 %v7522_v62, %v2974_v48 }
 0xb14   : > { %v7487_v17 = vadd.f32 %v4341_v41, %v4340_v51  ;;  %v4343_v53 = vpop.f32.mrb[54].mxu0  ;;  %v4570_v25 = vadd.f32 %v7528_v28, %v2977_v10  ;;  %v3722_v10 = vadd.f32 %v7482_v58, %v7698_v43 }
 0xb15   : > { %v4344_v47 = vpop.f32.mrb[55].mxu0 }
 0xb16   : > { %v7489_v27 = vadd.f32 %v4344_v47, %v4343_v53 }
 0xb1a   : > { %v4346_v57 = vpop.f32.mrb[56].mxu0 }
 0xb1b   : > { %v4347_v56 = vpop.f32.mrb[57].mxu0 }
 0xb1c   : > { %v7497_v7 = vadd.f32 %v4347_v56, %v4346_v57  ;;  %v4349_v21 = vpop.f32.mrb[58].mxu0 }
 0xb1d   : > { %v4350_v12 = vpop.f32.mrb[59].mxu0 }
 0xb1e   : > { %v7501_v55 = vadd.f32 %v4350_v12, %v4349_v21  ;;  %v3727_v21 = vadd.f32 %v7487_v17, %v7699_v40 }
 0xb20   : > { %v3738_v40 = vadd.f32 %v7501_v55, %v7702_v8 }
 0xb22   : > { %v4500_v0 = vpop.f32.mrb[44].mxu1  ;;  %v4352_v3 = vpop.f32.mrb[60].mxu0 }
 0xb23   : > { %v4559_v61 = vadd.f32 %v4558_v14, %v4500_v0  ;;  %v3157_v63 = vpop.f32.mrb[45].mxu1  ;;  %v4353_v44 = vpop.f32.mrb[61].mxu0  ;;  %v3730_v0 = vadd.f32 %v7489_v27, %v7700_v46 }
 0xb24   : > { %v4561_v18 = vadd.f32 %v4560_v26, %v3157_v63  ;;  %v7519_v54 = vadd.f32 %v4353_v44, %v4352_v3  ;;  %v4501_v42 = vpop.f32.mrb[46].mxu1  ;;  %v4355_v6 = vpop.f32.mrb[62].mxu0  ;;  %v3735_v63 = vadd.f32 %v7497_v7, %v7701_v38 }
 0xb25   : > { %3198 = vst [vmem:[%s7514_s24 + $0x20] sm:$0xff] %v4559_v61  ;;  %v4563_v1 = vadd.f32 %v4562_v49, %v4501_v42  ;;  %v3160_v5 = vpop.f32.mrb[47].mxu1  ;;  %v4356_v39 = vpop.f32.mrb[63].mxu0 }
 0xb26   : > { %3196 = vst [vmem:[%s7514_s24] sm:$0xff] %v4561_v18  ;;  %v4565_v24 = vadd.f32 %v4564_v4, %v3160_v5  ;;  %v7525_v37 = vadd.f32 %v4356_v39, %v4355_v6  ;;  %v3743_v38 = vadd.f32 %v7519_v54, %v7703_v13 }
 0xb27   : > { %3199 = vst [vmem:[%s7514_s24 + $0x30] sm:$0xff] %v4563_v1 }
 0xb28   : > { %3197 = vst [vmem:[%s7514_s24 + $0x10] sm:$0xff] %v4565_v24 }
 0xb2a   : > { %v4504_v35 = vpop.f32.mrb[48].mxu1  ;;  %v4374_v23 = vpop.f32.mrb[64].mxu0 }
 0xb2b   : > { %v4567_v2 = vadd.f32 %v4566_v15, %v4504_v35  ;;  %v3173_v50 = vpop.f32.mrb[49].mxu1  ;;  %v4375_v16 = vpop.f32.mrb[65].mxu0 }
 0xb2c   : > { %v4569_v31 = vadd.f32 %v4568_v9, %v3173_v50  ;;  %v4376_v48 = vadd.f32 %v4375_v16, %v4374_v23  ;;  %v4505_v45 = vpop.f32.mrb[50].mxu1  ;;  %v4377_v34 = vpop.f32.mrb[66].mxu0 }
 0xb2d   : > { %3202 = vst [vmem:[%s7514_s24 + $0x60] sm:$0xff] %v4567_v2  ;;  %v4571_v51 = vadd.f32 %v4570_v25, %v4505_v45  ;;  %v3176_v41 = vpop.f32.mrb[51].mxu1  ;;  %v4378_v53 = vpop.f32.mrb[67].mxu0 }
 0xb2e   : > { %3200 = vst [vmem:[%s7514_s24 + $0x40] sm:$0xff] %v4569_v31  ;;  %v3784_v47 = vadd.f32 %v4376_v48, %v3719_v30  ;;  %v4573_v57 = vadd.f32 %v4572_v29, %v3176_v41  ;;  %v4379_v56 = vadd.f32 %v4378_v53, %v4377_v34 }
 0xb2f   : > { %3203 = vst [vmem:[%s7514_s24 + $0x70] sm:$0xff] %v4571_v51 }
 0xb30   : > { %3201 = vst [vmem:[%s7514_s24 + $0x50] sm:$0xff] %v4573_v57  ;;  %v3787_v19 = vadd.f32 %v4379_v56, %v3722_v10  ;;  %v4576_v39 = vadd.f32 %v3784_v47, %v7493_v20  ;;  %v3746_v20 = vadd.f32 %v7525_v37, %v7484_v22 }
 0xb32   : > { %v4380_v11 = vpop.f32.mrb[68].mxu0 }
 0xb33   : > { %v4381_v52 = vpop.f32.mrb[69].mxu0 }
 0xb34   : > { %v4382_v12 = vadd.f32 %v4381_v52, %v4380_v11  ;;  %v4383_v14 = vpop.f32.mrb[70].mxu0 }
 0xb35   : > { %v4384_v26 = vpop.f32.mrb[71].mxu0 }
 0xb36   : > { %v3792_v3 = vadd.f32 %v4382_v12, %v3727_v21  ;;  %v4385_v43 = vadd.f32 %v4384_v26, %v4383_v14 }
 0xb38   : > { %v3795_v58 = vadd.f32 %v4385_v43, %v3730_v0  ;;  %v4574_v46 = vadd.f32 %v3792_v3, %v7495_v60  ;;  %v4580_v60 = vadd.f32 %v3787_v19, %v7491_v33 }
 0xb3a   : > { %v4386_v49 = vpop.f32.mrb[72].mxu0  ;;  %v4578_v55 = vadd.f32 %v3795_v58, %v7499_v36 }
 0xb3b   : > { %v4387_v61 = vpop.f32.mrb[73].mxu0 }
 0xb3c   : > { %v4388_v44 = vadd.f32 %v4387_v61, %v4386_v49  ;;  %v4389_v4 = vpop.f32.mrb[74].mxu0 }
 0xb3d   : > { %v4390_v18 = vpop.f32.mrb[75].mxu0 }
 0xb3e   : > { %v3800_v17 = vadd.f32 %v4388_v44, %v3735_v63  ;;  %v4391_v42 = vadd.f32 %v4390_v18, %v4389_v4 }
 0xb40   : > { %v3803_v6 = vadd.f32 %v4391_v42, %v3738_v40  ;;  %v4584_v22 = vadd.f32 %v3800_v17, %v7505_v32 }
 0xb42   : > { %v4392_v1 = vpop.f32.mrb[76].mxu0  ;;  %v4588_v45 = vadd.f32 %v3803_v6, %v7507_v59 }
 0xb43   : > { %v4528_v27 = vpop.f32.mrb[52].mxu1  ;;  %v4393_v5 = vpop.f32.mrb[77].mxu0 }
 0xb44   : > { %v4575_v7 = vadd.f32 %v4574_v46, %v4528_v27  ;;  %v4394_v24 = vadd.f32 %v4393_v5, %v4392_v1  ;;  %v3919_v15 = vpop.f32.mrb[53].mxu1  ;;  %v4395_v8 = vpop.f32.mrb[78].mxu0 }
 0xb45   : > { %v4577_v9 = vadd.f32 %v4576_v39, %v3919_v15  ;;  %v4529_v35 = vpop.f32.mrb[54].mxu1  ;;  %v4396_v23 = vpop.f32.mrb[79].mxu0 }
 0xb46   : > { %3960 = vst [vmem:[%s7514_s24 + $0x28] sm:$0xff] %v4575_v7  ;;  %v3808_v25 = vadd.f32 %v4394_v24, %v3743_v38  ;;  %v4579_v13 = vadd.f32 %v4578_v55, %v4529_v35  ;;  %v4397_v54 = vadd.f32 %v4396_v23, %v4395_v8  ;;  %v3922_v2 = vpop.f32.mrb[55].mxu1 }
 0xb47   : > { %3958 = vst [vmem:[%s7514_s24 + $0x8] sm:$0xff] %v4577_v9  ;;  %v4581_v50 = vadd.f32 %v4580_v60, %v3922_v2 }
 0xb48   : > { %3961 = vst [vmem:[%s7514_s24 + $0x38] sm:$0xff] %v4579_v13  ;;  %v3811_v36 = vadd.f32 %v4397_v54, %v3746_v20  ;;  %v4582_v16 = vadd.f32 %v3808_v25, %v7522_v62 }
 0xb49   : > { %3959 = vst [vmem:[%s7514_s24 + $0x18] sm:$0xff] %v4581_v50 }
 0xb4a   : > { %v4586_v33 = vadd.f32 %v3811_v36, %v7528_v28 }
 0xb4b   : > { %v4532_v30 = vpop.f32.mrb[56].mxu1 }
 0xb4c   : > { %v4583_v37 = vadd.f32 %v4582_v16, %v4532_v30  ;;  %v3935_v29 = vpop.f32.mrb[57].mxu1 }
 0xb4d   : > { %v4585_v31 = vadd.f32 %v4584_v22, %v3935_v29  ;;  %v4533_v48 = vpop.f32.mrb[58].mxu1 }
 0xb4e   : > { %3964 = vst [vmem:[%s7514_s24 + $0x68] sm:$0xff] %v4583_v37  ;;  %v4587_v34 = vadd.f32 %v4586_v33, %v4533_v48  ;;  %v3938_v51 = vpop.f32.mrb[59].mxu1 }
 0xb4f   : > { %3962 = vst [vmem:[%s7514_s24 + $0x48] sm:$0xff] %v4585_v31  ;;  %v4589_v41 = vadd.f32 %v4588_v45, %v3938_v51 }
 0xb50   : > { %3965 = vst [vmem:[%s7514_s24 + $0x78] sm:$0xff] %v4587_v34 }
 0xb51   : > { %3963 = vst [vmem:[%s7514_s24 + $0x58] sm:$0xff] %v4589_v41 }
 0xb52 PF: > { %s18_s27 = sadd.s32 1, %s4854_s27  }
 0xb53   : > { %p15_p4 = scmp.ge.s32.totalorder %s18_s27, 4  }
 0xb55   :  { %17 = sbr.rel (!%p15_p4) target bundleno = 1 (0x1), region = 82 }

</bundles_post_ra>
